<compile_context>
chip_gen: v7x
topology: tpu7x:2x2x1
jax: 0.10.0
libtpu: 0.0.40
codegen_flags: <defaults>
</compile_context>

<pallas_src>
import math
import jax
import jax.numpy as jnp
from jax.experimental import pallas as pl
from jax.experimental.pallas import tpu as pltpu


# ----------------------------------------------------------------------------
# Kernel: both modalities, all layers, both directions.  All refs are whole
# arrays resident in VMEM (no grid).  PyTorch gate order per direction: i,f,g,o.
# Fused gate column layout (width 8H): [i_f|i_b|f_f|f_b|g_f|g_b|o_f|o_b].
# ----------------------------------------------------------------------------
def _make_dual_bilstm_kernel(num_layers, B, T, Ha, Hv):

    def fused_cell(gates, c, H2):
        # H2 = 2*H: one call covers both directions.
        i = jax.nn.sigmoid(gates[:, 0:H2])
        f = jax.nn.sigmoid(gates[:, H2:2 * H2])
        g = jnp.tanh(gates[:, 2 * H2:3 * H2])
        o = jax.nn.sigmoid(gates[:, 3 * H2:4 * H2])
        c_new = f * c + i * g
        h_new = o * jnp.tanh(c_new)
        return h_new, c_new

    def kernel(*refs):
        xa_ref, xv_ref, ma_ref, mv_ref = refs[0:4]
        wa = refs[4:4 + 3 * num_layers]
        wv = refs[4 + 3 * num_layers:4 + 6 * num_layers]
        oa_ref = refs[4 + 6 * num_layers]
        ov_ref = refs[5 + 6 * num_layers]

        # fwd-column masks (True where a gate column belongs to the forward
        # direction), hoisted once for the whole kernel.
        mask_a = ma_ref[...] > 0.5          # (1, 8Ha) bool
        mask_v = mv_ref[...] > 0.5          # (1, 8Hv) bool

        # (t, b)-major activations, rows = t*B + b.
        cur_a = xa_ref[...].astype(jnp.float32)   # (T*B, Da)
        cur_v = xv_ref[...].astype(jnp.float32)   # (T*B, Dv)

        for layer in range(num_layers):
            wih_a, whh_a_ref, b_a = wa[3 * layer:3 * layer + 3]
            wih_v, whh_v_ref, b_v = wv[3 * layer:3 * layer + 3]

            # Hoisted, time-independent input projections (+ combined bias):
            # one GEMM over all T*B rows, both directions at once.
            gx_a = jnp.dot(cur_a, wih_a[...],
                           preferred_element_type=jnp.float32) + b_a[...]
            gx_v = jnp.dot(cur_v, wih_v[...],
                           preferred_element_type=jnp.float32) + b_v[...]

            # Hoist recurrent weights above the time loop.
            whh_a = whh_a_ref[...]          # (2Ha, 8Ha) block-diagonal
            whh_v = whh_v_ref[...]          # (2Hv, 8Hv) block-diagonal

            h_a = jnp.zeros((B, 2 * Ha), jnp.float32)
            c_a = jnp.zeros((B, 2 * Ha), jnp.float32)
            h_v = jnp.zeros((B, 2 * Hv), jnp.float32)
            c_v = jnp.zeros((B, 2 * Hv), jnp.float32)

            for k in range(T):              # static unroll (T is small)
                tb = T - 1 - k              # reversed time for the bwd dir

                # ---- audio step: fwd cols read time k, bwd cols read tb ----
                gin_a = jnp.where(mask_a,
                                  gx_a[k * B:(k + 1) * B, :],
                                  gx_a[tb * B:(tb + 1) * B, :])
                rec_a = jnp.dot(h_a, whh_a,
                                preferred_element_type=jnp.float32)
                h_a, c_a = fused_cell(gin_a + rec_a, c_a, 2 * Ha)

                # ---- visual step, interleaved to fill latency bubbles ----
                gin_v = jnp.where(mask_v,
                                  gx_v[k * B:(k + 1) * B, :],
                                  gx_v[tb * B:(tb + 1) * B, :])
                rec_v = jnp.dot(h_v, whh_v,
                                preferred_element_type=jnp.float32)
                h_v, c_v = fused_cell(gin_v + rec_v, c_v, 2 * Hv)

                # Contiguous slab stores in source-time order; the output refs
                # double as the inter-layer activation buffers.
                oa_ref[k * B:(k + 1) * B, 0:Ha] = h_a[:, 0:Ha]
                oa_ref[tb * B:(tb + 1) * B, Ha:2 * Ha] = h_a[:, Ha:2 * Ha]
                ov_ref[k * B:(k + 1) * B, 0:Hv] = h_v[:, 0:Hv]
                ov_ref[tb * B:(tb + 1) * B, Hv:2 * Hv] = h_v[:, Hv:2 * Hv]

            if layer + 1 < num_layers:
                cur_a = oa_ref[...]         # (T*B, 2Ha), [h_f | h_b] per row
                cur_v = ov_ref[...]

    return kernel


def _fwd_col_mask(H):
    """(1, 8H) f32 mask: 1.0 on forward-direction gate columns."""
    vals = [1.0 if (j % (2 * H)) < H else 0.0 for j in range(8 * H)]
    return jnp.asarray(vals, jnp.float32).reshape(1, 8 * H)


# ----------------------------------------------------------------------------
# RNNEncoder forward: both bidirectional LSTMs in one fused kernel.
# Inputs/outputs are batch-first (B, T, D), like nn.LSTM(batch_first=True).
# ----------------------------------------------------------------------------
@jax.jit
def rnn_encoder_forward(audio_feature, visual_feature, audio_packed, visual_packed):
    B, T, Da = audio_feature.shape
    Bv, Tv, Dv = visual_feature.shape
    assert (B, T) == (Bv, Tv)
    assert len(audio_packed) == len(visual_packed)
    num_layers = len(audio_packed)
    Ha = audio_packed[0][1].shape[0] // 2
    Hv = visual_packed[0][1].shape[0] // 2

    # (t, b)-major 2-D activations for the kernel (one tiny XLA transpose).
    xa = jnp.swapaxes(audio_feature, 0, 1).reshape(T * B, Da)
    xv = jnp.swapaxes(visual_feature, 0, 1).reshape(T * B, Dv)

    flat_w = []
    for (wih, whh, b) in audio_packed:
        flat_w += [wih, whh, b]
    for (wih, whh, b) in visual_packed:
        flat_w += [wih, whh, b]

    vmem = pl.BlockSpec(memory_space=pltpu.MemorySpace.VMEM)
    kernel = _make_dual_bilstm_kernel(num_layers, B, T, Ha, Hv)
    out_a, out_v = pl.pallas_call(
        kernel,
        out_shape=(jax.ShapeDtypeStruct((T * B, 2 * Ha), jnp.float32),
                   jax.ShapeDtypeStruct((T * B, 2 * Hv), jnp.float32)),
        in_specs=[vmem] * (4 + len(flat_w)),
        out_specs=(vmem, vmem),
    )(xa, xv, _fwd_col_mask(Ha), _fwd_col_mask(Hv), *flat_w)

    audio_out = jnp.swapaxes(out_a.reshape(T, B, 2 * Ha), 0, 1)   # (B, T, 2Ha)
    video_out = jnp.swapaxes(out_v.reshape(T, B, 2 * Hv), 0, 1)   # (B, T, 2Hv)
    return audio_out, video_out


# ----------------------------------------------------------------------------
# Parameter init (PyTorch-style U(-1/sqrt(H), 1/sqrt(H))) and packing.
# ----------------------------------------------------------------------------
def init_lstm_params(key, input_size, hidden_size, num_layers):
    """Raw nn.LSTM-style params: list over layers of dicts 'fwd'/'bwd' ->
    (w_ih (4H, Din_l), w_hh (4H, H), b_ih (4H,), b_hh (4H,))."""
    params = []
    bound = 1.0 / math.sqrt(hidden_size)
    for layer in range(num_layers):
        layer_in = input_size if layer == 0 else 2 * hidden_size
        layer_p = {}
        for dirname in ("fwd", "bwd"):
            key, k1, k2, k3, k4 = jax.random.split(key, 5)
            w_ih = jax.random.uniform(k1, (4 * hidden_size, layer_in),
                                      jnp.float32, -bound, bound)
            w_hh = jax.random.uniform(k2, (4 * hidden_size, hidden_size),
                                      jnp.float32, -bound, bound)
            b_ih = jax.random.uniform(k3, (4 * hidden_size,),
                                      jnp.float32, -bound, bound)
            b_hh = jax.random.uniform(k4, (4 * hidden_size,),
                                      jnp.float32, -bound, bound)
            layer_p[dirname] = (w_ih, w_hh, b_ih, b_hh)
        params.append(layer_p)
    return params, key


def pack_lstm_params(raw_params, hidden_size):
    """Pack raw params into the fused-kernel layout.

    Gate column order (width 8H): [i_f|i_b|f_f|f_b|g_f|g_b|o_f|o_b], H each.
      wih  (Din_l, 8H): input projection for both directions.
      whh  (2H, 8H):    block-diagonal recurrent weights; rows [0:H] = fwd h,
                        rows [H:2H] = bwd h.
      bias (1, 8H):     b_ih + b_hh per direction/gate.
    """
    H = hidden_size
    packed = []
    for lp in raw_params:
        w_ih_f, w_hh_f, b_ih_f, b_hh_f = lp["fwd"]
        w_ih_b, w_hh_b, b_ih_b, b_hh_b = lp["bwd"]
        zH = jnp.zeros((H, H), jnp.float32)
        wih_cols, whh_cols, b_cols = [], [], []
        for gi in range(4):                       # i, f, g, o
            sl = slice(gi * H, (gi + 1) * H)
            wih_cols += [w_ih_f[sl].T, w_ih_b[sl].T]
            whh_cols += [jnp.concatenate([w_hh_f[sl].T, zH], axis=0),
                         jnp.concatenate([zH, w_hh_b[sl].T], axis=0)]
            b_cols += [b_ih_f[sl] + b_hh_f[sl], b_ih_b[sl] + b_hh_b[sl]]
        wih = jnp.concatenate(wih_cols, axis=1)           # (Din_l, 8H)
        whh = jnp.concatenate(whh_cols, axis=1)           # (2H, 8H)
        bias = jnp.concatenate(b_cols).reshape(1, 8 * H)  # (1, 8H)
        packed.append((wih, whh, bias))
    return packed


# ----------------------------------------------------------------------------
# Pure-JAX reference (nn.LSTM eval semantics) for the correctness check.
# ----------------------------------------------------------------------------
def _lstm_ref_bidir(x, raw_params, H):
    def run_dir(xin, w_ih, w_hh, b_ih, b_hh, reverse):
        B = xin.shape[0]
        xs = jnp.swapaxes(xin, 0, 1)
        if reverse:
            xs = xs[::-1]

        def step(carry, x_t):
            h, c = carry
            g = x_t @ w_ih.T + h @ w_hh.T + b_ih + b_hh
            i = jax.nn.sigmoid(g[:, :H])
            f = jax.nn.sigmoid(g[:, H:2 * H])
            gg = jnp.tanh(g[:, 2 * H:3 * H])
            o = jax.nn.sigmoid(g[:, 3 * H:])
            c2 = f * c + i * gg
            h2 = o * jnp.tanh(c2)
            return (h2, c2), h2

        init = (jnp.zeros((B, H), jnp.float32), jnp.zeros((B, H), jnp.float32))
        _, ys = jax.lax.scan(step, init, xs)
        if reverse:
            ys = ys[::-1]
        return jnp.swapaxes(ys, 0, 1)

    cur = x
    for lp in raw_params:
        yf = run_dir(cur, *lp["fwd"], reverse=False)
        yb = run_dir(cur, *lp["bwd"], reverse=True)
        cur = jnp.concatenate([yf, yb], axis=-1)
    return cur


if __name__ == "__main__":
    B, T = 2, 8
    audio_dim, video_dim = 24, 40
    d_model, num_layers = 32, 2

    key = jax.random.PRNGKey(0)
    key, ka, kv = jax.random.split(key, 3)
    audio_feature = jax.random.normal(ka, (B, T, audio_dim), jnp.float32)
    visual_feature = jax.random.normal(kv, (B, T, video_dim), jnp.float32)

    # audio_rnn: LSTM(audio_dim, d_model//2, bidirectional) -> out dim d_model
    audio_raw, key = init_lstm_params(key, audio_dim, d_model // 2, num_layers)
    # visual_rnn: LSTM(video_dim, d_model, bidirectional)   -> out dim 2*d_model
    visual_raw, key = init_lstm_params(key, video_dim, d_model, num_layers)

    audio_packed = pack_lstm_params(audio_raw, d_model // 2)
    visual_packed = pack_lstm_params(visual_raw, d_model)

    audio_out, video_out = rnn_encoder_forward(
        audio_feature, visual_feature, audio_packed, visual_packed)
    jax.block_until_ready((audio_out, video_out))

    assert audio_out.shape == (B, T, d_model)
    assert video_out.shape == (B, T, 2 * d_model)

    # correctness check against the pure-JAX reference
    audio_ref = _lstm_ref_bidir(audio_feature, audio_raw, d_model // 2)
    video_ref = _lstm_ref_bidir(visual_feature, visual_raw, d_model)
    a_err = float(jnp.max(jnp.abs(audio_out - audio_ref)))
    v_err = float(jnp.max(jnp.abs(video_out - video_ref)))
    assert a_err < 2e-3 and v_err < 2e-3, (a_err, v_err)

    print("KERNEL_OK")
</pallas_src>

<mosaic_0001>
module attributes {stable_mosaic.version = 11 : i64} {
  func.func @kernel(%arg0: memref<16x24xf32, #tpu.memory_space<vmem>>, %arg1: memref<16x40xf32, #tpu.memory_space<vmem>>, %arg2: memref<1x128xf32, #tpu.memory_space<vmem>>, %arg3: memref<1x256xf32, #tpu.memory_space<vmem>>, %arg4: memref<24x128xf32, #tpu.memory_space<vmem>>, %arg5: memref<32x128xf32, #tpu.memory_space<vmem>>, %arg6: memref<1x128xf32, #tpu.memory_space<vmem>>, %arg7: memref<32x128xf32, #tpu.memory_space<vmem>>, %arg8: memref<32x128xf32, #tpu.memory_space<vmem>>, %arg9: memref<1x128xf32, #tpu.memory_space<vmem>>, %arg10: memref<40x256xf32, #tpu.memory_space<vmem>>, %arg11: memref<64x256xf32, #tpu.memory_space<vmem>>, %arg12: memref<1x256xf32, #tpu.memory_space<vmem>>, %arg13: memref<64x256xf32, #tpu.memory_space<vmem>>, %arg14: memref<64x256xf32, #tpu.memory_space<vmem>>, %arg15: memref<1x256xf32, #tpu.memory_space<vmem>>, %arg16: memref<16x32xf32, #tpu.memory_space<vmem>>, %arg17: memref<16x64xf32, #tpu.memory_space<vmem>>) attributes {dimension_semantics = [], scalar_prefetch = 0 : i64, scratch_operands = 0 : i64, tpu.core_type = #tpu.core_type<tc>} {
    %c0 = arith.constant 0 : index
    %c0_0 = arith.constant 0 : index
    %0 = vector.load %arg2[%c0, %c0_0] : memref<1x128xf32, #tpu.memory_space<vmem>>, vector<1x128xf32>
    %cst = arith.constant 5.000000e-01 : f32
    %1 = vector.broadcast %cst : f32 to vector<1x128xf32>
    %2 = arith.cmpf ogt, %0, %1 : vector<1x128xf32>
    %c0_1 = arith.constant 0 : index
    %c0_2 = arith.constant 0 : index
    %3 = vector.load %arg3[%c0_1, %c0_2] : memref<1x256xf32, #tpu.memory_space<vmem>>, vector<1x256xf32>
    %cst_3 = arith.constant 5.000000e-01 : f32
    %4 = vector.broadcast %cst_3 : f32 to vector<1x256xf32>
    %5 = arith.cmpf ogt, %3, %4 : vector<1x256xf32>
    %c0_4 = arith.constant 0 : index
    %c0_5 = arith.constant 0 : index
    %6 = vector.load %arg0[%c0_4, %c0_5] : memref<16x24xf32, #tpu.memory_space<vmem>>, vector<16x24xf32>
    %c0_6 = arith.constant 0 : index
    %c0_7 = arith.constant 0 : index
    %7 = vector.load %arg1[%c0_6, %c0_7] : memref<16x40xf32, #tpu.memory_space<vmem>>, vector<16x40xf32>
    %c0_8 = arith.constant 0 : index
    %c0_9 = arith.constant 0 : index
    %8 = vector.load %arg4[%c0_8, %c0_9] : memref<24x128xf32, #tpu.memory_space<vmem>>, vector<24x128xf32>
    %cst_10 = arith.constant dense<0.000000e+00> : vector<16x128xf32>
    %9 = tpu.matmul %6, %8, %cst_10 {dimension_numbers = #tpu.dot_dimension_numbers<[1], [0], [0], [1], [0, 0, 1, 1], [], []>} : vector<16x24xf32>, vector<24x128xf32>, vector<16x128xf32> -> vector<16x128xf32>
    %c0_11 = arith.constant 0 : index
    %c0_12 = arith.constant 0 : index
    %10 = vector.load %arg6[%c0_11, %c0_12] : memref<1x128xf32, #tpu.memory_space<vmem>>, vector<1x128xf32>
    %11 = vector.broadcast %10 : vector<1x128xf32> to vector<16x128xf32>
    %12 = arith.addf %9, %11 : vector<16x128xf32>
    %c0_13 = arith.constant 0 : index
    %c0_14 = arith.constant 0 : index
    %13 = vector.load %arg10[%c0_13, %c0_14] : memref<40x256xf32, #tpu.memory_space<vmem>>, vector<40x256xf32>
    %cst_15 = arith.constant dense<0.000000e+00> : vector<16x256xf32>
    %14 = tpu.matmul %7, %13, %cst_15 {dimension_numbers = #tpu.dot_dimension_numbers<[1], [0], [0], [1], [0, 0, 1, 1], [], []>} : vector<16x40xf32>, vector<40x256xf32>, vector<16x256xf32> -> vector<16x256xf32>
    %c0_16 = arith.constant 0 : index
    %c0_17 = arith.constant 0 : index
    %15 = vector.load %arg12[%c0_16, %c0_17] : memref<1x256xf32, #tpu.memory_space<vmem>>, vector<1x256xf32>
    %16 = vector.broadcast %15 : vector<1x256xf32> to vector<16x256xf32>
    %17 = arith.addf %14, %16 : vector<16x256xf32>
    %c0_18 = arith.constant 0 : index
    %c0_19 = arith.constant 0 : index
    %18 = vector.load %arg5[%c0_18, %c0_19] : memref<32x128xf32, #tpu.memory_space<vmem>>, vector<32x128xf32>
    %c0_20 = arith.constant 0 : index
    %c0_21 = arith.constant 0 : index
    %19 = vector.load %arg11[%c0_20, %c0_21] : memref<64x256xf32, #tpu.memory_space<vmem>>, vector<64x256xf32>
    %cst_22 = arith.constant 0.000000e+00 : f32
    %20 = vector.broadcast %cst_22 : f32 to vector<2x32xf32>
    %cst_23 = arith.constant 0.000000e+00 : f32
    %21 = vector.broadcast %cst_23 : f32 to vector<2x32xf32>
    %cst_24 = arith.constant 0.000000e+00 : f32
    %22 = vector.broadcast %cst_24 : f32 to vector<2x64xf32>
    %cst_25 = arith.constant 0.000000e+00 : f32
    %23 = vector.broadcast %cst_25 : f32 to vector<2x64xf32>
    %24 = vector.extract_strided_slice %12 {offsets = [0, 0], sizes = [2, 128], strides = [1, 1]} : vector<16x128xf32> to vector<2x128xf32>
    %25 = vector.extract_strided_slice %12 {offsets = [14, 0], sizes = [2, 128], strides = [1, 1]} : vector<16x128xf32> to vector<2x128xf32>
    %26 = vector.shape_cast %2 : vector<1x128xi1> to vector<1x128xi1>
    %27 = vector.broadcast %26 : vector<1x128xi1> to vector<2x128xi1>
    %28 = arith.select %27, %24, %25 : vector<2x128xi1>, vector<2x128xf32>
    %cst_26 = arith.constant dense<0.000000e+00> : vector<2x128xf32>
    %29 = tpu.matmul %20, %18, %cst_26 {dimension_numbers = #tpu.dot_dimension_numbers<[1], [0], [0], [1], [0, 0, 1, 1], [], []>} : vector<2x32xf32>, vector<32x128xf32>, vector<2x128xf32> -> vector<2x128xf32>
    %30 = arith.addf %28, %29 : vector<2x128xf32>
    %31 = vector.extract_strided_slice %30 {offsets = [0, 0], sizes = [2, 32], strides = [1, 1]} : vector<2x128xf32> to vector<2x32xf32>
    %32 = arith.negf %31 : vector<2x32xf32>
    %33 = math.exp %32 : vector<2x32xf32>
    %cst_27 = arith.constant 1.000000e+00 : f32
    %34 = vector.broadcast %cst_27 : f32 to vector<2x32xf32>
    %35 = arith.addf %34, %33 : vector<2x32xf32>
    %36 = arith.divf %34, %35 : vector<2x32xf32>
    %37 = vector.extract_strided_slice %30 {offsets = [0, 32], sizes = [2, 32], strides = [1, 1]} : vector<2x128xf32> to vector<2x32xf32>
    %38 = arith.negf %37 : vector<2x32xf32>
    %39 = math.exp %38 : vector<2x32xf32>
    %cst_28 = arith.constant 1.000000e+00 : f32
    %40 = vector.broadcast %cst_28 : f32 to vector<2x32xf32>
    %41 = arith.addf %40, %39 : vector<2x32xf32>
    %42 = arith.divf %40, %41 : vector<2x32xf32>
    %43 = vector.extract_strided_slice %30 {offsets = [0, 64], sizes = [2, 32], strides = [1, 1]} : vector<2x128xf32> to vector<2x32xf32>
    %44 = math.tanh %43 : vector<2x32xf32>
    %45 = vector.extract_strided_slice %30 {offsets = [0, 96], sizes = [2, 32], strides = [1, 1]} : vector<2x128xf32> to vector<2x32xf32>
    %46 = arith.negf %45 : vector<2x32xf32>
    %47 = math.exp %46 : vector<2x32xf32>
    %cst_29 = arith.constant 1.000000e+00 : f32
    %48 = vector.broadcast %cst_29 : f32 to vector<2x32xf32>
    %49 = arith.addf %48, %47 : vector<2x32xf32>
    %50 = arith.divf %48, %49 : vector<2x32xf32>
    %51 = arith.mulf %42, %21 : vector<2x32xf32>
    %52 = arith.mulf %36, %44 : vector<2x32xf32>
    %53 = arith.addf %51, %52 : vector<2x32xf32>
    %54 = math.tanh %53 : vector<2x32xf32>
    %55 = arith.mulf %50, %54 : vector<2x32xf32>
    %56 = vector.extract_strided_slice %17 {offsets = [0, 0], sizes = [2, 256], strides = [1, 1]} : vector<16x256xf32> to vector<2x256xf32>
    %57 = vector.extract_strided_slice %17 {offsets = [14, 0], sizes = [2, 256], strides = [1, 1]} : vector<16x256xf32> to vector<2x256xf32>
    %58 = vector.shape_cast %5 : vector<1x256xi1> to vector<1x256xi1>
    %59 = vector.broadcast %58 : vector<1x256xi1> to vector<2x256xi1>
    %60 = arith.select %59, %56, %57 : vector<2x256xi1>, vector<2x256xf32>
    %cst_30 = arith.constant dense<0.000000e+00> : vector<2x256xf32>
    %61 = tpu.matmul %22, %19, %cst_30 {dimension_numbers = #tpu.dot_dimension_numbers<[1], [0], [0], [1], [0, 0, 1, 1], [], []>} : vector<2x64xf32>, vector<64x256xf32>, vector<2x256xf32> -> vector<2x256xf32>
    %62 = arith.addf %60, %61 : vector<2x256xf32>
    %63 = vector.extract_strided_slice %62 {offsets = [0, 0], sizes = [2, 64], strides = [1, 1]} : vector<2x256xf32> to vector<2x64xf32>
    %64 = arith.negf %63 : vector<2x64xf32>
    %65 = math.exp %64 : vector<2x64xf32>
    %cst_31 = arith.constant 1.000000e+00 : f32
    %66 = vector.broadcast %cst_31 : f32 to vector<2x64xf32>
    %67 = arith.addf %66, %65 : vector<2x64xf32>
    %68 = arith.divf %66, %67 : vector<2x64xf32>
    %69 = vector.extract_strided_slice %62 {offsets = [0, 64], sizes = [2, 64], strides = [1, 1]} : vector<2x256xf32> to vector<2x64xf32>
    %70 = arith.negf %69 : vector<2x64xf32>
    %71 = math.exp %70 : vector<2x64xf32>
    %cst_32 = arith.constant 1.000000e+00 : f32
    %72 = vector.broadcast %cst_32 : f32 to vector<2x64xf32>
    %73 = arith.addf %72, %71 : vector<2x64xf32>
    %74 = arith.divf %72, %73 : vector<2x64xf32>
    %75 = vector.extract_strided_slice %62 {offsets = [0, 128], sizes = [2, 64], strides = [1, 1]} : vector<2x256xf32> to vector<2x64xf32>
    %76 = math.tanh %75 : vector<2x64xf32>
    %77 = vector.extract_strided_slice %62 {offsets = [0, 192], sizes = [2, 64], strides = [1, 1]} : vector<2x256xf32> to vector<2x64xf32>
    %78 = arith.negf %77 : vector<2x64xf32>
    %79 = math.exp %78 : vector<2x64xf32>
    %cst_33 = arith.constant 1.000000e+00 : f32
    %80 = vector.broadcast %cst_33 : f32 to vector<2x64xf32>
    %81 = arith.addf %80, %79 : vector<2x64xf32>
    %82 = arith.divf %80, %81 : vector<2x64xf32>
    %83 = arith.mulf %74, %23 : vector<2x64xf32>
    %84 = arith.mulf %68, %76 : vector<2x64xf32>
    %85 = arith.addf %83, %84 : vector<2x64xf32>
    %86 = math.tanh %85 : vector<2x64xf32>
    %87 = arith.mulf %82, %86 : vector<2x64xf32>
    %88 = vector.extract_strided_slice %55 {offsets = [0, 0], sizes = [2, 16], strides = [1, 1]} : vector<2x32xf32> to vector<2x16xf32>
    %c0_34 = arith.constant 0 : index
    %c0_35 = arith.constant 0 : index
    %89 = vector.load %arg16[%c0_34, %c0_35] : memref<16x32xf32, #tpu.memory_space<vmem>>, vector<2x16xf32>
    tpu.vector_store %arg16[%c0_34, %c0_35], %88 {strides = array<i32>} : memref<16x32xf32, #tpu.memory_space<vmem>>, vector<2x16xf32>,
    %90 = vector.extract_strided_slice %55 {offsets = [0, 16], sizes = [2, 16], strides = [1, 1]} : vector<2x32xf32> to vector<2x16xf32>
    %c14 = arith.constant 14 : index
    %c16 = arith.constant 16 : index
    %91 = vector.load %arg16[%c14, %c16] : memref<16x32xf32, #tpu.memory_space<vmem>>, vector<2x16xf32>
    tpu.vector_store %arg16[%c14, %c16], %90 {strides = array<i32>} : memref<16x32xf32, #tpu.memory_space<vmem>>, vector<2x16xf32>,
    %92 = vector.extract_strided_slice %87 {offsets = [0, 0], sizes = [2, 32], strides = [1, 1]} : vector<2x64xf32> to vector<2x32xf32>
    %c0_36 = arith.constant 0 : index
    %c0_37 = arith.constant 0 : index
    %93 = vector.load %arg17[%c0_36, %c0_37] : memref<16x64xf32, #tpu.memory_space<vmem>>, vector<2x32xf32>
    tpu.vector_store %arg17[%c0_36, %c0_37], %92 {strides = array<i32>} : memref<16x64xf32, #tpu.memory_space<vmem>>, vector<2x32xf32>,
    %94 = vector.extract_strided_slice %87 {offsets = [0, 32], sizes = [2, 32], strides = [1, 1]} : vector<2x64xf32> to vector<2x32xf32>
    %c14_38 = arith.constant 14 : index
    %c32 = arith.constant 32 : index
    %95 = vector.load %arg17[%c14_38, %c32] : memref<16x64xf32, #tpu.memory_space<vmem>>, vector<2x32xf32>
    tpu.vector_store %arg17[%c14_38, %c32], %94 {strides = array<i32>} : memref<16x64xf32, #tpu.memory_space<vmem>>, vector<2x32xf32>,
    %96 = vector.extract_strided_slice %12 {offsets = [2, 0], sizes = [2, 128], strides = [1, 1]} : vector<16x128xf32> to vector<2x128xf32>
    %97 = vector.extract_strided_slice %12 {offsets = [12, 0], sizes = [2, 128], strides = [1, 1]} : vector<16x128xf32> to vector<2x128xf32>
    %98 = vector.shape_cast %2 : vector<1x128xi1> to vector<1x128xi1>
    %99 = vector.broadcast %98 : vector<1x128xi1> to vector<2x128xi1>
    %100 = arith.select %99, %96, %97 : vector<2x128xi1>, vector<2x128xf32>
    %cst_39 = arith.constant dense<0.000000e+00> : vector<2x128xf32>
    %101 = tpu.matmul %55, %18, %cst_39 {dimension_numbers = #tpu.dot_dimension_numbers<[1], [0], [0], [1], [0, 0, 1, 1], [], []>} : vector<2x32xf32>, vector<32x128xf32>, vector<2x128xf32> -> vector<2x128xf32>
    %102 = arith.addf %100, %101 : vector<2x128xf32>
    %103 = vector.extract_strided_slice %102 {offsets = [0, 0], sizes = [2, 32], strides = [1, 1]} : vector<2x128xf32> to vector<2x32xf32>
    %104 = arith.negf %103 : vector<2x32xf32>
    %105 = math.exp %104 : vector<2x32xf32>
    %cst_40 = arith.constant 1.000000e+00 : f32
    %106 = vector.broadcast %cst_40 : f32 to vector<2x32xf32>
    %107 = arith.addf %106, %105 : vector<2x32xf32>
    %108 = arith.divf %106, %107 : vector<2x32xf32>
    %109 = vector.extract_strided_slice %102 {offsets = [0, 32], sizes = [2, 32], strides = [1, 1]} : vector<2x128xf32> to vector<2x32xf32>
    %110 = arith.negf %109 : vector<2x32xf32>
    %111 = math.exp %110 : vector<2x32xf32>
    %cst_41 = arith.constant 1.000000e+00 : f32
    %112 = vector.broadcast %cst_41 : f32 to vector<2x32xf32>
    %113 = arith.addf %112, %111 : vector<2x32xf32>
    %114 = arith.divf %112, %113 : vector<2x32xf32>
    %115 = vector.extract_strided_slice %102 {offsets = [0, 64], sizes = [2, 32], strides = [1, 1]} : vector<2x128xf32> to vector<2x32xf32>
    %116 = math.tanh %115 : vector<2x32xf32>
    %117 = vector.extract_strided_slice %102 {offsets = [0, 96], sizes = [2, 32], strides = [1, 1]} : vector<2x128xf32> to vector<2x32xf32>
    %118 = arith.negf %117 : vector<2x32xf32>
    %119 = math.exp %118 : vector<2x32xf32>
    %cst_42 = arith.constant 1.000000e+00 : f32
    %120 = vector.broadcast %cst_42 : f32 to vector<2x32xf32>
    %121 = arith.addf %120, %119 : vector<2x32xf32>
    %122 = arith.divf %120, %121 : vector<2x32xf32>
    %123 = arith.mulf %114, %53 : vector<2x32xf32>
    %124 = arith.mulf %108, %116 : vector<2x32xf32>
    %125 = arith.addf %123, %124 : vector<2x32xf32>
    %126 = math.tanh %125 : vector<2x32xf32>
    %127 = arith.mulf %122, %126 : vector<2x32xf32>
    %128 = vector.extract_strided_slice %17 {offsets = [2, 0], sizes = [2, 256], strides = [1, 1]} : vector<16x256xf32> to vector<2x256xf32>
    %129 = vector.extract_strided_slice %17 {offsets = [12, 0], sizes = [2, 256], strides = [1, 1]} : vector<16x256xf32> to vector<2x256xf32>
    %130 = vector.shape_cast %5 : vector<1x256xi1> to vector<1x256xi1>
    %131 = vector.broadcast %130 : vector<1x256xi1> to vector<2x256xi1>
    %132 = arith.select %131, %128, %129 : vector<2x256xi1>, vector<2x256xf32>
    %cst_43 = arith.constant dense<0.000000e+00> : vector<2x256xf32>
    %133 = tpu.matmul %87, %19, %cst_43 {dimension_numbers = #tpu.dot_dimension_numbers<[1], [0], [0], [1], [0, 0, 1, 1], [], []>} : vector<2x64xf32>, vector<64x256xf32>, vector<2x256xf32> -> vector<2x256xf32>
    %134 = arith.addf %132, %133 : vector<2x256xf32>
    %135 = vector.extract_strided_slice %134 {offsets = [0, 0], sizes = [2, 64], strides = [1, 1]} : vector<2x256xf32> to vector<2x64xf32>
    %136 = arith.negf %135 : vector<2x64xf32>
    %137 = math.exp %136 : vector<2x64xf32>
    %cst_44 = arith.constant 1.000000e+00 : f32
    %138 = vector.broadcast %cst_44 : f32 to vector<2x64xf32>
    %139 = arith.addf %138, %137 : vector<2x64xf32>
    %140 = arith.divf %138, %139 : vector<2x64xf32>
    %141 = vector.extract_strided_slice %134 {offsets = [0, 64], sizes = [2, 64], strides = [1, 1]} : vector<2x256xf32> to vector<2x64xf32>
    %142 = arith.negf %141 : vector<2x64xf32>
    %143 = math.exp %142 : vector<2x64xf32>
    %cst_45 = arith.constant 1.000000e+00 : f32
    %144 = vector.broadcast %cst_45 : f32 to vector<2x64xf32>
    %145 = arith.addf %144, %143 : vector<2x64xf32>
    %146 = arith.divf %144, %145 : vector<2x64xf32>
    %147 = vector.extract_strided_slice %134 {offsets = [0, 128], sizes = [2, 64], strides = [1, 1]} : vector<2x256xf32> to vector<2x64xf32>
    %148 = math.tanh %147 : vector<2x64xf32>
    %149 = vector.extract_strided_slice %134 {offsets = [0, 192], sizes = [2, 64], strides = [1, 1]} : vector<2x256xf32> to vector<2x64xf32>
    %150 = arith.negf %149 : vector<2x64xf32>
    %151 = math.exp %150 : vector<2x64xf32>
    %cst_46 = arith.constant 1.000000e+00 : f32
    %152 = vector.broadcast %cst_46 : f32 to vector<2x64xf32>
    %153 = arith.addf %152, %151 : vector<2x64xf32>
    %154 = arith.divf %152, %153 : vector<2x64xf32>
    %155 = arith.mulf %146, %85 : vector<2x64xf32>
    %156 = arith.mulf %140, %148 : vector<2x64xf32>
    %157 = arith.addf %155, %156 : vector<2x64xf32>
    %158 = math.tanh %157 : vector<2x64xf32>
    %159 = arith.mulf %154, %158 : vector<2x64xf32>
    %160 = vector.extract_strided_slice %127 {offsets = [0, 0], sizes = [2, 16], strides = [1, 1]} : vector<2x32xf32> to vector<2x16xf32>
    %c2 = arith.constant 2 : index
    %c0_47 = arith.constant 0 : index
    %161 = vector.load %arg16[%c2, %c0_47] : memref<16x32xf32, #tpu.memory_space<vmem>>, vector<2x16xf32>
    tpu.vector_store %arg16[%c2, %c0_47], %160 {strides = array<i32>} : memref<16x32xf32, #tpu.memory_space<vmem>>, vector<2x16xf32>,
    %162 = vector.extract_strided_slice %127 {offsets = [0, 16], sizes = [2, 16], strides = [1, 1]} : vector<2x32xf32> to vector<2x16xf32>
    %c12 = arith.constant 12 : index
    %c16_48 = arith.constant 16 : index
    %163 = vector.load %arg16[%c12, %c16_48] : memref<16x32xf32, #tpu.memory_space<vmem>>, vector<2x16xf32>
    tpu.vector_store %arg16[%c12, %c16_48], %162 {strides = array<i32>} : memref<16x32xf32, #tpu.memory_space<vmem>>, vector<2x16xf32>,
    %164 = vector.extract_strided_slice %159 {offsets = [0, 0], sizes = [2, 32], strides = [1, 1]} : vector<2x64xf32> to vector<2x32xf32>
    %c2_49 = arith.constant 2 : index
    %c0_50 = arith.constant 0 : index
    %165 = vector.load %arg17[%c2_49, %c0_50] : memref<16x64xf32, #tpu.memory_space<vmem>>, vector<2x32xf32>
    tpu.vector_store %arg17[%c2_49, %c0_50], %164 {strides = array<i32>} : memref<16x64xf32, #tpu.memory_space<vmem>>, vector<2x32xf32>,
    %166 = vector.extract_strided_slice %159 {offsets = [0, 32], sizes = [2, 32], strides = [1, 1]} : vector<2x64xf32> to vector<2x32xf32>
    %c12_51 = arith.constant 12 : index
    %c32_52 = arith.constant 32 : index
    %167 = vector.load %arg17[%c12_51, %c32_52] : memref<16x64xf32, #tpu.memory_space<vmem>>, vector<2x32xf32>
    tpu.vector_store %arg17[%c12_51, %c32_52], %166 {strides = array<i32>} : memref<16x64xf32, #tpu.memory_space<vmem>>, vector<2x32xf32>,
    %168 = vector.extract_strided_slice %12 {offsets = [4, 0], sizes = [2, 128], strides = [1, 1]} : vector<16x128xf32> to vector<2x128xf32>
    %169 = vector.extract_strided_slice %12 {offsets = [10, 0], sizes = [2, 128], strides = [1, 1]} : vector<16x128xf32> to vector<2x128xf32>
    %170 = vector.shape_cast %2 : vector<1x128xi1> to vector<1x128xi1>
    %171 = vector.broadcast %170 : vector<1x128xi1> to vector<2x128xi1>
    %172 = arith.select %171, %168, %169 : vector<2x128xi1>, vector<2x128xf32>
    %cst_53 = arith.constant dense<0.000000e+00> : vector<2x128xf32>
    %173 = tpu.matmul %127, %18, %cst_53 {dimension_numbers = #tpu.dot_dimension_numbers<[1], [0], [0], [1], [0, 0, 1, 1], [], []>} : vector<2x32xf32>, vector<32x128xf32>, vector<2x128xf32> -> vector<2x128xf32>
    %174 = arith.addf %172, %173 : vector<2x128xf32>
    %175 = vector.extract_strided_slice %174 {offsets = [0, 0], sizes = [2, 32], strides = [1, 1]} : vector<2x128xf32> to vector<2x32xf32>
    %176 = arith.negf %175 : vector<2x32xf32>
    %177 = math.exp %176 : vector<2x32xf32>
    %cst_54 = arith.constant 1.000000e+00 : f32
    %178 = vector.broadcast %cst_54 : f32 to vector<2x32xf32>
    %179 = arith.addf %178, %177 : vector<2x32xf32>
    %180 = arith.divf %178, %179 : vector<2x32xf32>
    %181 = vector.extract_strided_slice %174 {offsets = [0, 32], sizes = [2, 32], strides = [1, 1]} : vector<2x128xf32> to vector<2x32xf32>
    %182 = arith.negf %181 : vector<2x32xf32>
    %183 = math.exp %182 : vector<2x32xf32>
    %cst_55 = arith.constant 1.000000e+00 : f32
    %184 = vector.broadcast %cst_55 : f32 to vector<2x32xf32>
    %185 = arith.addf %184, %183 : vector<2x32xf32>
    %186 = arith.divf %184, %185 : vector<2x32xf32>
    %187 = vector.extract_strided_slice %174 {offsets = [0, 64], sizes = [2, 32], strides = [1, 1]} : vector<2x128xf32> to vector<2x32xf32>
    %188 = math.tanh %187 : vector<2x32xf32>
    %189 = vector.extract_strided_slice %174 {offsets = [0, 96], sizes = [2, 32], strides = [1, 1]} : vector<2x128xf32> to vector<2x32xf32>
    %190 = arith.negf %189 : vector<2x32xf32>
    %191 = math.exp %190 : vector<2x32xf32>
    %cst_56 = arith.constant 1.000000e+00 : f32
    %192 = vector.broadcast %cst_56 : f32 to vector<2x32xf32>
    %193 = arith.addf %192, %191 : vector<2x32xf32>
    %194 = arith.divf %192, %193 : vector<2x32xf32>
    %195 = arith.mulf %186, %125 : vector<2x32xf32>
    %196 = arith.mulf %180, %188 : vector<2x32xf32>
    %197 = arith.addf %195, %196 : vector<2x32xf32>
    %198 = math.tanh %197 : vector<2x32xf32>
    %199 = arith.mulf %194, %198 : vector<2x32xf32>
    %200 = vector.extract_strided_slice %17 {offsets = [4, 0], sizes = [2, 256], strides = [1, 1]} : vector<16x256xf32> to vector<2x256xf32>
    %201 = vector.extract_strided_slice %17 {offsets = [10, 0], sizes = [2, 256], strides = [1, 1]} : vector<16x256xf32> to vector<2x256xf32>
    %202 = vector.shape_cast %5 : vector<1x256xi1> to vector<1x256xi1>
    %203 = vector.broadcast %202 : vector<1x256xi1> to vector<2x256xi1>
    %204 = arith.select %203, %200, %201 : vector<2x256xi1>, vector<2x256xf32>
    %cst_57 = arith.constant dense<0.000000e+00> : vector<2x256xf32>
    %205 = tpu.matmul %159, %19, %cst_57 {dimension_numbers = #tpu.dot_dimension_numbers<[1], [0], [0], [1], [0, 0, 1, 1], [], []>} : vector<2x64xf32>, vector<64x256xf32>, vector<2x256xf32> -> vector<2x256xf32>
    %206 = arith.addf %204, %205 : vector<2x256xf32>
    %207 = vector.extract_strided_slice %206 {offsets = [0, 0], sizes = [2, 64], strides = [1, 1]} : vector<2x256xf32> to vector<2x64xf32>
    %208 = arith.negf %207 : vector<2x64xf32>
    %209 = math.exp %208 : vector<2x64xf32>
    %cst_58 = arith.constant 1.000000e+00 : f32
    %210 = vector.broadcast %cst_58 : f32 to vector<2x64xf32>
    %211 = arith.addf %210, %209 : vector<2x64xf32>
    %212 = arith.divf %210, %211 : vector<2x64xf32>
    %213 = vector.extract_strided_slice %206 {offsets = [0, 64], sizes = [2, 64], strides = [1, 1]} : vector<2x256xf32> to vector<2x64xf32>
    %214 = arith.negf %213 : vector<2x64xf32>
    %215 = math.exp %214 : vector<2x64xf32>
    %cst_59 = arith.constant 1.000000e+00 : f32
    %216 = vector.broadcast %cst_59 : f32 to vector<2x64xf32>
    %217 = arith.addf %216, %215 : vector<2x64xf32>
    %218 = arith.divf %216, %217 : vector<2x64xf32>
    %219 = vector.extract_strided_slice %206 {offsets = [0, 128], sizes = [2, 64], strides = [1, 1]} : vector<2x256xf32> to vector<2x64xf32>
    %220 = math.tanh %219 : vector<2x64xf32>
    %221 = vector.extract_strided_slice %206 {offsets = [0, 192], sizes = [2, 64], strides = [1, 1]} : vector<2x256xf32> to vector<2x64xf32>
    %222 = arith.negf %221 : vector<2x64xf32>
    %223 = math.exp %222 : vector<2x64xf32>
    %cst_60 = arith.constant 1.000000e+00 : f32
    %224 = vector.broadcast %cst_60 : f32 to vector<2x64xf32>
    %225 = arith.addf %224, %223 : vector<2x64xf32>
    %226 = arith.divf %224, %225 : vector<2x64xf32>
    %227 = arith.mulf %218, %157 : vector<2x64xf32>
    %228 = arith.mulf %212, %220 : vector<2x64xf32>
    %229 = arith.addf %227, %228 : vector<2x64xf32>
    %230 = math.tanh %229 : vector<2x64xf32>
    %231 = arith.mulf %226, %230 : vector<2x64xf32>
    %232 = vector.extract_strided_slice %199 {offsets = [0, 0], sizes = [2, 16], strides = [1, 1]} : vector<2x32xf32> to vector<2x16xf32>
    %c4 = arith.constant 4 : index
    %c0_61 = arith.constant 0 : index
    %233 = vector.load %arg16[%c4, %c0_61] : memref<16x32xf32, #tpu.memory_space<vmem>>, vector<2x16xf32>
    tpu.vector_store %arg16[%c4, %c0_61], %232 {strides = array<i32>} : memref<16x32xf32, #tpu.memory_space<vmem>>, vector<2x16xf32>,
    %234 = vector.extract_strided_slice %199 {offsets = [0, 16], sizes = [2, 16], strides = [1, 1]} : vector<2x32xf32> to vector<2x16xf32>
    %c10 = arith.constant 10 : index
    %c16_62 = arith.constant 16 : index
    %235 = vector.load %arg16[%c10, %c16_62] : memref<16x32xf32, #tpu.memory_space<vmem>>, vector<2x16xf32>
    tpu.vector_store %arg16[%c10, %c16_62], %234 {strides = array<i32>} : memref<16x32xf32, #tpu.memory_space<vmem>>, vector<2x16xf32>,
    %236 = vector.extract_strided_slice %231 {offsets = [0, 0], sizes = [2, 32], strides = [1, 1]} : vector<2x64xf32> to vector<2x32xf32>
    %c4_63 = arith.constant 4 : index
    %c0_64 = arith.constant 0 : index
    %237 = vector.load %arg17[%c4_63, %c0_64] : memref<16x64xf32, #tpu.memory_space<vmem>>, vector<2x32xf32>
    tpu.vector_store %arg17[%c4_63, %c0_64], %236 {strides = array<i32>} : memref<16x64xf32, #tpu.memory_space<vmem>>, vector<2x32xf32>,
    %238 = vector.extract_strided_slice %231 {offsets = [0, 32], sizes = [2, 32], strides = [1, 1]} : vector<2x64xf32> to vector<2x32xf32>
    %c10_65 = arith.constant 10 : index
    %c32_66 = arith.constant 32 : index
    %239 = vector.load %arg17[%c10_65, %c32_66] : memref<16x64xf32, #tpu.memory_space<vmem>>, vector<2x32xf32>
    tpu.vector_store %arg17[%c10_65, %c32_66], %238 {strides = array<i32>} : memref<16x64xf32, #tpu.memory_space<vmem>>, vector<2x32xf32>,
    %240 = vector.extract_strided_slice %12 {offsets = [6, 0], sizes = [2, 128], strides = [1, 1]} : vector<16x128xf32> to vector<2x128xf32>
    %241 = vector.extract_strided_slice %12 {offsets = [8, 0], sizes = [2, 128], strides = [1, 1]} : vector<16x128xf32> to vector<2x128xf32>
    %242 = vector.shape_cast %2 : vector<1x128xi1> to vector<1x128xi1>
    %243 = vector.broadcast %242 : vector<1x128xi1> to vector<2x128xi1>
    %244 = arith.select %243, %240, %241 : vector<2x128xi1>, vector<2x128xf32>
    %cst_67 = arith.constant dense<0.000000e+00> : vector<2x128xf32>
    %245 = tpu.matmul %199, %18, %cst_67 {dimension_numbers = #tpu.dot_dimension_numbers<[1], [0], [0], [1], [0, 0, 1, 1], [], []>} : vector<2x32xf32>, vector<32x128xf32>, vector<2x128xf32> -> vector<2x128xf32>
    %246 = arith.addf %244, %245 : vector<2x128xf32>
    %247 = vector.extract_strided_slice %246 {offsets = [0, 0], sizes = [2, 32], strides = [1, 1]} : vector<2x128xf32> to vector<2x32xf32>
    %248 = arith.negf %247 : vector<2x32xf32>
    %249 = math.exp %248 : vector<2x32xf32>
    %cst_68 = arith.constant 1.000000e+00 : f32
    %250 = vector.broadcast %cst_68 : f32 to vector<2x32xf32>
    %251 = arith.addf %250, %249 : vector<2x32xf32>
    %252 = arith.divf %250, %251 : vector<2x32xf32>
    %253 = vector.extract_strided_slice %246 {offsets = [0, 32], sizes = [2, 32], strides = [1, 1]} : vector<2x128xf32> to vector<2x32xf32>
    %254 = arith.negf %253 : vector<2x32xf32>
    %255 = math.exp %254 : vector<2x32xf32>
    %cst_69 = arith.constant 1.000000e+00 : f32
    %256 = vector.broadcast %cst_69 : f32 to vector<2x32xf32>
    %257 = arith.addf %256, %255 : vector<2x32xf32>
    %258 = arith.divf %256, %257 : vector<2x32xf32>
    %259 = vector.extract_strided_slice %246 {offsets = [0, 64], sizes = [2, 32], strides = [1, 1]} : vector<2x128xf32> to vector<2x32xf32>
    %260 = math.tanh %259 : vector<2x32xf32>
    %261 = vector.extract_strided_slice %246 {offsets = [0, 96], sizes = [2, 32], strides = [1, 1]} : vector<2x128xf32> to vector<2x32xf32>
    %262 = arith.negf %261 : vector<2x32xf32>
    %263 = math.exp %262 : vector<2x32xf32>
    %cst_70 = arith.constant 1.000000e+00 : f32
    %264 = vector.broadcast %cst_70 : f32 to vector<2x32xf32>
    %265 = arith.addf %264, %263 : vector<2x32xf32>
    %266 = arith.divf %264, %265 : vector<2x32xf32>
    %267 = arith.mulf %258, %197 : vector<2x32xf32>
    %268 = arith.mulf %252, %260 : vector<2x32xf32>
    %269 = arith.addf %267, %268 : vector<2x32xf32>
    %270 = math.tanh %269 : vector<2x32xf32>
    %271 = arith.mulf %266, %270 : vector<2x32xf32>
    %272 = vector.extract_strided_slice %17 {offsets = [6, 0], sizes = [2, 256], strides = [1, 1]} : vector<16x256xf32> to vector<2x256xf32>
    %273 = vector.extract_strided_slice %17 {offsets = [8, 0], sizes = [2, 256], strides = [1, 1]} : vector<16x256xf32> to vector<2x256xf32>
    %274 = vector.shape_cast %5 : vector<1x256xi1> to vector<1x256xi1>
    %275 = vector.broadcast %274 : vector<1x256xi1> to vector<2x256xi1>
    %276 = arith.select %275, %272, %273 : vector<2x256xi1>, vector<2x256xf32>
    %cst_71 = arith.constant dense<0.000000e+00> : vector<2x256xf32>
    %277 = tpu.matmul %231, %19, %cst_71 {dimension_numbers = #tpu.dot_dimension_numbers<[1], [0], [0], [1], [0, 0, 1, 1], [], []>} : vector<2x64xf32>, vector<64x256xf32>, vector<2x256xf32> -> vector<2x256xf32>
    %278 = arith.addf %276, %277 : vector<2x256xf32>
    %279 = vector.extract_strided_slice %278 {offsets = [0, 0], sizes = [2, 64], strides = [1, 1]} : vector<2x256xf32> to vector<2x64xf32>
    %280 = arith.negf %279 : vector<2x64xf32>
    %281 = math.exp %280 : vector<2x64xf32>
    %cst_72 = arith.constant 1.000000e+00 : f32
    %282 = vector.broadcast %cst_72 : f32 to vector<2x64xf32>
    %283 = arith.addf %282, %281 : vector<2x64xf32>
    %284 = arith.divf %282, %283 : vector<2x64xf32>
    %285 = vector.extract_strided_slice %278 {offsets = [0, 64], sizes = [2, 64], strides = [1, 1]} : vector<2x256xf32> to vector<2x64xf32>
    %286 = arith.negf %285 : vector<2x64xf32>
    %287 = math.exp %286 : vector<2x64xf32>
    %cst_73 = arith.constant 1.000000e+00 : f32
    %288 = vector.broadcast %cst_73 : f32 to vector<2x64xf32>
    %289 = arith.addf %288, %287 : vector<2x64xf32>
    %290 = arith.divf %288, %289 : vector<2x64xf32>
    %291 = vector.extract_strided_slice %278 {offsets = [0, 128], sizes = [2, 64], strides = [1, 1]} : vector<2x256xf32> to vector<2x64xf32>
    %292 = math.tanh %291 : vector<2x64xf32>
    %293 = vector.extract_strided_slice %278 {offsets = [0, 192], sizes = [2, 64], strides = [1, 1]} : vector<2x256xf32> to vector<2x64xf32>
    %294 = arith.negf %293 : vector<2x64xf32>
    %295 = math.exp %294 : vector<2x64xf32>
    %cst_74 = arith.constant 1.000000e+00 : f32
    %296 = vector.broadcast %cst_74 : f32 to vector<2x64xf32>
    %297 = arith.addf %296, %295 : vector<2x64xf32>
    %298 = arith.divf %296, %297 : vector<2x64xf32>
    %299 = arith.mulf %290, %229 : vector<2x64xf32>
    %300 = arith.mulf %284, %292 : vector<2x64xf32>
    %301 = arith.addf %299, %300 : vector<2x64xf32>
    %302 = math.tanh %301 : vector<2x64xf32>
    %303 = arith.mulf %298, %302 : vector<2x64xf32>
    %304 = vector.extract_strided_slice %271 {offsets = [0, 0], sizes = [2, 16], strides = [1, 1]} : vector<2x32xf32> to vector<2x16xf32>
    %c6 = arith.constant 6 : index
    %c0_75 = arith.constant 0 : index
    %305 = vector.load %arg16[%c6, %c0_75] : memref<16x32xf32, #tpu.memory_space<vmem>>, vector<2x16xf32>
    tpu.vector_store %arg16[%c6, %c0_75], %304 {strides = array<i32>} : memref<16x32xf32, #tpu.memory_space<vmem>>, vector<2x16xf32>,
    %306 = vector.extract_strided_slice %271 {offsets = [0, 16], sizes = [2, 16], strides = [1, 1]} : vector<2x32xf32> to vector<2x16xf32>
    %c8 = arith.constant 8 : index
    %c16_76 = arith.constant 16 : index
    %307 = vector.load %arg16[%c8, %c16_76] : memref<16x32xf32, #tpu.memory_space<vmem>>, vector<2x16xf32>
    tpu.vector_store %arg16[%c8, %c16_76], %306 {strides = array<i32>} : memref<16x32xf32, #tpu.memory_space<vmem>>, vector<2x16xf32>,
    %308 = vector.extract_strided_slice %303 {offsets = [0, 0], sizes = [2, 32], strides = [1, 1]} : vector<2x64xf32> to vector<2x32xf32>
    %c6_77 = arith.constant 6 : index
    %c0_78 = arith.constant 0 : index
    %309 = vector.load %arg17[%c6_77, %c0_78] : memref<16x64xf32, #tpu.memory_space<vmem>>, vector<2x32xf32>
    tpu.vector_store %arg17[%c6_77, %c0_78], %308 {strides = array<i32>} : memref<16x64xf32, #tpu.memory_space<vmem>>, vector<2x32xf32>,
    %310 = vector.extract_strided_slice %303 {offsets = [0, 32], sizes = [2, 32], strides = [1, 1]} : vector<2x64xf32> to vector<2x32xf32>
    %c8_79 = arith.constant 8 : index
    %c32_80 = arith.constant 32 : index
    %311 = vector.load %arg17[%c8_79, %c32_80] : memref<16x64xf32, #tpu.memory_space<vmem>>, vector<2x32xf32>
    tpu.vector_store %arg17[%c8_79, %c32_80], %310 {strides = array<i32>} : memref<16x64xf32, #tpu.memory_space<vmem>>, vector<2x32xf32>,
    %312 = vector.extract_strided_slice %12 {offsets = [8, 0], sizes = [2, 128], strides = [1, 1]} : vector<16x128xf32> to vector<2x128xf32>
    %313 = vector.extract_strided_slice %12 {offsets = [6, 0], sizes = [2, 128], strides = [1, 1]} : vector<16x128xf32> to vector<2x128xf32>
    %314 = vector.shape_cast %2 : vector<1x128xi1> to vector<1x128xi1>
    %315 = vector.broadcast %314 : vector<1x128xi1> to vector<2x128xi1>
    %316 = arith.select %315, %312, %313 : vector<2x128xi1>, vector<2x128xf32>
    %cst_81 = arith.constant dense<0.000000e+00> : vector<2x128xf32>
    %317 = tpu.matmul %271, %18, %cst_81 {dimension_numbers = #tpu.dot_dimension_numbers<[1], [0], [0], [1], [0, 0, 1, 1], [], []>} : vector<2x32xf32>, vector<32x128xf32>, vector<2x128xf32> -> vector<2x128xf32>
    %318 = arith.addf %316, %317 : vector<2x128xf32>
    %319 = vector.extract_strided_slice %318 {offsets = [0, 0], sizes = [2, 32], strides = [1, 1]} : vector<2x128xf32> to vector<2x32xf32>
    %320 = arith.negf %319 : vector<2x32xf32>
    %321 = math.exp %320 : vector<2x32xf32>
    %cst_82 = arith.constant 1.000000e+00 : f32
    %322 = vector.broadcast %cst_82 : f32 to vector<2x32xf32>
    %323 = arith.addf %322, %321 : vector<2x32xf32>
    %324 = arith.divf %322, %323 : vector<2x32xf32>
    %325 = vector.extract_strided_slice %318 {offsets = [0, 32], sizes = [2, 32], strides = [1, 1]} : vector<2x128xf32> to vector<2x32xf32>
    %326 = arith.negf %325 : vector<2x32xf32>
    %327 = math.exp %326 : vector<2x32xf32>
    %cst_83 = arith.constant 1.000000e+00 : f32
    %328 = vector.broadcast %cst_83 : f32 to vector<2x32xf32>
    %329 = arith.addf %328, %327 : vector<2x32xf32>
    %330 = arith.divf %328, %329 : vector<2x32xf32>
    %331 = vector.extract_strided_slice %318 {offsets = [0, 64], sizes = [2, 32], strides = [1, 1]} : vector<2x128xf32> to vector<2x32xf32>
    %332 = math.tanh %331 : vector<2x32xf32>
    %333 = vector.extract_strided_slice %318 {offsets = [0, 96], sizes = [2, 32], strides = [1, 1]} : vector<2x128xf32> to vector<2x32xf32>
    %334 = arith.negf %333 : vector<2x32xf32>
    %335 = math.exp %334 : vector<2x32xf32>
    %cst_84 = arith.constant 1.000000e+00 : f32
    %336 = vector.broadcast %cst_84 : f32 to vector<2x32xf32>
    %337 = arith.addf %336, %335 : vector<2x32xf32>
    %338 = arith.divf %336, %337 : vector<2x32xf32>
    %339 = arith.mulf %330, %269 : vector<2x32xf32>
    %340 = arith.mulf %324, %332 : vector<2x32xf32>
    %341 = arith.addf %339, %340 : vector<2x32xf32>
    %342 = math.tanh %341 : vector<2x32xf32>
    %343 = arith.mulf %338, %342 : vector<2x32xf32>
    %344 = vector.extract_strided_slice %17 {offsets = [8, 0], sizes = [2, 256], strides = [1, 1]} : vector<16x256xf32> to vector<2x256xf32>
    %345 = vector.extract_strided_slice %17 {offsets = [6, 0], sizes = [2, 256], strides = [1, 1]} : vector<16x256xf32> to vector<2x256xf32>
    %346 = vector.shape_cast %5 : vector<1x256xi1> to vector<1x256xi1>
    %347 = vector.broadcast %346 : vector<1x256xi1> to vector<2x256xi1>
    %348 = arith.select %347, %344, %345 : vector<2x256xi1>, vector<2x256xf32>
    %cst_85 = arith.constant dense<0.000000e+00> : vector<2x256xf32>
    %349 = tpu.matmul %303, %19, %cst_85 {dimension_numbers = #tpu.dot_dimension_numbers<[1], [0], [0], [1], [0, 0, 1, 1], [], []>} : vector<2x64xf32>, vector<64x256xf32>, vector<2x256xf32> -> vector<2x256xf32>
    %350 = arith.addf %348, %349 : vector<2x256xf32>
    %351 = vector.extract_strided_slice %350 {offsets = [0, 0], sizes = [2, 64], strides = [1, 1]} : vector<2x256xf32> to vector<2x64xf32>
    %352 = arith.negf %351 : vector<2x64xf32>
    %353 = math.exp %352 : vector<2x64xf32>
    %cst_86 = arith.constant 1.000000e+00 : f32
    %354 = vector.broadcast %cst_86 : f32 to vector<2x64xf32>
    %355 = arith.addf %354, %353 : vector<2x64xf32>
    %356 = arith.divf %354, %355 : vector<2x64xf32>
    %357 = vector.extract_strided_slice %350 {offsets = [0, 64], sizes = [2, 64], strides = [1, 1]} : vector<2x256xf32> to vector<2x64xf32>
    %358 = arith.negf %357 : vector<2x64xf32>
    %359 = math.exp %358 : vector<2x64xf32>
    %cst_87 = arith.constant 1.000000e+00 : f32
    %360 = vector.broadcast %cst_87 : f32 to vector<2x64xf32>
    %361 = arith.addf %360, %359 : vector<2x64xf32>
    %362 = arith.divf %360, %361 : vector<2x64xf32>
    %363 = vector.extract_strided_slice %350 {offsets = [0, 128], sizes = [2, 64], strides = [1, 1]} : vector<2x256xf32> to vector<2x64xf32>
    %364 = math.tanh %363 : vector<2x64xf32>
    %365 = vector.extract_strided_slice %350 {offsets = [0, 192], sizes = [2, 64], strides = [1, 1]} : vector<2x256xf32> to vector<2x64xf32>
    %366 = arith.negf %365 : vector<2x64xf32>
    %367 = math.exp %366 : vector<2x64xf32>
    %cst_88 = arith.constant 1.000000e+00 : f32
    %368 = vector.broadcast %cst_88 : f32 to vector<2x64xf32>
    %369 = arith.addf %368, %367 : vector<2x64xf32>
    %370 = arith.divf %368, %369 : vector<2x64xf32>
    %371 = arith.mulf %362, %301 : vector<2x64xf32>
    %372 = arith.mulf %356, %364 : vector<2x64xf32>
    %373 = arith.addf %371, %372 : vector<2x64xf32>
    %374 = math.tanh %373 : vector<2x64xf32>
    %375 = arith.mulf %370, %374 : vector<2x64xf32>
    %376 = vector.extract_strided_slice %343 {offsets = [0, 0], sizes = [2, 16], strides = [1, 1]} : vector<2x32xf32> to vector<2x16xf32>
    %c8_89 = arith.constant 8 : index
    %c0_90 = arith.constant 0 : index
    %377 = vector.load %arg16[%c8_89, %c0_90] : memref<16x32xf32, #tpu.memory_space<vmem>>, vector<2x16xf32>
    tpu.vector_store %arg16[%c8_89, %c0_90], %376 {strides = array<i32>} : memref<16x32xf32, #tpu.memory_space<vmem>>, vector<2x16xf32>,
    %378 = vector.extract_strided_slice %343 {offsets = [0, 16], sizes = [2, 16], strides = [1, 1]} : vector<2x32xf32> to vector<2x16xf32>
    %c6_91 = arith.constant 6 : index
    %c16_92 = arith.constant 16 : index
    %379 = vector.load %arg16[%c6_91, %c16_92] : memref<16x32xf32, #tpu.memory_space<vmem>>, vector<2x16xf32>
    tpu.vector_store %arg16[%c6_91, %c16_92], %378 {strides = array<i32>} : memref<16x32xf32, #tpu.memory_space<vmem>>, vector<2x16xf32>,
    %380 = vector.extract_strided_slice %375 {offsets = [0, 0], sizes = [2, 32], strides = [1, 1]} : vector<2x64xf32> to vector<2x32xf32>
    %c8_93 = arith.constant 8 : index
    %c0_94 = arith.constant 0 : index
    %381 = vector.load %arg17[%c8_93, %c0_94] : memref<16x64xf32, #tpu.memory_space<vmem>>, vector<2x32xf32>
    tpu.vector_store %arg17[%c8_93, %c0_94], %380 {strides = array<i32>} : memref<16x64xf32, #tpu.memory_space<vmem>>, vector<2x32xf32>,
    %382 = vector.extract_strided_slice %375 {offsets = [0, 32], sizes = [2, 32], strides = [1, 1]} : vector<2x64xf32> to vector<2x32xf32>
    %c6_95 = arith.constant 6 : index
    %c32_96 = arith.constant 32 : index
    %383 = vector.load %arg17[%c6_95, %c32_96] : memref<16x64xf32, #tpu.memory_space<vmem>>, vector<2x32xf32>
    tpu.vector_store %arg17[%c6_95, %c32_96], %382 {strides = array<i32>} : memref<16x64xf32, #tpu.memory_space<vmem>>, vector<2x32xf32>,
    %384 = vector.extract_strided_slice %12 {offsets = [10, 0], sizes = [2, 128], strides = [1, 1]} : vector<16x128xf32> to vector<2x128xf32>
    %385 = vector.extract_strided_slice %12 {offsets = [4, 0], sizes = [2, 128], strides = [1, 1]} : vector<16x128xf32> to vector<2x128xf32>
    %386 = vector.shape_cast %2 : vector<1x128xi1> to vector<1x128xi1>
    %387 = vector.broadcast %386 : vector<1x128xi1> to vector<2x128xi1>
    %388 = arith.select %387, %384, %385 : vector<2x128xi1>, vector<2x128xf32>
    %cst_97 = arith.constant dense<0.000000e+00> : vector<2x128xf32>
    %389 = tpu.matmul %343, %18, %cst_97 {dimension_numbers = #tpu.dot_dimension_numbers<[1], [0], [0], [1], [0, 0, 1, 1], [], []>} : vector<2x32xf32>, vector<32x128xf32>, vector<2x128xf32> -> vector<2x128xf32>
    %390 = arith.addf %388, %389 : vector<2x128xf32>
    %391 = vector.extract_strided_slice %390 {offsets = [0, 0], sizes = [2, 32], strides = [1, 1]} : vector<2x128xf32> to vector<2x32xf32>
    %392 = arith.negf %391 : vector<2x32xf32>
    %393 = math.exp %392 : vector<2x32xf32>
    %cst_98 = arith.constant 1.000000e+00 : f32
    %394 = vector.broadcast %cst_98 : f32 to vector<2x32xf32>
    %395 = arith.addf %394, %393 : vector<2x32xf32>
    %396 = arith.divf %394, %395 : vector<2x32xf32>
    %397 = vector.extract_strided_slice %390 {offsets = [0, 32], sizes = [2, 32], strides = [1, 1]} : vector<2x128xf32> to vector<2x32xf32>
    %398 = arith.negf %397 : vector<2x32xf32>
    %399 = math.exp %398 : vector<2x32xf32>
    %cst_99 = arith.constant 1.000000e+00 : f32
    %400 = vector.broadcast %cst_99 : f32 to vector<2x32xf32>
    %401 = arith.addf %400, %399 : vector<2x32xf32>
    %402 = arith.divf %400, %401 : vector<2x32xf32>
    %403 = vector.extract_strided_slice %390 {offsets = [0, 64], sizes = [2, 32], strides = [1, 1]} : vector<2x128xf32> to vector<2x32xf32>
    %404 = math.tanh %403 : vector<2x32xf32>
    %405 = vector.extract_strided_slice %390 {offsets = [0, 96], sizes = [2, 32], strides = [1, 1]} : vector<2x128xf32> to vector<2x32xf32>
    %406 = arith.negf %405 : vector<2x32xf32>
    %407 = math.exp %406 : vector<2x32xf32>
    %cst_100 = arith.constant 1.000000e+00 : f32
    %408 = vector.broadcast %cst_100 : f32 to vector<2x32xf32>
    %409 = arith.addf %408, %407 : vector<2x32xf32>
    %410 = arith.divf %408, %409 : vector<2x32xf32>
    %411 = arith.mulf %402, %341 : vector<2x32xf32>
    %412 = arith.mulf %396, %404 : vector<2x32xf32>
    %413 = arith.addf %411, %412 : vector<2x32xf32>
    %414 = math.tanh %413 : vector<2x32xf32>
    %415 = arith.mulf %410, %414 : vector<2x32xf32>
    %416 = vector.extract_strided_slice %17 {offsets = [10, 0], sizes = [2, 256], strides = [1, 1]} : vector<16x256xf32> to vector<2x256xf32>
    %417 = vector.extract_strided_slice %17 {offsets = [4, 0], sizes = [2, 256], strides = [1, 1]} : vector<16x256xf32> to vector<2x256xf32>
    %418 = vector.shape_cast %5 : vector<1x256xi1> to vector<1x256xi1>
    %419 = vector.broadcast %418 : vector<1x256xi1> to vector<2x256xi1>
    %420 = arith.select %419, %416, %417 : vector<2x256xi1>, vector<2x256xf32>
    %cst_101 = arith.constant dense<0.000000e+00> : vector<2x256xf32>
    %421 = tpu.matmul %375, %19, %cst_101 {dimension_numbers = #tpu.dot_dimension_numbers<[1], [0], [0], [1], [0, 0, 1, 1], [], []>} : vector<2x64xf32>, vector<64x256xf32>, vector<2x256xf32> -> vector<2x256xf32>
    %422 = arith.addf %420, %421 : vector<2x256xf32>
    %423 = vector.extract_strided_slice %422 {offsets = [0, 0], sizes = [2, 64], strides = [1, 1]} : vector<2x256xf32> to vector<2x64xf32>
    %424 = arith.negf %423 : vector<2x64xf32>
    %425 = math.exp %424 : vector<2x64xf32>
    %cst_102 = arith.constant 1.000000e+00 : f32
    %426 = vector.broadcast %cst_102 : f32 to vector<2x64xf32>
    %427 = arith.addf %426, %425 : vector<2x64xf32>
    %428 = arith.divf %426, %427 : vector<2x64xf32>
    %429 = vector.extract_strided_slice %422 {offsets = [0, 64], sizes = [2, 64], strides = [1, 1]} : vector<2x256xf32> to vector<2x64xf32>
    %430 = arith.negf %429 : vector<2x64xf32>
    %431 = math.exp %430 : vector<2x64xf32>
    %cst_103 = arith.constant 1.000000e+00 : f32
    %432 = vector.broadcast %cst_103 : f32 to vector<2x64xf32>
    %433 = arith.addf %432, %431 : vector<2x64xf32>
    %434 = arith.divf %432, %433 : vector<2x64xf32>
    %435 = vector.extract_strided_slice %422 {offsets = [0, 128], sizes = [2, 64], strides = [1, 1]} : vector<2x256xf32> to vector<2x64xf32>
    %436 = math.tanh %435 : vector<2x64xf32>
    %437 = vector.extract_strided_slice %422 {offsets = [0, 192], sizes = [2, 64], strides = [1, 1]} : vector<2x256xf32> to vector<2x64xf32>
    %438 = arith.negf %437 : vector<2x64xf32>
    %439 = math.exp %438 : vector<2x64xf32>
    %cst_104 = arith.constant 1.000000e+00 : f32
    %440 = vector.broadcast %cst_104 : f32 to vector<2x64xf32>
    %441 = arith.addf %440, %439 : vector<2x64xf32>
    %442 = arith.divf %440, %441 : vector<2x64xf32>
    %443 = arith.mulf %434, %373 : vector<2x64xf32>
    %444 = arith.mulf %428, %436 : vector<2x64xf32>
    %445 = arith.addf %443, %444 : vector<2x64xf32>
    %446 = math.tanh %445 : vector<2x64xf32>
    %447 = arith.mulf %442, %446 : vector<2x64xf32>
    %448 = vector.extract_strided_slice %415 {offsets = [0, 0], sizes = [2, 16], strides = [1, 1]} : vector<2x32xf32> to vector<2x16xf32>
    %c10_105 = arith.constant 10 : index
    %c0_106 = arith.constant 0 : index
    %449 = vector.load %arg16[%c10_105, %c0_106] : memref<16x32xf32, #tpu.memory_space<vmem>>, vector<2x16xf32>
    tpu.vector_store %arg16[%c10_105, %c0_106], %448 {strides = array<i32>} : memref<16x32xf32, #tpu.memory_space<vmem>>, vector<2x16xf32>,
    %450 = vector.extract_strided_slice %415 {offsets = [0, 16], sizes = [2, 16], strides = [1, 1]} : vector<2x32xf32> to vector<2x16xf32>
    %c4_107 = arith.constant 4 : index
    %c16_108 = arith.constant 16 : index
    %451 = vector.load %arg16[%c4_107, %c16_108] : memref<16x32xf32, #tpu.memory_space<vmem>>, vector<2x16xf32>
    tpu.vector_store %arg16[%c4_107, %c16_108], %450 {strides = array<i32>} : memref<16x32xf32, #tpu.memory_space<vmem>>, vector<2x16xf32>,
    %452 = vector.extract_strided_slice %447 {offsets = [0, 0], sizes = [2, 32], strides = [1, 1]} : vector<2x64xf32> to vector<2x32xf32>
    %c10_109 = arith.constant 10 : index
    %c0_110 = arith.constant 0 : index
    %453 = vector.load %arg17[%c10_109, %c0_110] : memref<16x64xf32, #tpu.memory_space<vmem>>, vector<2x32xf32>
    tpu.vector_store %arg17[%c10_109, %c0_110], %452 {strides = array<i32>} : memref<16x64xf32, #tpu.memory_space<vmem>>, vector<2x32xf32>,
    %454 = vector.extract_strided_slice %447 {offsets = [0, 32], sizes = [2, 32], strides = [1, 1]} : vector<2x64xf32> to vector<2x32xf32>
    %c4_111 = arith.constant 4 : index
    %c32_112 = arith.constant 32 : index
    %455 = vector.load %arg17[%c4_111, %c32_112] : memref<16x64xf32, #tpu.memory_space<vmem>>, vector<2x32xf32>
    tpu.vector_store %arg17[%c4_111, %c32_112], %454 {strides = array<i32>} : memref<16x64xf32, #tpu.memory_space<vmem>>, vector<2x32xf32>,
    %456 = vector.extract_strided_slice %12 {offsets = [12, 0], sizes = [2, 128], strides = [1, 1]} : vector<16x128xf32> to vector<2x128xf32>
    %457 = vector.extract_strided_slice %12 {offsets = [2, 0], sizes = [2, 128], strides = [1, 1]} : vector<16x128xf32> to vector<2x128xf32>
    %458 = vector.shape_cast %2 : vector<1x128xi1> to vector<1x128xi1>
    %459 = vector.broadcast %458 : vector<1x128xi1> to vector<2x128xi1>
    %460 = arith.select %459, %456, %457 : vector<2x128xi1>, vector<2x128xf32>
    %cst_113 = arith.constant dense<0.000000e+00> : vector<2x128xf32>
    %461 = tpu.matmul %415, %18, %cst_113 {dimension_numbers = #tpu.dot_dimension_numbers<[1], [0], [0], [1], [0, 0, 1, 1], [], []>} : vector<2x32xf32>, vector<32x128xf32>, vector<2x128xf32> -> vector<2x128xf32>
    %462 = arith.addf %460, %461 : vector<2x128xf32>
    %463 = vector.extract_strided_slice %462 {offsets = [0, 0], sizes = [2, 32], strides = [1, 1]} : vector<2x128xf32> to vector<2x32xf32>
    %464 = arith.negf %463 : vector<2x32xf32>
    %465 = math.exp %464 : vector<2x32xf32>
    %cst_114 = arith.constant 1.000000e+00 : f32
    %466 = vector.broadcast %cst_114 : f32 to vector<2x32xf32>
    %467 = arith.addf %466, %465 : vector<2x32xf32>
    %468 = arith.divf %466, %467 : vector<2x32xf32>
    %469 = vector.extract_strided_slice %462 {offsets = [0, 32], sizes = [2, 32], strides = [1, 1]} : vector<2x128xf32> to vector<2x32xf32>
    %470 = arith.negf %469 : vector<2x32xf32>
    %471 = math.exp %470 : vector<2x32xf32>
    %cst_115 = arith.constant 1.000000e+00 : f32
    %472 = vector.broadcast %cst_115 : f32 to vector<2x32xf32>
    %473 = arith.addf %472, %471 : vector<2x32xf32>
    %474 = arith.divf %472, %473 : vector<2x32xf32>
    %475 = vector.extract_strided_slice %462 {offsets = [0, 64], sizes = [2, 32], strides = [1, 1]} : vector<2x128xf32> to vector<2x32xf32>
    %476 = math.tanh %475 : vector<2x32xf32>
    %477 = vector.extract_strided_slice %462 {offsets = [0, 96], sizes = [2, 32], strides = [1, 1]} : vector<2x128xf32> to vector<2x32xf32>
    %478 = arith.negf %477 : vector<2x32xf32>
    %479 = math.exp %478 : vector<2x32xf32>
    %cst_116 = arith.constant 1.000000e+00 : f32
    %480 = vector.broadcast %cst_116 : f32 to vector<2x32xf32>
    %481 = arith.addf %480, %479 : vector<2x32xf32>
    %482 = arith.divf %480, %481 : vector<2x32xf32>
    %483 = arith.mulf %474, %413 : vector<2x32xf32>
    %484 = arith.mulf %468, %476 : vector<2x32xf32>
    %485 = arith.addf %483, %484 : vector<2x32xf32>
    %486 = math.tanh %485 : vector<2x32xf32>
    %487 = arith.mulf %482, %486 : vector<2x32xf32>
    %488 = vector.extract_strided_slice %17 {offsets = [12, 0], sizes = [2, 256], strides = [1, 1]} : vector<16x256xf32> to vector<2x256xf32>
    %489 = vector.extract_strided_slice %17 {offsets = [2, 0], sizes = [2, 256], strides = [1, 1]} : vector<16x256xf32> to vector<2x256xf32>
    %490 = vector.shape_cast %5 : vector<1x256xi1> to vector<1x256xi1>
    %491 = vector.broadcast %490 : vector<1x256xi1> to vector<2x256xi1>
    %492 = arith.select %491, %488, %489 : vector<2x256xi1>, vector<2x256xf32>
    %cst_117 = arith.constant dense<0.000000e+00> : vector<2x256xf32>
    %493 = tpu.matmul %447, %19, %cst_117 {dimension_numbers = #tpu.dot_dimension_numbers<[1], [0], [0], [1], [0, 0, 1, 1], [], []>} : vector<2x64xf32>, vector<64x256xf32>, vector<2x256xf32> -> vector<2x256xf32>
    %494 = arith.addf %492, %493 : vector<2x256xf32>
    %495 = vector.extract_strided_slice %494 {offsets = [0, 0], sizes = [2, 64], strides = [1, 1]} : vector<2x256xf32> to vector<2x64xf32>
    %496 = arith.negf %495 : vector<2x64xf32>
    %497 = math.exp %496 : vector<2x64xf32>
    %cst_118 = arith.constant 1.000000e+00 : f32
    %498 = vector.broadcast %cst_118 : f32 to vector<2x64xf32>
    %499 = arith.addf %498, %497 : vector<2x64xf32>
    %500 = arith.divf %498, %499 : vector<2x64xf32>
    %501 = vector.extract_strided_slice %494 {offsets = [0, 64], sizes = [2, 64], strides = [1, 1]} : vector<2x256xf32> to vector<2x64xf32>
    %502 = arith.negf %501 : vector<2x64xf32>
    %503 = math.exp %502 : vector<2x64xf32>
    %cst_119 = arith.constant 1.000000e+00 : f32
    %504 = vector.broadcast %cst_119 : f32 to vector<2x64xf32>
    %505 = arith.addf %504, %503 : vector<2x64xf32>
    %506 = arith.divf %504, %505 : vector<2x64xf32>
    %507 = vector.extract_strided_slice %494 {offsets = [0, 128], sizes = [2, 64], strides = [1, 1]} : vector<2x256xf32> to vector<2x64xf32>
    %508 = math.tanh %507 : vector<2x64xf32>
    %509 = vector.extract_strided_slice %494 {offsets = [0, 192], sizes = [2, 64], strides = [1, 1]} : vector<2x256xf32> to vector<2x64xf32>
    %510 = arith.negf %509 : vector<2x64xf32>
    %511 = math.exp %510 : vector<2x64xf32>
    %cst_120 = arith.constant 1.000000e+00 : f32
    %512 = vector.broadcast %cst_120 : f32 to vector<2x64xf32>
    %513 = arith.addf %512, %511 : vector<2x64xf32>
    %514 = arith.divf %512, %513 : vector<2x64xf32>
    %515 = arith.mulf %506, %445 : vector<2x64xf32>
    %516 = arith.mulf %500, %508 : vector<2x64xf32>
    %517 = arith.addf %515, %516 : vector<2x64xf32>
    %518 = math.tanh %517 : vector<2x64xf32>
    %519 = arith.mulf %514, %518 : vector<2x64xf32>
    %520 = vector.extract_strided_slice %487 {offsets = [0, 0], sizes = [2, 16], strides = [1, 1]} : vector<2x32xf32> to vector<2x16xf32>
    %c12_121 = arith.constant 12 : index
    %c0_122 = arith.constant 0 : index
    %521 = vector.load %arg16[%c12_121, %c0_122] : memref<16x32xf32, #tpu.memory_space<vmem>>, vector<2x16xf32>
    tpu.vector_store %arg16[%c12_121, %c0_122], %520 {strides = array<i32>} : memref<16x32xf32, #tpu.memory_space<vmem>>, vector<2x16xf32>,
    %522 = vector.extract_strided_slice %487 {offsets = [0, 16], sizes = [2, 16], strides = [1, 1]} : vector<2x32xf32> to vector<2x16xf32>
    %c2_123 = arith.constant 2 : index
    %c16_124 = arith.constant 16 : index
    %523 = vector.load %arg16[%c2_123, %c16_124] : memref<16x32xf32, #tpu.memory_space<vmem>>, vector<2x16xf32>
    tpu.vector_store %arg16[%c2_123, %c16_124], %522 {strides = array<i32>} : memref<16x32xf32, #tpu.memory_space<vmem>>, vector<2x16xf32>,
    %524 = vector.extract_strided_slice %519 {offsets = [0, 0], sizes = [2, 32], strides = [1, 1]} : vector<2x64xf32> to vector<2x32xf32>
    %c12_125 = arith.constant 12 : index
    %c0_126 = arith.constant 0 : index
    %525 = vector.load %arg17[%c12_125, %c0_126] : memref<16x64xf32, #tpu.memory_space<vmem>>, vector<2x32xf32>
    tpu.vector_store %arg17[%c12_125, %c0_126], %524 {strides = array<i32>} : memref<16x64xf32, #tpu.memory_space<vmem>>, vector<2x32xf32>,
    %526 = vector.extract_strided_slice %519 {offsets = [0, 32], sizes = [2, 32], strides = [1, 1]} : vector<2x64xf32> to vector<2x32xf32>
    %c2_127 = arith.constant 2 : index
    %c32_128 = arith.constant 32 : index
    %527 = vector.load %arg17[%c2_127, %c32_128] : memref<16x64xf32, #tpu.memory_space<vmem>>, vector<2x32xf32>
    tpu.vector_store %arg17[%c2_127, %c32_128], %526 {strides = array<i32>} : memref<16x64xf32, #tpu.memory_space<vmem>>, vector<2x32xf32>,
    %528 = vector.extract_strided_slice %12 {offsets = [14, 0], sizes = [2, 128], strides = [1, 1]} : vector<16x128xf32> to vector<2x128xf32>
    %529 = vector.extract_strided_slice %12 {offsets = [0, 0], sizes = [2, 128], strides = [1, 1]} : vector<16x128xf32> to vector<2x128xf32>
    %530 = vector.shape_cast %2 : vector<1x128xi1> to vector<1x128xi1>
    %531 = vector.broadcast %530 : vector<1x128xi1> to vector<2x128xi1>
    %532 = arith.select %531, %528, %529 : vector<2x128xi1>, vector<2x128xf32>
    %cst_129 = arith.constant dense<0.000000e+00> : vector<2x128xf32>
    %533 = tpu.matmul %487, %18, %cst_129 {dimension_numbers = #tpu.dot_dimension_numbers<[1], [0], [0], [1], [0, 0, 1, 1], [], []>} : vector<2x32xf32>, vector<32x128xf32>, vector<2x128xf32> -> vector<2x128xf32>
    %534 = arith.addf %532, %533 : vector<2x128xf32>
    %535 = vector.extract_strided_slice %534 {offsets = [0, 0], sizes = [2, 32], strides = [1, 1]} : vector<2x128xf32> to vector<2x32xf32>
    %536 = arith.negf %535 : vector<2x32xf32>
    %537 = math.exp %536 : vector<2x32xf32>
    %cst_130 = arith.constant 1.000000e+00 : f32
    %538 = vector.broadcast %cst_130 : f32 to vector<2x32xf32>
    %539 = arith.addf %538, %537 : vector<2x32xf32>
    %540 = arith.divf %538, %539 : vector<2x32xf32>
    %541 = vector.extract_strided_slice %534 {offsets = [0, 32], sizes = [2, 32], strides = [1, 1]} : vector<2x128xf32> to vector<2x32xf32>
    %542 = arith.negf %541 : vector<2x32xf32>
    %543 = math.exp %542 : vector<2x32xf32>
    %cst_131 = arith.constant 1.000000e+00 : f32
    %544 = vector.broadcast %cst_131 : f32 to vector<2x32xf32>
    %545 = arith.addf %544, %543 : vector<2x32xf32>
    %546 = arith.divf %544, %545 : vector<2x32xf32>
    %547 = vector.extract_strided_slice %534 {offsets = [0, 64], sizes = [2, 32], strides = [1, 1]} : vector<2x128xf32> to vector<2x32xf32>
    %548 = math.tanh %547 : vector<2x32xf32>
    %549 = vector.extract_strided_slice %534 {offsets = [0, 96], sizes = [2, 32], strides = [1, 1]} : vector<2x128xf32> to vector<2x32xf32>
    %550 = arith.negf %549 : vector<2x32xf32>
    %551 = math.exp %550 : vector<2x32xf32>
    %cst_132 = arith.constant 1.000000e+00 : f32
    %552 = vector.broadcast %cst_132 : f32 to vector<2x32xf32>
    %553 = arith.addf %552, %551 : vector<2x32xf32>
    %554 = arith.divf %552, %553 : vector<2x32xf32>
    %555 = arith.mulf %546, %485 : vector<2x32xf32>
    %556 = arith.mulf %540, %548 : vector<2x32xf32>
    %557 = arith.addf %555, %556 : vector<2x32xf32>
    %558 = math.tanh %557 : vector<2x32xf32>
    %559 = arith.mulf %554, %558 : vector<2x32xf32>
    %560 = vector.extract_strided_slice %17 {offsets = [14, 0], sizes = [2, 256], strides = [1, 1]} : vector<16x256xf32> to vector<2x256xf32>
    %561 = vector.extract_strided_slice %17 {offsets = [0, 0], sizes = [2, 256], strides = [1, 1]} : vector<16x256xf32> to vector<2x256xf32>
    %562 = vector.shape_cast %5 : vector<1x256xi1> to vector<1x256xi1>
    %563 = vector.broadcast %562 : vector<1x256xi1> to vector<2x256xi1>
    %564 = arith.select %563, %560, %561 : vector<2x256xi1>, vector<2x256xf32>
    %cst_133 = arith.constant dense<0.000000e+00> : vector<2x256xf32>
    %565 = tpu.matmul %519, %19, %cst_133 {dimension_numbers = #tpu.dot_dimension_numbers<[1], [0], [0], [1], [0, 0, 1, 1], [], []>} : vector<2x64xf32>, vector<64x256xf32>, vector<2x256xf32> -> vector<2x256xf32>
    %566 = arith.addf %564, %565 : vector<2x256xf32>
    %567 = vector.extract_strided_slice %566 {offsets = [0, 0], sizes = [2, 64], strides = [1, 1]} : vector<2x256xf32> to vector<2x64xf32>
    %568 = arith.negf %567 : vector<2x64xf32>
    %569 = math.exp %568 : vector<2x64xf32>
    %cst_134 = arith.constant 1.000000e+00 : f32
    %570 = vector.broadcast %cst_134 : f32 to vector<2x64xf32>
    %571 = arith.addf %570, %569 : vector<2x64xf32>
    %572 = arith.divf %570, %571 : vector<2x64xf32>
    %573 = vector.extract_strided_slice %566 {offsets = [0, 64], sizes = [2, 64], strides = [1, 1]} : vector<2x256xf32> to vector<2x64xf32>
    %574 = arith.negf %573 : vector<2x64xf32>
    %575 = math.exp %574 : vector<2x64xf32>
    %cst_135 = arith.constant 1.000000e+00 : f32
    %576 = vector.broadcast %cst_135 : f32 to vector<2x64xf32>
    %577 = arith.addf %576, %575 : vector<2x64xf32>
    %578 = arith.divf %576, %577 : vector<2x64xf32>
    %579 = vector.extract_strided_slice %566 {offsets = [0, 128], sizes = [2, 64], strides = [1, 1]} : vector<2x256xf32> to vector<2x64xf32>
    %580 = math.tanh %579 : vector<2x64xf32>
    %581 = vector.extract_strided_slice %566 {offsets = [0, 192], sizes = [2, 64], strides = [1, 1]} : vector<2x256xf32> to vector<2x64xf32>
    %582 = arith.negf %581 : vector<2x64xf32>
    %583 = math.exp %582 : vector<2x64xf32>
    %cst_136 = arith.constant 1.000000e+00 : f32
    %584 = vector.broadcast %cst_136 : f32 to vector<2x64xf32>
    %585 = arith.addf %584, %583 : vector<2x64xf32>
    %586 = arith.divf %584, %585 : vector<2x64xf32>
    %587 = arith.mulf %578, %517 : vector<2x64xf32>
    %588 = arith.mulf %572, %580 : vector<2x64xf32>
    %589 = arith.addf %587, %588 : vector<2x64xf32>
    %590 = math.tanh %589 : vector<2x64xf32>
    %591 = arith.mulf %586, %590 : vector<2x64xf32>
    %592 = vector.extract_strided_slice %559 {offsets = [0, 0], sizes = [2, 16], strides = [1, 1]} : vector<2x32xf32> to vector<2x16xf32>
    %c14_137 = arith.constant 14 : index
    %c0_138 = arith.constant 0 : index
    %593 = vector.load %arg16[%c14_137, %c0_138] : memref<16x32xf32, #tpu.memory_space<vmem>>, vector<2x16xf32>
    tpu.vector_store %arg16[%c14_137, %c0_138], %592 {strides = array<i32>} : memref<16x32xf32, #tpu.memory_space<vmem>>, vector<2x16xf32>,
    %594 = vector.extract_strided_slice %559 {offsets = [0, 16], sizes = [2, 16], strides = [1, 1]} : vector<2x32xf32> to vector<2x16xf32>
    %c0_139 = arith.constant 0 : index
    %c16_140 = arith.constant 16 : index
    %595 = vector.load %arg16[%c0_139, %c16_140] : memref<16x32xf32, #tpu.memory_space<vmem>>, vector<2x16xf32>
    tpu.vector_store %arg16[%c0_139, %c16_140], %594 {strides = array<i32>} : memref<16x32xf32, #tpu.memory_space<vmem>>, vector<2x16xf32>,
    %596 = vector.extract_strided_slice %591 {offsets = [0, 0], sizes = [2, 32], strides = [1, 1]} : vector<2x64xf32> to vector<2x32xf32>
    %c14_141 = arith.constant 14 : index
    %c0_142 = arith.constant 0 : index
    %597 = vector.load %arg17[%c14_141, %c0_142] : memref<16x64xf32, #tpu.memory_space<vmem>>, vector<2x32xf32>
    tpu.vector_store %arg17[%c14_141, %c0_142], %596 {strides = array<i32>} : memref<16x64xf32, #tpu.memory_space<vmem>>, vector<2x32xf32>,
    %598 = vector.extract_strided_slice %591 {offsets = [0, 32], sizes = [2, 32], strides = [1, 1]} : vector<2x64xf32> to vector<2x32xf32>
    %c0_143 = arith.constant 0 : index
    %c32_144 = arith.constant 32 : index
    %599 = vector.load %arg17[%c0_143, %c32_144] : memref<16x64xf32, #tpu.memory_space<vmem>>, vector<2x32xf32>
    tpu.vector_store %arg17[%c0_143, %c32_144], %598 {strides = array<i32>} : memref<16x64xf32, #tpu.memory_space<vmem>>, vector<2x32xf32>,
    %c0_145 = arith.constant 0 : index
    %c0_146 = arith.constant 0 : index
    %600 = vector.load %arg16[%c0_145, %c0_146] : memref<16x32xf32, #tpu.memory_space<vmem>>, vector<16x32xf32>
    %c0_147 = arith.constant 0 : index
    %c0_148 = arith.constant 0 : index
    %601 = vector.load %arg17[%c0_147, %c0_148] : memref<16x64xf32, #tpu.memory_space<vmem>>, vector<16x64xf32>
    %c0_149 = arith.constant 0 : index
    %c0_150 = arith.constant 0 : index
    %602 = vector.load %arg7[%c0_149, %c0_150] : memref<32x128xf32, #tpu.memory_space<vmem>>, vector<32x128xf32>
    %cst_151 = arith.constant dense<0.000000e+00> : vector<16x128xf32>
    %603 = tpu.matmul %600, %602, %cst_151 {dimension_numbers = #tpu.dot_dimension_numbers<[1], [0], [0], [1], [0, 0, 1, 1], [], []>} : vector<16x32xf32>, vector<32x128xf32>, vector<16x128xf32> -> vector<16x128xf32>
    %c0_152 = arith.constant 0 : index
    %c0_153 = arith.constant 0 : index
    %604 = vector.load %arg9[%c0_152, %c0_153] : memref<1x128xf32, #tpu.memory_space<vmem>>, vector<1x128xf32>
    %605 = vector.broadcast %604 : vector<1x128xf32> to vector<16x128xf32>
    %606 = arith.addf %603, %605 : vector<16x128xf32>
    %c0_154 = arith.constant 0 : index
    %c0_155 = arith.constant 0 : index
    %607 = vector.load %arg13[%c0_154, %c0_155] : memref<64x256xf32, #tpu.memory_space<vmem>>, vector<64x256xf32>
    %cst_156 = arith.constant dense<0.000000e+00> : vector<16x256xf32>
    %608 = tpu.matmul %601, %607, %cst_156 {dimension_numbers = #tpu.dot_dimension_numbers<[1], [0], [0], [1], [0, 0, 1, 1], [], []>} : vector<16x64xf32>, vector<64x256xf32>, vector<16x256xf32> -> vector<16x256xf32>
    %c0_157 = arith.constant 0 : index
    %c0_158 = arith.constant 0 : index
    %609 = vector.load %arg15[%c0_157, %c0_158] : memref<1x256xf32, #tpu.memory_space<vmem>>, vector<1x256xf32>
    %610 = vector.broadcast %609 : vector<1x256xf32> to vector<16x256xf32>
    %611 = arith.addf %608, %610 : vector<16x256xf32>
    %c0_159 = arith.constant 0 : index
    %c0_160 = arith.constant 0 : index
    %612 = vector.load %arg8[%c0_159, %c0_160] : memref<32x128xf32, #tpu.memory_space<vmem>>, vector<32x128xf32>
    %c0_161 = arith.constant 0 : index
    %c0_162 = arith.constant 0 : index
    %613 = vector.load %arg14[%c0_161, %c0_162] : memref<64x256xf32, #tpu.memory_space<vmem>>, vector<64x256xf32>
    %cst_163 = arith.constant 0.000000e+00 : f32
    %614 = vector.broadcast %cst_163 : f32 to vector<2x32xf32>
    %cst_164 = arith.constant 0.000000e+00 : f32
    %615 = vector.broadcast %cst_164 : f32 to vector<2x32xf32>
    %cst_165 = arith.constant 0.000000e+00 : f32
    %616 = vector.broadcast %cst_165 : f32 to vector<2x64xf32>
    %cst_166 = arith.constant 0.000000e+00 : f32
    %617 = vector.broadcast %cst_166 : f32 to vector<2x64xf32>
    %618 = vector.extract_strided_slice %606 {offsets = [0, 0], sizes = [2, 128], strides = [1, 1]} : vector<16x128xf32> to vector<2x128xf32>
    %619 = vector.extract_strided_slice %606 {offsets = [14, 0], sizes = [2, 128], strides = [1, 1]} : vector<16x128xf32> to vector<2x128xf32>
    %620 = vector.shape_cast %2 : vector<1x128xi1> to vector<1x128xi1>
    %621 = vector.broadcast %620 : vector<1x128xi1> to vector<2x128xi1>
    %622 = arith.select %621, %618, %619 : vector<2x128xi1>, vector<2x128xf32>
    %cst_167 = arith.constant dense<0.000000e+00> : vector<2x128xf32>
    %623 = tpu.matmul %614, %612, %cst_167 {dimension_numbers = #tpu.dot_dimension_numbers<[1], [0], [0], [1], [0, 0, 1, 1], [], []>} : vector<2x32xf32>, vector<32x128xf32>, vector<2x128xf32> -> vector<2x128xf32>
    %624 = arith.addf %622, %623 : vector<2x128xf32>
    %625 = vector.extract_strided_slice %624 {offsets = [0, 0], sizes = [2, 32], strides = [1, 1]} : vector<2x128xf32> to vector<2x32xf32>
    %626 = arith.negf %625 : vector<2x32xf32>
    %627 = math.exp %626 : vector<2x32xf32>
    %cst_168 = arith.constant 1.000000e+00 : f32
    %628 = vector.broadcast %cst_168 : f32 to vector<2x32xf32>
    %629 = arith.addf %628, %627 : vector<2x32xf32>
    %630 = arith.divf %628, %629 : vector<2x32xf32>
    %631 = vector.extract_strided_slice %624 {offsets = [0, 32], sizes = [2, 32], strides = [1, 1]} : vector<2x128xf32> to vector<2x32xf32>
    %632 = arith.negf %631 : vector<2x32xf32>
    %633 = math.exp %632 : vector<2x32xf32>
    %cst_169 = arith.constant 1.000000e+00 : f32
    %634 = vector.broadcast %cst_169 : f32 to vector<2x32xf32>
    %635 = arith.addf %634, %633 : vector<2x32xf32>
    %636 = arith.divf %634, %635 : vector<2x32xf32>
    %637 = vector.extract_strided_slice %624 {offsets = [0, 64], sizes = [2, 32], strides = [1, 1]} : vector<2x128xf32> to vector<2x32xf32>
    %638 = math.tanh %637 : vector<2x32xf32>
    %639 = vector.extract_strided_slice %624 {offsets = [0, 96], sizes = [2, 32], strides = [1, 1]} : vector<2x128xf32> to vector<2x32xf32>
    %640 = arith.negf %639 : vector<2x32xf32>
    %641 = math.exp %640 : vector<2x32xf32>
    %cst_170 = arith.constant 1.000000e+00 : f32
    %642 = vector.broadcast %cst_170 : f32 to vector<2x32xf32>
    %643 = arith.addf %642, %641 : vector<2x32xf32>
    %644 = arith.divf %642, %643 : vector<2x32xf32>
    %645 = arith.mulf %636, %615 : vector<2x32xf32>
    %646 = arith.mulf %630, %638 : vector<2x32xf32>
    %647 = arith.addf %645, %646 : vector<2x32xf32>
    %648 = math.tanh %647 : vector<2x32xf32>
    %649 = arith.mulf %644, %648 : vector<2x32xf32>
    %650 = vector.extract_strided_slice %611 {offsets = [0, 0], sizes = [2, 256], strides = [1, 1]} : vector<16x256xf32> to vector<2x256xf32>
    %651 = vector.extract_strided_slice %611 {offsets = [14, 0], sizes = [2, 256], strides = [1, 1]} : vector<16x256xf32> to vector<2x256xf32>
    %652 = vector.shape_cast %5 : vector<1x256xi1> to vector<1x256xi1>
    %653 = vector.broadcast %652 : vector<1x256xi1> to vector<2x256xi1>
    %654 = arith.select %653, %650, %651 : vector<2x256xi1>, vector<2x256xf32>
    %cst_171 = arith.constant dense<0.000000e+00> : vector<2x256xf32>
    %655 = tpu.matmul %616, %613, %cst_171 {dimension_numbers = #tpu.dot_dimension_numbers<[1], [0], [0], [1], [0, 0, 1, 1], [], []>} : vector<2x64xf32>, vector<64x256xf32>, vector<2x256xf32> -> vector<2x256xf32>
    %656 = arith.addf %654, %655 : vector<2x256xf32>
    %657 = vector.extract_strided_slice %656 {offsets = [0, 0], sizes = [2, 64], strides = [1, 1]} : vector<2x256xf32> to vector<2x64xf32>
    %658 = arith.negf %657 : vector<2x64xf32>
    %659 = math.exp %658 : vector<2x64xf32>
    %cst_172 = arith.constant 1.000000e+00 : f32
    %660 = vector.broadcast %cst_172 : f32 to vector<2x64xf32>
    %661 = arith.addf %660, %659 : vector<2x64xf32>
    %662 = arith.divf %660, %661 : vector<2x64xf32>
    %663 = vector.extract_strided_slice %656 {offsets = [0, 64], sizes = [2, 64], strides = [1, 1]} : vector<2x256xf32> to vector<2x64xf32>
    %664 = arith.negf %663 : vector<2x64xf32>
    %665 = math.exp %664 : vector<2x64xf32>
    %cst_173 = arith.constant 1.000000e+00 : f32
    %666 = vector.broadcast %cst_173 : f32 to vector<2x64xf32>
    %667 = arith.addf %666, %665 : vector<2x64xf32>
    %668 = arith.divf %666, %667 : vector<2x64xf32>
    %669 = vector.extract_strided_slice %656 {offsets = [0, 128], sizes = [2, 64], strides = [1, 1]} : vector<2x256xf32> to vector<2x64xf32>
    %670 = math.tanh %669 : vector<2x64xf32>
    %671 = vector.extract_strided_slice %656 {offsets = [0, 192], sizes = [2, 64], strides = [1, 1]} : vector<2x256xf32> to vector<2x64xf32>
    %672 = arith.negf %671 : vector<2x64xf32>
    %673 = math.exp %672 : vector<2x64xf32>
    %cst_174 = arith.constant 1.000000e+00 : f32
    %674 = vector.broadcast %cst_174 : f32 to vector<2x64xf32>
    %675 = arith.addf %674, %673 : vector<2x64xf32>
    %676 = arith.divf %674, %675 : vector<2x64xf32>
    %677 = arith.mulf %668, %617 : vector<2x64xf32>
    %678 = arith.mulf %662, %670 : vector<2x64xf32>
    %679 = arith.addf %677, %678 : vector<2x64xf32>
    %680 = math.tanh %679 : vector<2x64xf32>
    %681 = arith.mulf %676, %680 : vector<2x64xf32>
    %682 = vector.extract_strided_slice %649 {offsets = [0, 0], sizes = [2, 16], strides = [1, 1]} : vector<2x32xf32> to vector<2x16xf32>
    %c0_175 = arith.constant 0 : index
    %c0_176 = arith.constant 0 : index
    %683 = vector.load %arg16[%c0_175, %c0_176] : memref<16x32xf32, #tpu.memory_space<vmem>>, vector<2x16xf32>
    tpu.vector_store %arg16[%c0_175, %c0_176], %682 {strides = array<i32>} : memref<16x32xf32, #tpu.memory_space<vmem>>, vector<2x16xf32>,
    %684 = vector.extract_strided_slice %649 {offsets = [0, 16], sizes = [2, 16], strides = [1, 1]} : vector<2x32xf32> to vector<2x16xf32>
    %c14_177 = arith.constant 14 : index
    %c16_178 = arith.constant 16 : index
    %685 = vector.load %arg16[%c14_177, %c16_178] : memref<16x32xf32, #tpu.memory_space<vmem>>, vector<2x16xf32>
    tpu.vector_store %arg16[%c14_177, %c16_178], %684 {strides = array<i32>} : memref<16x32xf32, #tpu.memory_space<vmem>>, vector<2x16xf32>,
    %686 = vector.extract_strided_slice %681 {offsets = [0, 0], sizes = [2, 32], strides = [1, 1]} : vector<2x64xf32> to vector<2x32xf32>
    %c0_179 = arith.constant 0 : index
    %c0_180 = arith.constant 0 : index
    %687 = vector.load %arg17[%c0_179, %c0_180] : memref<16x64xf32, #tpu.memory_space<vmem>>, vector<2x32xf32>
    tpu.vector_store %arg17[%c0_179, %c0_180], %686 {strides = array<i32>} : memref<16x64xf32, #tpu.memory_space<vmem>>, vector<2x32xf32>,
    %688 = vector.extract_strided_slice %681 {offsets = [0, 32], sizes = [2, 32], strides = [1, 1]} : vector<2x64xf32> to vector<2x32xf32>
    %c14_181 = arith.constant 14 : index
    %c32_182 = arith.constant 32 : index
    %689 = vector.load %arg17[%c14_181, %c32_182] : memref<16x64xf32, #tpu.memory_space<vmem>>, vector<2x32xf32>
    tpu.vector_store %arg17[%c14_181, %c32_182], %688 {strides = array<i32>} : memref<16x64xf32, #tpu.memory_space<vmem>>, vector<2x32xf32>,
    %690 = vector.extract_strided_slice %606 {offsets = [2, 0], sizes = [2, 128], strides = [1, 1]} : vector<16x128xf32> to vector<2x128xf32>
    %691 = vector.extract_strided_slice %606 {offsets = [12, 0], sizes = [2, 128], strides = [1, 1]} : vector<16x128xf32> to vector<2x128xf32>
    %692 = vector.shape_cast %2 : vector<1x128xi1> to vector<1x128xi1>
    %693 = vector.broadcast %692 : vector<1x128xi1> to vector<2x128xi1>
    %694 = arith.select %693, %690, %691 : vector<2x128xi1>, vector<2x128xf32>
    %cst_183 = arith.constant dense<0.000000e+00> : vector<2x128xf32>
    %695 = tpu.matmul %649, %612, %cst_183 {dimension_numbers = #tpu.dot_dimension_numbers<[1], [0], [0], [1], [0, 0, 1, 1], [], []>} : vector<2x32xf32>, vector<32x128xf32>, vector<2x128xf32> -> vector<2x128xf32>
    %696 = arith.addf %694, %695 : vector<2x128xf32>
    %697 = vector.extract_strided_slice %696 {offsets = [0, 0], sizes = [2, 32], strides = [1, 1]} : vector<2x128xf32> to vector<2x32xf32>
    %698 = arith.negf %697 : vector<2x32xf32>
    %699 = math.exp %698 : vector<2x32xf32>
    %cst_184 = arith.constant 1.000000e+00 : f32
    %700 = vector.broadcast %cst_184 : f32 to vector<2x32xf32>
    %701 = arith.addf %700, %699 : vector<2x32xf32>
    %702 = arith.divf %700, %701 : vector<2x32xf32>
    %703 = vector.extract_strided_slice %696 {offsets = [0, 32], sizes = [2, 32], strides = [1, 1]} : vector<2x128xf32> to vector<2x32xf32>
    %704 = arith.negf %703 : vector<2x32xf32>
    %705 = math.exp %704 : vector<2x32xf32>
    %cst_185 = arith.constant 1.000000e+00 : f32
    %706 = vector.broadcast %cst_185 : f32 to vector<2x32xf32>
    %707 = arith.addf %706, %705 : vector<2x32xf32>
    %708 = arith.divf %706, %707 : vector<2x32xf32>
    %709 = vector.extract_strided_slice %696 {offsets = [0, 64], sizes = [2, 32], strides = [1, 1]} : vector<2x128xf32> to vector<2x32xf32>
    %710 = math.tanh %709 : vector<2x32xf32>
    %711 = vector.extract_strided_slice %696 {offsets = [0, 96], sizes = [2, 32], strides = [1, 1]} : vector<2x128xf32> to vector<2x32xf32>
    %712 = arith.negf %711 : vector<2x32xf32>
    %713 = math.exp %712 : vector<2x32xf32>
    %cst_186 = arith.constant 1.000000e+00 : f32
    %714 = vector.broadcast %cst_186 : f32 to vector<2x32xf32>
    %715 = arith.addf %714, %713 : vector<2x32xf32>
    %716 = arith.divf %714, %715 : vector<2x32xf32>
    %717 = arith.mulf %708, %647 : vector<2x32xf32>
    %718 = arith.mulf %702, %710 : vector<2x32xf32>
    %719 = arith.addf %717, %718 : vector<2x32xf32>
    %720 = math.tanh %719 : vector<2x32xf32>
    %721 = arith.mulf %716, %720 : vector<2x32xf32>
    %722 = vector.extract_strided_slice %611 {offsets = [2, 0], sizes = [2, 256], strides = [1, 1]} : vector<16x256xf32> to vector<2x256xf32>
    %723 = vector.extract_strided_slice %611 {offsets = [12, 0], sizes = [2, 256], strides = [1, 1]} : vector<16x256xf32> to vector<2x256xf32>
    %724 = vector.shape_cast %5 : vector<1x256xi1> to vector<1x256xi1>
    %725 = vector.broadcast %724 : vector<1x256xi1> to vector<2x256xi1>
    %726 = arith.select %725, %722, %723 : vector<2x256xi1>, vector<2x256xf32>
    %cst_187 = arith.constant dense<0.000000e+00> : vector<2x256xf32>
    %727 = tpu.matmul %681, %613, %cst_187 {dimension_numbers = #tpu.dot_dimension_numbers<[1], [0], [0], [1], [0, 0, 1, 1], [], []>} : vector<2x64xf32>, vector<64x256xf32>, vector<2x256xf32> -> vector<2x256xf32>
    %728 = arith.addf %726, %727 : vector<2x256xf32>
    %729 = vector.extract_strided_slice %728 {offsets = [0, 0], sizes = [2, 64], strides = [1, 1]} : vector<2x256xf32> to vector<2x64xf32>
    %730 = arith.negf %729 : vector<2x64xf32>
    %731 = math.exp %730 : vector<2x64xf32>
    %cst_188 = arith.constant 1.000000e+00 : f32
    %732 = vector.broadcast %cst_188 : f32 to vector<2x64xf32>
    %733 = arith.addf %732, %731 : vector<2x64xf32>
    %734 = arith.divf %732, %733 : vector<2x64xf32>
    %735 = vector.extract_strided_slice %728 {offsets = [0, 64], sizes = [2, 64], strides = [1, 1]} : vector<2x256xf32> to vector<2x64xf32>
    %736 = arith.negf %735 : vector<2x64xf32>
    %737 = math.exp %736 : vector<2x64xf32>
    %cst_189 = arith.constant 1.000000e+00 : f32
    %738 = vector.broadcast %cst_189 : f32 to vector<2x64xf32>
    %739 = arith.addf %738, %737 : vector<2x64xf32>
    %740 = arith.divf %738, %739 : vector<2x64xf32>
    %741 = vector.extract_strided_slice %728 {offsets = [0, 128], sizes = [2, 64], strides = [1, 1]} : vector<2x256xf32> to vector<2x64xf32>
    %742 = math.tanh %741 : vector<2x64xf32>
    %743 = vector.extract_strided_slice %728 {offsets = [0, 192], sizes = [2, 64], strides = [1, 1]} : vector<2x256xf32> to vector<2x64xf32>
    %744 = arith.negf %743 : vector<2x64xf32>
    %745 = math.exp %744 : vector<2x64xf32>
    %cst_190 = arith.constant 1.000000e+00 : f32
    %746 = vector.broadcast %cst_190 : f32 to vector<2x64xf32>
    %747 = arith.addf %746, %745 : vector<2x64xf32>
    %748 = arith.divf %746, %747 : vector<2x64xf32>
    %749 = arith.mulf %740, %679 : vector<2x64xf32>
    %750 = arith.mulf %734, %742 : vector<2x64xf32>
    %751 = arith.addf %749, %750 : vector<2x64xf32>
    %752 = math.tanh %751 : vector<2x64xf32>
    %753 = arith.mulf %748, %752 : vector<2x64xf32>
    %754 = vector.extract_strided_slice %721 {offsets = [0, 0], sizes = [2, 16], strides = [1, 1]} : vector<2x32xf32> to vector<2x16xf32>
    %c2_191 = arith.constant 2 : index
    %c0_192 = arith.constant 0 : index
    %755 = vector.load %arg16[%c2_191, %c0_192] : memref<16x32xf32, #tpu.memory_space<vmem>>, vector<2x16xf32>
    tpu.vector_store %arg16[%c2_191, %c0_192], %754 {strides = array<i32>} : memref<16x32xf32, #tpu.memory_space<vmem>>, vector<2x16xf32>,
    %756 = vector.extract_strided_slice %721 {offsets = [0, 16], sizes = [2, 16], strides = [1, 1]} : vector<2x32xf32> to vector<2x16xf32>
    %c12_193 = arith.constant 12 : index
    %c16_194 = arith.constant 16 : index
    %757 = vector.load %arg16[%c12_193, %c16_194] : memref<16x32xf32, #tpu.memory_space<vmem>>, vector<2x16xf32>
    tpu.vector_store %arg16[%c12_193, %c16_194], %756 {strides = array<i32>} : memref<16x32xf32, #tpu.memory_space<vmem>>, vector<2x16xf32>,
    %758 = vector.extract_strided_slice %753 {offsets = [0, 0], sizes = [2, 32], strides = [1, 1]} : vector<2x64xf32> to vector<2x32xf32>
    %c2_195 = arith.constant 2 : index
    %c0_196 = arith.constant 0 : index
    %759 = vector.load %arg17[%c2_195, %c0_196] : memref<16x64xf32, #tpu.memory_space<vmem>>, vector<2x32xf32>
    tpu.vector_store %arg17[%c2_195, %c0_196], %758 {strides = array<i32>} : memref<16x64xf32, #tpu.memory_space<vmem>>, vector<2x32xf32>,
    %760 = vector.extract_strided_slice %753 {offsets = [0, 32], sizes = [2, 32], strides = [1, 1]} : vector<2x64xf32> to vector<2x32xf32>
    %c12_197 = arith.constant 12 : index
    %c32_198 = arith.constant 32 : index
    %761 = vector.load %arg17[%c12_197, %c32_198] : memref<16x64xf32, #tpu.memory_space<vmem>>, vector<2x32xf32>
    tpu.vector_store %arg17[%c12_197, %c32_198], %760 {strides = array<i32>} : memref<16x64xf32, #tpu.memory_space<vmem>>, vector<2x32xf32>,
    %762 = vector.extract_strided_slice %606 {offsets = [4, 0], sizes = [2, 128], strides = [1, 1]} : vector<16x128xf32> to vector<2x128xf32>
    %763 = vector.extract_strided_slice %606 {offsets = [10, 0], sizes = [2, 128], strides = [1, 1]} : vector<16x128xf32> to vector<2x128xf32>
    %764 = vector.shape_cast %2 : vector<1x128xi1> to vector<1x128xi1>
    %765 = vector.broadcast %764 : vector<1x128xi1> to vector<2x128xi1>
    %766 = arith.select %765, %762, %763 : vector<2x128xi1>, vector<2x128xf32>
    %cst_199 = arith.constant dense<0.000000e+00> : vector<2x128xf32>
    %767 = tpu.matmul %721, %612, %cst_199 {dimension_numbers = #tpu.dot_dimension_numbers<[1], [0], [0], [1], [0, 0, 1, 1], [], []>} : vector<2x32xf32>, vector<32x128xf32>, vector<2x128xf32> -> vector<2x128xf32>
    %768 = arith.addf %766, %767 : vector<2x128xf32>
    %769 = vector.extract_strided_slice %768 {offsets = [0, 0], sizes = [2, 32], strides = [1, 1]} : vector<2x128xf32> to vector<2x32xf32>
    %770 = arith.negf %769 : vector<2x32xf32>
    %771 = math.exp %770 : vector<2x32xf32>
    %cst_200 = arith.constant 1.000000e+00 : f32
    %772 = vector.broadcast %cst_200 : f32 to vector<2x32xf32>
    %773 = arith.addf %772, %771 : vector<2x32xf32>
    %774 = arith.divf %772, %773 : vector<2x32xf32>
    %775 = vector.extract_strided_slice %768 {offsets = [0, 32], sizes = [2, 32], strides = [1, 1]} : vector<2x128xf32> to vector<2x32xf32>
    %776 = arith.negf %775 : vector<2x32xf32>
    %777 = math.exp %776 : vector<2x32xf32>
    %cst_201 = arith.constant 1.000000e+00 : f32
    %778 = vector.broadcast %cst_201 : f32 to vector<2x32xf32>
    %779 = arith.addf %778, %777 : vector<2x32xf32>
    %780 = arith.divf %778, %779 : vector<2x32xf32>
    %781 = vector.extract_strided_slice %768 {offsets = [0, 64], sizes = [2, 32], strides = [1, 1]} : vector<2x128xf32> to vector<2x32xf32>
    %782 = math.tanh %781 : vector<2x32xf32>
    %783 = vector.extract_strided_slice %768 {offsets = [0, 96], sizes = [2, 32], strides = [1, 1]} : vector<2x128xf32> to vector<2x32xf32>
    %784 = arith.negf %783 : vector<2x32xf32>
    %785 = math.exp %784 : vector<2x32xf32>
    %cst_202 = arith.constant 1.000000e+00 : f32
    %786 = vector.broadcast %cst_202 : f32 to vector<2x32xf32>
    %787 = arith.addf %786, %785 : vector<2x32xf32>
    %788 = arith.divf %786, %787 : vector<2x32xf32>
    %789 = arith.mulf %780, %719 : vector<2x32xf32>
    %790 = arith.mulf %774, %782 : vector<2x32xf32>
    %791 = arith.addf %789, %790 : vector<2x32xf32>
    %792 = math.tanh %791 : vector<2x32xf32>
    %793 = arith.mulf %788, %792 : vector<2x32xf32>
    %794 = vector.extract_strided_slice %611 {offsets = [4, 0], sizes = [2, 256], strides = [1, 1]} : vector<16x256xf32> to vector<2x256xf32>
    %795 = vector.extract_strided_slice %611 {offsets = [10, 0], sizes = [2, 256], strides = [1, 1]} : vector<16x256xf32> to vector<2x256xf32>
    %796 = vector.shape_cast %5 : vector<1x256xi1> to vector<1x256xi1>
    %797 = vector.broadcast %796 : vector<1x256xi1> to vector<2x256xi1>
    %798 = arith.select %797, %794, %795 : vector<2x256xi1>, vector<2x256xf32>
    %cst_203 = arith.constant dense<0.000000e+00> : vector<2x256xf32>
    %799 = tpu.matmul %753, %613, %cst_203 {dimension_numbers = #tpu.dot_dimension_numbers<[1], [0], [0], [1], [0, 0, 1, 1], [], []>} : vector<2x64xf32>, vector<64x256xf32>, vector<2x256xf32> -> vector<2x256xf32>
    %800 = arith.addf %798, %799 : vector<2x256xf32>
    %801 = vector.extract_strided_slice %800 {offsets = [0, 0], sizes = [2, 64], strides = [1, 1]} : vector<2x256xf32> to vector<2x64xf32>
    %802 = arith.negf %801 : vector<2x64xf32>
    %803 = math.exp %802 : vector<2x64xf32>
    %cst_204 = arith.constant 1.000000e+00 : f32
    %804 = vector.broadcast %cst_204 : f32 to vector<2x64xf32>
    %805 = arith.addf %804, %803 : vector<2x64xf32>
    %806 = arith.divf %804, %805 : vector<2x64xf32>
    %807 = vector.extract_strided_slice %800 {offsets = [0, 64], sizes = [2, 64], strides = [1, 1]} : vector<2x256xf32> to vector<2x64xf32>
    %808 = arith.negf %807 : vector<2x64xf32>
    %809 = math.exp %808 : vector<2x64xf32>
    %cst_205 = arith.constant 1.000000e+00 : f32
    %810 = vector.broadcast %cst_205 : f32 to vector<2x64xf32>
    %811 = arith.addf %810, %809 : vector<2x64xf32>
    %812 = arith.divf %810, %811 : vector<2x64xf32>
    %813 = vector.extract_strided_slice %800 {offsets = [0, 128], sizes = [2, 64], strides = [1, 1]} : vector<2x256xf32> to vector<2x64xf32>
    %814 = math.tanh %813 : vector<2x64xf32>
    %815 = vector.extract_strided_slice %800 {offsets = [0, 192], sizes = [2, 64], strides = [1, 1]} : vector<2x256xf32> to vector<2x64xf32>
    %816 = arith.negf %815 : vector<2x64xf32>
    %817 = math.exp %816 : vector<2x64xf32>
    %cst_206 = arith.constant 1.000000e+00 : f32
    %818 = vector.broadcast %cst_206 : f32 to vector<2x64xf32>
    %819 = arith.addf %818, %817 : vector<2x64xf32>
    %820 = arith.divf %818, %819 : vector<2x64xf32>
    %821 = arith.mulf %812, %751 : vector<2x64xf32>
    %822 = arith.mulf %806, %814 : vector<2x64xf32>
    %823 = arith.addf %821, %822 : vector<2x64xf32>
    %824 = math.tanh %823 : vector<2x64xf32>
    %825 = arith.mulf %820, %824 : vector<2x64xf32>
    %826 = vector.extract_strided_slice %793 {offsets = [0, 0], sizes = [2, 16], strides = [1, 1]} : vector<2x32xf32> to vector<2x16xf32>
    %c4_207 = arith.constant 4 : index
    %c0_208 = arith.constant 0 : index
    %827 = vector.load %arg16[%c4_207, %c0_208] : memref<16x32xf32, #tpu.memory_space<vmem>>, vector<2x16xf32>
    tpu.vector_store %arg16[%c4_207, %c0_208], %826 {strides = array<i32>} : memref<16x32xf32, #tpu.memory_space<vmem>>, vector<2x16xf32>,
    %828 = vector.extract_strided_slice %793 {offsets = [0, 16], sizes = [2, 16], strides = [1, 1]} : vector<2x32xf32> to vector<2x16xf32>
    %c10_209 = arith.constant 10 : index
    %c16_210 = arith.constant 16 : index
    %829 = vector.load %arg16[%c10_209, %c16_210] : memref<16x32xf32, #tpu.memory_space<vmem>>, vector<2x16xf32>
    tpu.vector_store %arg16[%c10_209, %c16_210], %828 {strides = array<i32>} : memref<16x32xf32, #tpu.memory_space<vmem>>, vector<2x16xf32>,
    %830 = vector.extract_strided_slice %825 {offsets = [0, 0], sizes = [2, 32], strides = [1, 1]} : vector<2x64xf32> to vector<2x32xf32>
    %c4_211 = arith.constant 4 : index
    %c0_212 = arith.constant 0 : index
    %831 = vector.load %arg17[%c4_211, %c0_212] : memref<16x64xf32, #tpu.memory_space<vmem>>, vector<2x32xf32>
    tpu.vector_store %arg17[%c4_211, %c0_212], %830 {strides = array<i32>} : memref<16x64xf32, #tpu.memory_space<vmem>>, vector<2x32xf32>,
    %832 = vector.extract_strided_slice %825 {offsets = [0, 32], sizes = [2, 32], strides = [1, 1]} : vector<2x64xf32> to vector<2x32xf32>
    %c10_213 = arith.constant 10 : index
    %c32_214 = arith.constant 32 : index
    %833 = vector.load %arg17[%c10_213, %c32_214] : memref<16x64xf32, #tpu.memory_space<vmem>>, vector<2x32xf32>
    tpu.vector_store %arg17[%c10_213, %c32_214], %832 {strides = array<i32>} : memref<16x64xf32, #tpu.memory_space<vmem>>, vector<2x32xf32>,
    %834 = vector.extract_strided_slice %606 {offsets = [6, 0], sizes = [2, 128], strides = [1, 1]} : vector<16x128xf32> to vector<2x128xf32>
    %835 = vector.extract_strided_slice %606 {offsets = [8, 0], sizes = [2, 128], strides = [1, 1]} : vector<16x128xf32> to vector<2x128xf32>
    %836 = vector.shape_cast %2 : vector<1x128xi1> to vector<1x128xi1>
    %837 = vector.broadcast %836 : vector<1x128xi1> to vector<2x128xi1>
    %838 = arith.select %837, %834, %835 : vector<2x128xi1>, vector<2x128xf32>
    %cst_215 = arith.constant dense<0.000000e+00> : vector<2x128xf32>
    %839 = tpu.matmul %793, %612, %cst_215 {dimension_numbers = #tpu.dot_dimension_numbers<[1], [0], [0], [1], [0, 0, 1, 1], [], []>} : vector<2x32xf32>, vector<32x128xf32>, vector<2x128xf32> -> vector<2x128xf32>
    %840 = arith.addf %838, %839 : vector<2x128xf32>
    %841 = vector.extract_strided_slice %840 {offsets = [0, 0], sizes = [2, 32], strides = [1, 1]} : vector<2x128xf32> to vector<2x32xf32>
    %842 = arith.negf %841 : vector<2x32xf32>
    %843 = math.exp %842 : vector<2x32xf32>
    %cst_216 = arith.constant 1.000000e+00 : f32
    %844 = vector.broadcast %cst_216 : f32 to vector<2x32xf32>
    %845 = arith.addf %844, %843 : vector<2x32xf32>
    %846 = arith.divf %844, %845 : vector<2x32xf32>
    %847 = vector.extract_strided_slice %840 {offsets = [0, 32], sizes = [2, 32], strides = [1, 1]} : vector<2x128xf32> to vector<2x32xf32>
    %848 = arith.negf %847 : vector<2x32xf32>
    %849 = math.exp %848 : vector<2x32xf32>
    %cst_217 = arith.constant 1.000000e+00 : f32
    %850 = vector.broadcast %cst_217 : f32 to vector<2x32xf32>
    %851 = arith.addf %850, %849 : vector<2x32xf32>
    %852 = arith.divf %850, %851 : vector<2x32xf32>
    %853 = vector.extract_strided_slice %840 {offsets = [0, 64], sizes = [2, 32], strides = [1, 1]} : vector<2x128xf32> to vector<2x32xf32>
    %854 = math.tanh %853 : vector<2x32xf32>
    %855 = vector.extract_strided_slice %840 {offsets = [0, 96], sizes = [2, 32], strides = [1, 1]} : vector<2x128xf32> to vector<2x32xf32>
    %856 = arith.negf %855 : vector<2x32xf32>
    %857 = math.exp %856 : vector<2x32xf32>
    %cst_218 = arith.constant 1.000000e+00 : f32
    %858 = vector.broadcast %cst_218 : f32 to vector<2x32xf32>
    %859 = arith.addf %858, %857 : vector<2x32xf32>
    %860 = arith.divf %858, %859 : vector<2x32xf32>
    %861 = arith.mulf %852, %791 : vector<2x32xf32>
    %862 = arith.mulf %846, %854 : vector<2x32xf32>
    %863 = arith.addf %861, %862 : vector<2x32xf32>
    %864 = math.tanh %863 : vector<2x32xf32>
    %865 = arith.mulf %860, %864 : vector<2x32xf32>
    %866 = vector.extract_strided_slice %611 {offsets = [6, 0], sizes = [2, 256], strides = [1, 1]} : vector<16x256xf32> to vector<2x256xf32>
    %867 = vector.extract_strided_slice %611 {offsets = [8, 0], sizes = [2, 256], strides = [1, 1]} : vector<16x256xf32> to vector<2x256xf32>
    %868 = vector.shape_cast %5 : vector<1x256xi1> to vector<1x256xi1>
    %869 = vector.broadcast %868 : vector<1x256xi1> to vector<2x256xi1>
    %870 = arith.select %869, %866, %867 : vector<2x256xi1>, vector<2x256xf32>
    %cst_219 = arith.constant dense<0.000000e+00> : vector<2x256xf32>
    %871 = tpu.matmul %825, %613, %cst_219 {dimension_numbers = #tpu.dot_dimension_numbers<[1], [0], [0], [1], [0, 0, 1, 1], [], []>} : vector<2x64xf32>, vector<64x256xf32>, vector<2x256xf32> -> vector<2x256xf32>
    %872 = arith.addf %870, %871 : vector<2x256xf32>
    %873 = vector.extract_strided_slice %872 {offsets = [0, 0], sizes = [2, 64], strides = [1, 1]} : vector<2x256xf32> to vector<2x64xf32>
    %874 = arith.negf %873 : vector<2x64xf32>
    %875 = math.exp %874 : vector<2x64xf32>
    %cst_220 = arith.constant 1.000000e+00 : f32
    %876 = vector.broadcast %cst_220 : f32 to vector<2x64xf32>
    %877 = arith.addf %876, %875 : vector<2x64xf32>
    %878 = arith.divf %876, %877 : vector<2x64xf32>
    %879 = vector.extract_strided_slice %872 {offsets = [0, 64], sizes = [2, 64], strides = [1, 1]} : vector<2x256xf32> to vector<2x64xf32>
    %880 = arith.negf %879 : vector<2x64xf32>
    %881 = math.exp %880 : vector<2x64xf32>
    %cst_221 = arith.constant 1.000000e+00 : f32
    %882 = vector.broadcast %cst_221 : f32 to vector<2x64xf32>
    %883 = arith.addf %882, %881 : vector<2x64xf32>
    %884 = arith.divf %882, %883 : vector<2x64xf32>
    %885 = vector.extract_strided_slice %872 {offsets = [0, 128], sizes = [2, 64], strides = [1, 1]} : vector<2x256xf32> to vector<2x64xf32>
    %886 = math.tanh %885 : vector<2x64xf32>
    %887 = vector.extract_strided_slice %872 {offsets = [0, 192], sizes = [2, 64], strides = [1, 1]} : vector<2x256xf32> to vector<2x64xf32>
    %888 = arith.negf %887 : vector<2x64xf32>
    %889 = math.exp %888 : vector<2x64xf32>
    %cst_222 = arith.constant 1.000000e+00 : f32
    %890 = vector.broadcast %cst_222 : f32 to vector<2x64xf32>
    %891 = arith.addf %890, %889 : vector<2x64xf32>
    %892 = arith.divf %890, %891 : vector<2x64xf32>
    %893 = arith.mulf %884, %823 : vector<2x64xf32>
    %894 = arith.mulf %878, %886 : vector<2x64xf32>
    %895 = arith.addf %893, %894 : vector<2x64xf32>
    %896 = math.tanh %895 : vector<2x64xf32>
    %897 = arith.mulf %892, %896 : vector<2x64xf32>
    %898 = vector.extract_strided_slice %865 {offsets = [0, 0], sizes = [2, 16], strides = [1, 1]} : vector<2x32xf32> to vector<2x16xf32>
    %c6_223 = arith.constant 6 : index
    %c0_224 = arith.constant 0 : index
    %899 = vector.load %arg16[%c6_223, %c0_224] : memref<16x32xf32, #tpu.memory_space<vmem>>, vector<2x16xf32>
    tpu.vector_store %arg16[%c6_223, %c0_224], %898 {strides = array<i32>} : memref<16x32xf32, #tpu.memory_space<vmem>>, vector<2x16xf32>,
    %900 = vector.extract_strided_slice %865 {offsets = [0, 16], sizes = [2, 16], strides = [1, 1]} : vector<2x32xf32> to vector<2x16xf32>
    %c8_225 = arith.constant 8 : index
    %c16_226 = arith.constant 16 : index
    %901 = vector.load %arg16[%c8_225, %c16_226] : memref<16x32xf32, #tpu.memory_space<vmem>>, vector<2x16xf32>
    tpu.vector_store %arg16[%c8_225, %c16_226], %900 {strides = array<i32>} : memref<16x32xf32, #tpu.memory_space<vmem>>, vector<2x16xf32>,
    %902 = vector.extract_strided_slice %897 {offsets = [0, 0], sizes = [2, 32], strides = [1, 1]} : vector<2x64xf32> to vector<2x32xf32>
    %c6_227 = arith.constant 6 : index
    %c0_228 = arith.constant 0 : index
    %903 = vector.load %arg17[%c6_227, %c0_228] : memref<16x64xf32, #tpu.memory_space<vmem>>, vector<2x32xf32>
    tpu.vector_store %arg17[%c6_227, %c0_228], %902 {strides = array<i32>} : memref<16x64xf32, #tpu.memory_space<vmem>>, vector<2x32xf32>,
    %904 = vector.extract_strided_slice %897 {offsets = [0, 32], sizes = [2, 32], strides = [1, 1]} : vector<2x64xf32> to vector<2x32xf32>
    %c8_229 = arith.constant 8 : index
    %c32_230 = arith.constant 32 : index
    %905 = vector.load %arg17[%c8_229, %c32_230] : memref<16x64xf32, #tpu.memory_space<vmem>>, vector<2x32xf32>
    tpu.vector_store %arg17[%c8_229, %c32_230], %904 {strides = array<i32>} : memref<16x64xf32, #tpu.memory_space<vmem>>, vector<2x32xf32>,
    %906 = vector.extract_strided_slice %606 {offsets = [8, 0], sizes = [2, 128], strides = [1, 1]} : vector<16x128xf32> to vector<2x128xf32>
    %907 = vector.extract_strided_slice %606 {offsets = [6, 0], sizes = [2, 128], strides = [1, 1]} : vector<16x128xf32> to vector<2x128xf32>
    %908 = vector.shape_cast %2 : vector<1x128xi1> to vector<1x128xi1>
    %909 = vector.broadcast %908 : vector<1x128xi1> to vector<2x128xi1>
    %910 = arith.select %909, %906, %907 : vector<2x128xi1>, vector<2x128xf32>
    %cst_231 = arith.constant dense<0.000000e+00> : vector<2x128xf32>
    %911 = tpu.matmul %865, %612, %cst_231 {dimension_numbers = #tpu.dot_dimension_numbers<[1], [0], [0], [1], [0, 0, 1, 1], [], []>} : vector<2x32xf32>, vector<32x128xf32>, vector<2x128xf32> -> vector<2x128xf32>
    %912 = arith.addf %910, %911 : vector<2x128xf32>
    %913 = vector.extract_strided_slice %912 {offsets = [0, 0], sizes = [2, 32], strides = [1, 1]} : vector<2x128xf32> to vector<2x32xf32>
    %914 = arith.negf %913 : vector<2x32xf32>
    %915 = math.exp %914 : vector<2x32xf32>
    %cst_232 = arith.constant 1.000000e+00 : f32
    %916 = vector.broadcast %cst_232 : f32 to vector<2x32xf32>
    %917 = arith.addf %916, %915 : vector<2x32xf32>
    %918 = arith.divf %916, %917 : vector<2x32xf32>
    %919 = vector.extract_strided_slice %912 {offsets = [0, 32], sizes = [2, 32], strides = [1, 1]} : vector<2x128xf32> to vector<2x32xf32>
    %920 = arith.negf %919 : vector<2x32xf32>
    %921 = math.exp %920 : vector<2x32xf32>
    %cst_233 = arith.constant 1.000000e+00 : f32
    %922 = vector.broadcast %cst_233 : f32 to vector<2x32xf32>
    %923 = arith.addf %922, %921 : vector<2x32xf32>
    %924 = arith.divf %922, %923 : vector<2x32xf32>
    %925 = vector.extract_strided_slice %912 {offsets = [0, 64], sizes = [2, 32], strides = [1, 1]} : vector<2x128xf32> to vector<2x32xf32>
    %926 = math.tanh %925 : vector<2x32xf32>
    %927 = vector.extract_strided_slice %912 {offsets = [0, 96], sizes = [2, 32], strides = [1, 1]} : vector<2x128xf32> to vector<2x32xf32>
    %928 = arith.negf %927 : vector<2x32xf32>
    %929 = math.exp %928 : vector<2x32xf32>
    %cst_234 = arith.constant 1.000000e+00 : f32
    %930 = vector.broadcast %cst_234 : f32 to vector<2x32xf32>
    %931 = arith.addf %930, %929 : vector<2x32xf32>
    %932 = arith.divf %930, %931 : vector<2x32xf32>
    %933 = arith.mulf %924, %863 : vector<2x32xf32>
    %934 = arith.mulf %918, %926 : vector<2x32xf32>
    %935 = arith.addf %933, %934 : vector<2x32xf32>
    %936 = math.tanh %935 : vector<2x32xf32>
    %937 = arith.mulf %932, %936 : vector<2x32xf32>
    %938 = vector.extract_strided_slice %611 {offsets = [8, 0], sizes = [2, 256], strides = [1, 1]} : vector<16x256xf32> to vector<2x256xf32>
    %939 = vector.extract_strided_slice %611 {offsets = [6, 0], sizes = [2, 256], strides = [1, 1]} : vector<16x256xf32> to vector<2x256xf32>
    %940 = vector.shape_cast %5 : vector<1x256xi1> to vector<1x256xi1>
    %941 = vector.broadcast %940 : vector<1x256xi1> to vector<2x256xi1>
    %942 = arith.select %941, %938, %939 : vector<2x256xi1>, vector<2x256xf32>
    %cst_235 = arith.constant dense<0.000000e+00> : vector<2x256xf32>
    %943 = tpu.matmul %897, %613, %cst_235 {dimension_numbers = #tpu.dot_dimension_numbers<[1], [0], [0], [1], [0, 0, 1, 1], [], []>} : vector<2x64xf32>, vector<64x256xf32>, vector<2x256xf32> -> vector<2x256xf32>
    %944 = arith.addf %942, %943 : vector<2x256xf32>
    %945 = vector.extract_strided_slice %944 {offsets = [0, 0], sizes = [2, 64], strides = [1, 1]} : vector<2x256xf32> to vector<2x64xf32>
    %946 = arith.negf %945 : vector<2x64xf32>
    %947 = math.exp %946 : vector<2x64xf32>
    %cst_236 = arith.constant 1.000000e+00 : f32
    %948 = vector.broadcast %cst_236 : f32 to vector<2x64xf32>
    %949 = arith.addf %948, %947 : vector<2x64xf32>
    %950 = arith.divf %948, %949 : vector<2x64xf32>
    %951 = vector.extract_strided_slice %944 {offsets = [0, 64], sizes = [2, 64], strides = [1, 1]} : vector<2x256xf32> to vector<2x64xf32>
    %952 = arith.negf %951 : vector<2x64xf32>
    %953 = math.exp %952 : vector<2x64xf32>
    %cst_237 = arith.constant 1.000000e+00 : f32
    %954 = vector.broadcast %cst_237 : f32 to vector<2x64xf32>
    %955 = arith.addf %954, %953 : vector<2x64xf32>
    %956 = arith.divf %954, %955 : vector<2x64xf32>
    %957 = vector.extract_strided_slice %944 {offsets = [0, 128], sizes = [2, 64], strides = [1, 1]} : vector<2x256xf32> to vector<2x64xf32>
    %958 = math.tanh %957 : vector<2x64xf32>
    %959 = vector.extract_strided_slice %944 {offsets = [0, 192], sizes = [2, 64], strides = [1, 1]} : vector<2x256xf32> to vector<2x64xf32>
    %960 = arith.negf %959 : vector<2x64xf32>
    %961 = math.exp %960 : vector<2x64xf32>
    %cst_238 = arith.constant 1.000000e+00 : f32
    %962 = vector.broadcast %cst_238 : f32 to vector<2x64xf32>
    %963 = arith.addf %962, %961 : vector<2x64xf32>
    %964 = arith.divf %962, %963 : vector<2x64xf32>
    %965 = arith.mulf %956, %895 : vector<2x64xf32>
    %966 = arith.mulf %950, %958 : vector<2x64xf32>
    %967 = arith.addf %965, %966 : vector<2x64xf32>
    %968 = math.tanh %967 : vector<2x64xf32>
    %969 = arith.mulf %964, %968 : vector<2x64xf32>
    %970 = vector.extract_strided_slice %937 {offsets = [0, 0], sizes = [2, 16], strides = [1, 1]} : vector<2x32xf32> to vector<2x16xf32>
    %c8_239 = arith.constant 8 : index
    %c0_240 = arith.constant 0 : index
    %971 = vector.load %arg16[%c8_239, %c0_240] : memref<16x32xf32, #tpu.memory_space<vmem>>, vector<2x16xf32>
    tpu.vector_store %arg16[%c8_239, %c0_240], %970 {strides = array<i32>} : memref<16x32xf32, #tpu.memory_space<vmem>>, vector<2x16xf32>,
    %972 = vector.extract_strided_slice %937 {offsets = [0, 16], sizes = [2, 16], strides = [1, 1]} : vector<2x32xf32> to vector<2x16xf32>
    %c6_241 = arith.constant 6 : index
    %c16_242 = arith.constant 16 : index
    %973 = vector.load %arg16[%c6_241, %c16_242] : memref<16x32xf32, #tpu.memory_space<vmem>>, vector<2x16xf32>
    tpu.vector_store %arg16[%c6_241, %c16_242], %972 {strides = array<i32>} : memref<16x32xf32, #tpu.memory_space<vmem>>, vector<2x16xf32>,
    %974 = vector.extract_strided_slice %969 {offsets = [0, 0], sizes = [2, 32], strides = [1, 1]} : vector<2x64xf32> to vector<2x32xf32>
    %c8_243 = arith.constant 8 : index
    %c0_244 = arith.constant 0 : index
    %975 = vector.load %arg17[%c8_243, %c0_244] : memref<16x64xf32, #tpu.memory_space<vmem>>, vector<2x32xf32>
    tpu.vector_store %arg17[%c8_243, %c0_244], %974 {strides = array<i32>} : memref<16x64xf32, #tpu.memory_space<vmem>>, vector<2x32xf32>,
    %976 = vector.extract_strided_slice %969 {offsets = [0, 32], sizes = [2, 32], strides = [1, 1]} : vector<2x64xf32> to vector<2x32xf32>
    %c6_245 = arith.constant 6 : index
    %c32_246 = arith.constant 32 : index
    %977 = vector.load %arg17[%c6_245, %c32_246] : memref<16x64xf32, #tpu.memory_space<vmem>>, vector<2x32xf32>
    tpu.vector_store %arg17[%c6_245, %c32_246], %976 {strides = array<i32>} : memref<16x64xf32, #tpu.memory_space<vmem>>, vector<2x32xf32>,
    %978 = vector.extract_strided_slice %606 {offsets = [10, 0], sizes = [2, 128], strides = [1, 1]} : vector<16x128xf32> to vector<2x128xf32>
    %979 = vector.extract_strided_slice %606 {offsets = [4, 0], sizes = [2, 128], strides = [1, 1]} : vector<16x128xf32> to vector<2x128xf32>
    %980 = vector.shape_cast %2 : vector<1x128xi1> to vector<1x128xi1>
    %981 = vector.broadcast %980 : vector<1x128xi1> to vector<2x128xi1>
    %982 = arith.select %981, %978, %979 : vector<2x128xi1>, vector<2x128xf32>
    %cst_247 = arith.constant dense<0.000000e+00> : vector<2x128xf32>
    %983 = tpu.matmul %937, %612, %cst_247 {dimension_numbers = #tpu.dot_dimension_numbers<[1], [0], [0], [1], [0, 0, 1, 1], [], []>} : vector<2x32xf32>, vector<32x128xf32>, vector<2x128xf32> -> vector<2x128xf32>
    %984 = arith.addf %982, %983 : vector<2x128xf32>
    %985 = vector.extract_strided_slice %984 {offsets = [0, 0], sizes = [2, 32], strides = [1, 1]} : vector<2x128xf32> to vector<2x32xf32>
    %986 = arith.negf %985 : vector<2x32xf32>
    %987 = math.exp %986 : vector<2x32xf32>
    %cst_248 = arith.constant 1.000000e+00 : f32
    %988 = vector.broadcast %cst_248 : f32 to vector<2x32xf32>
    %989 = arith.addf %988, %987 : vector<2x32xf32>
    %990 = arith.divf %988, %989 : vector<2x32xf32>
    %991 = vector.extract_strided_slice %984 {offsets = [0, 32], sizes = [2, 32], strides = [1, 1]} : vector<2x128xf32> to vector<2x32xf32>
    %992 = arith.negf %991 : vector<2x32xf32>
    %993 = math.exp %992 : vector<2x32xf32>
    %cst_249 = arith.constant 1.000000e+00 : f32
    %994 = vector.broadcast %cst_249 : f32 to vector<2x32xf32>
    %995 = arith.addf %994, %993 : vector<2x32xf32>
    %996 = arith.divf %994, %995 : vector<2x32xf32>
    %997 = vector.extract_strided_slice %984 {offsets = [0, 64], sizes = [2, 32], strides = [1, 1]} : vector<2x128xf32> to vector<2x32xf32>
    %998 = math.tanh %997 : vector<2x32xf32>
    %999 = vector.extract_strided_slice %984 {offsets = [0, 96], sizes = [2, 32], strides = [1, 1]} : vector<2x128xf32> to vector<2x32xf32>
    %1000 = arith.negf %999 : vector<2x32xf32>
    %1001 = math.exp %1000 : vector<2x32xf32>
    %cst_250 = arith.constant 1.000000e+00 : f32
    %1002 = vector.broadcast %cst_250 : f32 to vector<2x32xf32>
    %1003 = arith.addf %1002, %1001 : vector<2x32xf32>
    %1004 = arith.divf %1002, %1003 : vector<2x32xf32>
    %1005 = arith.mulf %996, %935 : vector<2x32xf32>
    %1006 = arith.mulf %990, %998 : vector<2x32xf32>
    %1007 = arith.addf %1005, %1006 : vector<2x32xf32>
    %1008 = math.tanh %1007 : vector<2x32xf32>
    %1009 = arith.mulf %1004, %1008 : vector<2x32xf32>
    %1010 = vector.extract_strided_slice %611 {offsets = [10, 0], sizes = [2, 256], strides = [1, 1]} : vector<16x256xf32> to vector<2x256xf32>
    %1011 = vector.extract_strided_slice %611 {offsets = [4, 0], sizes = [2, 256], strides = [1, 1]} : vector<16x256xf32> to vector<2x256xf32>
    %1012 = vector.shape_cast %5 : vector<1x256xi1> to vector<1x256xi1>
    %1013 = vector.broadcast %1012 : vector<1x256xi1> to vector<2x256xi1>
    %1014 = arith.select %1013, %1010, %1011 : vector<2x256xi1>, vector<2x256xf32>
    %cst_251 = arith.constant dense<0.000000e+00> : vector<2x256xf32>
    %1015 = tpu.matmul %969, %613, %cst_251 {dimension_numbers = #tpu.dot_dimension_numbers<[1], [0], [0], [1], [0, 0, 1, 1], [], []>} : vector<2x64xf32>, vector<64x256xf32>, vector<2x256xf32> -> vector<2x256xf32>
    %1016 = arith.addf %1014, %1015 : vector<2x256xf32>
    %1017 = vector.extract_strided_slice %1016 {offsets = [0, 0], sizes = [2, 64], strides = [1, 1]} : vector<2x256xf32> to vector<2x64xf32>
    %1018 = arith.negf %1017 : vector<2x64xf32>
    %1019 = math.exp %1018 : vector<2x64xf32>
    %cst_252 = arith.constant 1.000000e+00 : f32
    %1020 = vector.broadcast %cst_252 : f32 to vector<2x64xf32>
    %1021 = arith.addf %1020, %1019 : vector<2x64xf32>
    %1022 = arith.divf %1020, %1021 : vector<2x64xf32>
    %1023 = vector.extract_strided_slice %1016 {offsets = [0, 64], sizes = [2, 64], strides = [1, 1]} : vector<2x256xf32> to vector<2x64xf32>
    %1024 = arith.negf %1023 : vector<2x64xf32>
    %1025 = math.exp %1024 : vector<2x64xf32>
    %cst_253 = arith.constant 1.000000e+00 : f32
    %1026 = vector.broadcast %cst_253 : f32 to vector<2x64xf32>
    %1027 = arith.addf %1026, %1025 : vector<2x64xf32>
    %1028 = arith.divf %1026, %1027 : vector<2x64xf32>
    %1029 = vector.extract_strided_slice %1016 {offsets = [0, 128], sizes = [2, 64], strides = [1, 1]} : vector<2x256xf32> to vector<2x64xf32>
    %1030 = math.tanh %1029 : vector<2x64xf32>
    %1031 = vector.extract_strided_slice %1016 {offsets = [0, 192], sizes = [2, 64], strides = [1, 1]} : vector<2x256xf32> to vector<2x64xf32>
    %1032 = arith.negf %1031 : vector<2x64xf32>
    %1033 = math.exp %1032 : vector<2x64xf32>
    %cst_254 = arith.constant 1.000000e+00 : f32
    %1034 = vector.broadcast %cst_254 : f32 to vector<2x64xf32>
    %1035 = arith.addf %1034, %1033 : vector<2x64xf32>
    %1036 = arith.divf %1034, %1035 : vector<2x64xf32>
    %1037 = arith.mulf %1028, %967 : vector<2x64xf32>
    %1038 = arith.mulf %1022, %1030 : vector<2x64xf32>
    %1039 = arith.addf %1037, %1038 : vector<2x64xf32>
    %1040 = math.tanh %1039 : vector<2x64xf32>
    %1041 = arith.mulf %1036, %1040 : vector<2x64xf32>
    %1042 = vector.extract_strided_slice %1009 {offsets = [0, 0], sizes = [2, 16], strides = [1, 1]} : vector<2x32xf32> to vector<2x16xf32>
    %c10_255 = arith.constant 10 : index
    %c0_256 = arith.constant 0 : index
    %1043 = vector.load %arg16[%c10_255, %c0_256] : memref<16x32xf32, #tpu.memory_space<vmem>>, vector<2x16xf32>
    tpu.vector_store %arg16[%c10_255, %c0_256], %1042 {strides = array<i32>} : memref<16x32xf32, #tpu.memory_space<vmem>>, vector<2x16xf32>,
    %1044 = vector.extract_strided_slice %1009 {offsets = [0, 16], sizes = [2, 16], strides = [1, 1]} : vector<2x32xf32> to vector<2x16xf32>
    %c4_257 = arith.constant 4 : index
    %c16_258 = arith.constant 16 : index
    %1045 = vector.load %arg16[%c4_257, %c16_258] : memref<16x32xf32, #tpu.memory_space<vmem>>, vector<2x16xf32>
    tpu.vector_store %arg16[%c4_257, %c16_258], %1044 {strides = array<i32>} : memref<16x32xf32, #tpu.memory_space<vmem>>, vector<2x16xf32>,
    %1046 = vector.extract_strided_slice %1041 {offsets = [0, 0], sizes = [2, 32], strides = [1, 1]} : vector<2x64xf32> to vector<2x32xf32>
    %c10_259 = arith.constant 10 : index
    %c0_260 = arith.constant 0 : index
    %1047 = vector.load %arg17[%c10_259, %c0_260] : memref<16x64xf32, #tpu.memory_space<vmem>>, vector<2x32xf32>
    tpu.vector_store %arg17[%c10_259, %c0_260], %1046 {strides = array<i32>} : memref<16x64xf32, #tpu.memory_space<vmem>>, vector<2x32xf32>,
    %1048 = vector.extract_strided_slice %1041 {offsets = [0, 32], sizes = [2, 32], strides = [1, 1]} : vector<2x64xf32> to vector<2x32xf32>
    %c4_261 = arith.constant 4 : index
    %c32_262 = arith.constant 32 : index
    %1049 = vector.load %arg17[%c4_261, %c32_262] : memref<16x64xf32, #tpu.memory_space<vmem>>, vector<2x32xf32>
    tpu.vector_store %arg17[%c4_261, %c32_262], %1048 {strides = array<i32>} : memref<16x64xf32, #tpu.memory_space<vmem>>, vector<2x32xf32>,
    %1050 = vector.extract_strided_slice %606 {offsets = [12, 0], sizes = [2, 128], strides = [1, 1]} : vector<16x128xf32> to vector<2x128xf32>
    %1051 = vector.extract_strided_slice %606 {offsets = [2, 0], sizes = [2, 128], strides = [1, 1]} : vector<16x128xf32> to vector<2x128xf32>
    %1052 = vector.shape_cast %2 : vector<1x128xi1> to vector<1x128xi1>
    %1053 = vector.broadcast %1052 : vector<1x128xi1> to vector<2x128xi1>
    %1054 = arith.select %1053, %1050, %1051 : vector<2x128xi1>, vector<2x128xf32>
    %cst_263 = arith.constant dense<0.000000e+00> : vector<2x128xf32>
    %1055 = tpu.matmul %1009, %612, %cst_263 {dimension_numbers = #tpu.dot_dimension_numbers<[1], [0], [0], [1], [0, 0, 1, 1], [], []>} : vector<2x32xf32>, vector<32x128xf32>, vector<2x128xf32> -> vector<2x128xf32>
    %1056 = arith.addf %1054, %1055 : vector<2x128xf32>
    %1057 = vector.extract_strided_slice %1056 {offsets = [0, 0], sizes = [2, 32], strides = [1, 1]} : vector<2x128xf32> to vector<2x32xf32>
    %1058 = arith.negf %1057 : vector<2x32xf32>
    %1059 = math.exp %1058 : vector<2x32xf32>
    %cst_264 = arith.constant 1.000000e+00 : f32
    %1060 = vector.broadcast %cst_264 : f32 to vector<2x32xf32>
    %1061 = arith.addf %1060, %1059 : vector<2x32xf32>
    %1062 = arith.divf %1060, %1061 : vector<2x32xf32>
    %1063 = vector.extract_strided_slice %1056 {offsets = [0, 32], sizes = [2, 32], strides = [1, 1]} : vector<2x128xf32> to vector<2x32xf32>
    %1064 = arith.negf %1063 : vector<2x32xf32>
    %1065 = math.exp %1064 : vector<2x32xf32>
    %cst_265 = arith.constant 1.000000e+00 : f32
    %1066 = vector.broadcast %cst_265 : f32 to vector<2x32xf32>
    %1067 = arith.addf %1066, %1065 : vector<2x32xf32>
    %1068 = arith.divf %1066, %1067 : vector<2x32xf32>
    %1069 = vector.extract_strided_slice %1056 {offsets = [0, 64], sizes = [2, 32], strides = [1, 1]} : vector<2x128xf32> to vector<2x32xf32>
    %1070 = math.tanh %1069 : vector<2x32xf32>
    %1071 = vector.extract_strided_slice %1056 {offsets = [0, 96], sizes = [2, 32], strides = [1, 1]} : vector<2x128xf32> to vector<2x32xf32>
    %1072 = arith.negf %1071 : vector<2x32xf32>
    %1073 = math.exp %1072 : vector<2x32xf32>
    %cst_266 = arith.constant 1.000000e+00 : f32
    %1074 = vector.broadcast %cst_266 : f32 to vector<2x32xf32>
    %1075 = arith.addf %1074, %1073 : vector<2x32xf32>
    %1076 = arith.divf %1074, %1075 : vector<2x32xf32>
    %1077 = arith.mulf %1068, %1007 : vector<2x32xf32>
    %1078 = arith.mulf %1062, %1070 : vector<2x32xf32>
    %1079 = arith.addf %1077, %1078 : vector<2x32xf32>
    %1080 = math.tanh %1079 : vector<2x32xf32>
    %1081 = arith.mulf %1076, %1080 : vector<2x32xf32>
    %1082 = vector.extract_strided_slice %611 {offsets = [12, 0], sizes = [2, 256], strides = [1, 1]} : vector<16x256xf32> to vector<2x256xf32>
    %1083 = vector.extract_strided_slice %611 {offsets = [2, 0], sizes = [2, 256], strides = [1, 1]} : vector<16x256xf32> to vector<2x256xf32>
    %1084 = vector.shape_cast %5 : vector<1x256xi1> to vector<1x256xi1>
    %1085 = vector.broadcast %1084 : vector<1x256xi1> to vector<2x256xi1>
    %1086 = arith.select %1085, %1082, %1083 : vector<2x256xi1>, vector<2x256xf32>
    %cst_267 = arith.constant dense<0.000000e+00> : vector<2x256xf32>
    %1087 = tpu.matmul %1041, %613, %cst_267 {dimension_numbers = #tpu.dot_dimension_numbers<[1], [0], [0], [1], [0, 0, 1, 1], [], []>} : vector<2x64xf32>, vector<64x256xf32>, vector<2x256xf32> -> vector<2x256xf32>
    %1088 = arith.addf %1086, %1087 : vector<2x256xf32>
    %1089 = vector.extract_strided_slice %1088 {offsets = [0, 0], sizes = [2, 64], strides = [1, 1]} : vector<2x256xf32> to vector<2x64xf32>
    %1090 = arith.negf %1089 : vector<2x64xf32>
    %1091 = math.exp %1090 : vector<2x64xf32>
    %cst_268 = arith.constant 1.000000e+00 : f32
    %1092 = vector.broadcast %cst_268 : f32 to vector<2x64xf32>
    %1093 = arith.addf %1092, %1091 : vector<2x64xf32>
    %1094 = arith.divf %1092, %1093 : vector<2x64xf32>
    %1095 = vector.extract_strided_slice %1088 {offsets = [0, 64], sizes = [2, 64], strides = [1, 1]} : vector<2x256xf32> to vector<2x64xf32>
    %1096 = arith.negf %1095 : vector<2x64xf32>
    %1097 = math.exp %1096 : vector<2x64xf32>
    %cst_269 = arith.constant 1.000000e+00 : f32
    %1098 = vector.broadcast %cst_269 : f32 to vector<2x64xf32>
    %1099 = arith.addf %1098, %1097 : vector<2x64xf32>
    %1100 = arith.divf %1098, %1099 : vector<2x64xf32>
    %1101 = vector.extract_strided_slice %1088 {offsets = [0, 128], sizes = [2, 64], strides = [1, 1]} : vector<2x256xf32> to vector<2x64xf32>
    %1102 = math.tanh %1101 : vector<2x64xf32>
    %1103 = vector.extract_strided_slice %1088 {offsets = [0, 192], sizes = [2, 64], strides = [1, 1]} : vector<2x256xf32> to vector<2x64xf32>
    %1104 = arith.negf %1103 : vector<2x64xf32>
    %1105 = math.exp %1104 : vector<2x64xf32>
    %cst_270 = arith.constant 1.000000e+00 : f32
    %1106 = vector.broadcast %cst_270 : f32 to vector<2x64xf32>
    %1107 = arith.addf %1106, %1105 : vector<2x64xf32>
    %1108 = arith.divf %1106, %1107 : vector<2x64xf32>
    %1109 = arith.mulf %1100, %1039 : vector<2x64xf32>
    %1110 = arith.mulf %1094, %1102 : vector<2x64xf32>
    %1111 = arith.addf %1109, %1110 : vector<2x64xf32>
    %1112 = math.tanh %1111 : vector<2x64xf32>
    %1113 = arith.mulf %1108, %1112 : vector<2x64xf32>
    %1114 = vector.extract_strided_slice %1081 {offsets = [0, 0], sizes = [2, 16], strides = [1, 1]} : vector<2x32xf32> to vector<2x16xf32>
    %c12_271 = arith.constant 12 : index
    %c0_272 = arith.constant 0 : index
    %1115 = vector.load %arg16[%c12_271, %c0_272] : memref<16x32xf32, #tpu.memory_space<vmem>>, vector<2x16xf32>
    tpu.vector_store %arg16[%c12_271, %c0_272], %1114 {strides = array<i32>} : memref<16x32xf32, #tpu.memory_space<vmem>>, vector<2x16xf32>,
    %1116 = vector.extract_strided_slice %1081 {offsets = [0, 16], sizes = [2, 16], strides = [1, 1]} : vector<2x32xf32> to vector<2x16xf32>
    %c2_273 = arith.constant 2 : index
    %c16_274 = arith.constant 16 : index
    %1117 = vector.load %arg16[%c2_273, %c16_274] : memref<16x32xf32, #tpu.memory_space<vmem>>, vector<2x16xf32>
    tpu.vector_store %arg16[%c2_273, %c16_274], %1116 {strides = array<i32>} : memref<16x32xf32, #tpu.memory_space<vmem>>, vector<2x16xf32>,
    %1118 = vector.extract_strided_slice %1113 {offsets = [0, 0], sizes = [2, 32], strides = [1, 1]} : vector<2x64xf32> to vector<2x32xf32>
    %c12_275 = arith.constant 12 : index
    %c0_276 = arith.constant 0 : index
    %1119 = vector.load %arg17[%c12_275, %c0_276] : memref<16x64xf32, #tpu.memory_space<vmem>>, vector<2x32xf32>
    tpu.vector_store %arg17[%c12_275, %c0_276], %1118 {strides = array<i32>} : memref<16x64xf32, #tpu.memory_space<vmem>>, vector<2x32xf32>,
    %1120 = vector.extract_strided_slice %1113 {offsets = [0, 32], sizes = [2, 32], strides = [1, 1]} : vector<2x64xf32> to vector<2x32xf32>
    %c2_277 = arith.constant 2 : index
    %c32_278 = arith.constant 32 : index
    %1121 = vector.load %arg17[%c2_277, %c32_278] : memref<16x64xf32, #tpu.memory_space<vmem>>, vector<2x32xf32>
    tpu.vector_store %arg17[%c2_277, %c32_278], %1120 {strides = array<i32>} : memref<16x64xf32, #tpu.memory_space<vmem>>, vector<2x32xf32>,
    %1122 = vector.extract_strided_slice %606 {offsets = [14, 0], sizes = [2, 128], strides = [1, 1]} : vector<16x128xf32> to vector<2x128xf32>
    %1123 = vector.extract_strided_slice %606 {offsets = [0, 0], sizes = [2, 128], strides = [1, 1]} : vector<16x128xf32> to vector<2x128xf32>
    %1124 = vector.shape_cast %2 : vector<1x128xi1> to vector<1x128xi1>
    %1125 = vector.broadcast %1124 : vector<1x128xi1> to vector<2x128xi1>
    %1126 = arith.select %1125, %1122, %1123 : vector<2x128xi1>, vector<2x128xf32>
    %cst_279 = arith.constant dense<0.000000e+00> : vector<2x128xf32>
    %1127 = tpu.matmul %1081, %612, %cst_279 {dimension_numbers = #tpu.dot_dimension_numbers<[1], [0], [0], [1], [0, 0, 1, 1], [], []>} : vector<2x32xf32>, vector<32x128xf32>, vector<2x128xf32> -> vector<2x128xf32>
    %1128 = arith.addf %1126, %1127 : vector<2x128xf32>
    %1129 = vector.extract_strided_slice %1128 {offsets = [0, 0], sizes = [2, 32], strides = [1, 1]} : vector<2x128xf32> to vector<2x32xf32>
    %1130 = arith.negf %1129 : vector<2x32xf32>
    %1131 = math.exp %1130 : vector<2x32xf32>
    %cst_280 = arith.constant 1.000000e+00 : f32
    %1132 = vector.broadcast %cst_280 : f32 to vector<2x32xf32>
    %1133 = arith.addf %1132, %1131 : vector<2x32xf32>
    %1134 = arith.divf %1132, %1133 : vector<2x32xf32>
    %1135 = vector.extract_strided_slice %1128 {offsets = [0, 32], sizes = [2, 32], strides = [1, 1]} : vector<2x128xf32> to vector<2x32xf32>
    %1136 = arith.negf %1135 : vector<2x32xf32>
    %1137 = math.exp %1136 : vector<2x32xf32>
    %cst_281 = arith.constant 1.000000e+00 : f32
    %1138 = vector.broadcast %cst_281 : f32 to vector<2x32xf32>
    %1139 = arith.addf %1138, %1137 : vector<2x32xf32>
    %1140 = arith.divf %1138, %1139 : vector<2x32xf32>
    %1141 = vector.extract_strided_slice %1128 {offsets = [0, 64], sizes = [2, 32], strides = [1, 1]} : vector<2x128xf32> to vector<2x32xf32>
    %1142 = math.tanh %1141 : vector<2x32xf32>
    %1143 = vector.extract_strided_slice %1128 {offsets = [0, 96], sizes = [2, 32], strides = [1, 1]} : vector<2x128xf32> to vector<2x32xf32>
    %1144 = arith.negf %1143 : vector<2x32xf32>
    %1145 = math.exp %1144 : vector<2x32xf32>
    %cst_282 = arith.constant 1.000000e+00 : f32
    %1146 = vector.broadcast %cst_282 : f32 to vector<2x32xf32>
    %1147 = arith.addf %1146, %1145 : vector<2x32xf32>
    %1148 = arith.divf %1146, %1147 : vector<2x32xf32>
    %1149 = arith.mulf %1140, %1079 : vector<2x32xf32>
    %1150 = arith.mulf %1134, %1142 : vector<2x32xf32>
    %1151 = arith.addf %1149, %1150 : vector<2x32xf32>
    %1152 = math.tanh %1151 : vector<2x32xf32>
    %1153 = arith.mulf %1148, %1152 : vector<2x32xf32>
    %1154 = vector.extract_strided_slice %611 {offsets = [14, 0], sizes = [2, 256], strides = [1, 1]} : vector<16x256xf32> to vector<2x256xf32>
    %1155 = vector.extract_strided_slice %611 {offsets = [0, 0], sizes = [2, 256], strides = [1, 1]} : vector<16x256xf32> to vector<2x256xf32>
    %1156 = vector.shape_cast %5 : vector<1x256xi1> to vector<1x256xi1>
    %1157 = vector.broadcast %1156 : vector<1x256xi1> to vector<2x256xi1>
    %1158 = arith.select %1157, %1154, %1155 : vector<2x256xi1>, vector<2x256xf32>
    %cst_283 = arith.constant dense<0.000000e+00> : vector<2x256xf32>
    %1159 = tpu.matmul %1113, %613, %cst_283 {dimension_numbers = #tpu.dot_dimension_numbers<[1], [0], [0], [1], [0, 0, 1, 1], [], []>} : vector<2x64xf32>, vector<64x256xf32>, vector<2x256xf32> -> vector<2x256xf32>
    %1160 = arith.addf %1158, %1159 : vector<2x256xf32>
    %1161 = vector.extract_strided_slice %1160 {offsets = [0, 0], sizes = [2, 64], strides = [1, 1]} : vector<2x256xf32> to vector<2x64xf32>
    %1162 = arith.negf %1161 : vector<2x64xf32>
    %1163 = math.exp %1162 : vector<2x64xf32>
    %cst_284 = arith.constant 1.000000e+00 : f32
    %1164 = vector.broadcast %cst_284 : f32 to vector<2x64xf32>
    %1165 = arith.addf %1164, %1163 : vector<2x64xf32>
    %1166 = arith.divf %1164, %1165 : vector<2x64xf32>
    %1167 = vector.extract_strided_slice %1160 {offsets = [0, 64], sizes = [2, 64], strides = [1, 1]} : vector<2x256xf32> to vector<2x64xf32>
    %1168 = arith.negf %1167 : vector<2x64xf32>
    %1169 = math.exp %1168 : vector<2x64xf32>
    %cst_285 = arith.constant 1.000000e+00 : f32
    %1170 = vector.broadcast %cst_285 : f32 to vector<2x64xf32>
    %1171 = arith.addf %1170, %1169 : vector<2x64xf32>
    %1172 = arith.divf %1170, %1171 : vector<2x64xf32>
    %1173 = vector.extract_strided_slice %1160 {offsets = [0, 128], sizes = [2, 64], strides = [1, 1]} : vector<2x256xf32> to vector<2x64xf32>
    %1174 = math.tanh %1173 : vector<2x64xf32>
    %1175 = vector.extract_strided_slice %1160 {offsets = [0, 192], sizes = [2, 64], strides = [1, 1]} : vector<2x256xf32> to vector<2x64xf32>
    %1176 = arith.negf %1175 : vector<2x64xf32>
    %1177 = math.exp %1176 : vector<2x64xf32>
    %cst_286 = arith.constant 1.000000e+00 : f32
    %1178 = vector.broadcast %cst_286 : f32 to vector<2x64xf32>
    %1179 = arith.addf %1178, %1177 : vector<2x64xf32>
    %1180 = arith.divf %1178, %1179 : vector<2x64xf32>
    %1181 = arith.mulf %1172, %1111 : vector<2x64xf32>
    %1182 = arith.mulf %1166, %1174 : vector<2x64xf32>
    %1183 = arith.addf %1181, %1182 : vector<2x64xf32>
    %1184 = math.tanh %1183 : vector<2x64xf32>
    %1185 = arith.mulf %1180, %1184 : vector<2x64xf32>
    %1186 = vector.extract_strided_slice %1153 {offsets = [0, 0], sizes = [2, 16], strides = [1, 1]} : vector<2x32xf32> to vector<2x16xf32>
    %c14_287 = arith.constant 14 : index
    %c0_288 = arith.constant 0 : index
    %1187 = vector.load %arg16[%c14_287, %c0_288] : memref<16x32xf32, #tpu.memory_space<vmem>>, vector<2x16xf32>
    tpu.vector_store %arg16[%c14_287, %c0_288], %1186 {strides = array<i32>} : memref<16x32xf32, #tpu.memory_space<vmem>>, vector<2x16xf32>,
    %1188 = vector.extract_strided_slice %1153 {offsets = [0, 16], sizes = [2, 16], strides = [1, 1]} : vector<2x32xf32> to vector<2x16xf32>
    %c0_289 = arith.constant 0 : index
    %c16_290 = arith.constant 16 : index
    %1189 = vector.load %arg16[%c0_289, %c16_290] : memref<16x32xf32, #tpu.memory_space<vmem>>, vector<2x16xf32>
    tpu.vector_store %arg16[%c0_289, %c16_290], %1188 {strides = array<i32>} : memref<16x32xf32, #tpu.memory_space<vmem>>, vector<2x16xf32>,
    %1190 = vector.extract_strided_slice %1185 {offsets = [0, 0], sizes = [2, 32], strides = [1, 1]} : vector<2x64xf32> to vector<2x32xf32>
    %c14_291 = arith.constant 14 : index
    %c0_292 = arith.constant 0 : index
    %1191 = vector.load %arg17[%c14_291, %c0_292] : memref<16x64xf32, #tpu.memory_space<vmem>>, vector<2x32xf32>
    tpu.vector_store %arg17[%c14_291, %c0_292], %1190 {strides = array<i32>} : memref<16x64xf32, #tpu.memory_space<vmem>>, vector<2x32xf32>,
    %1192 = vector.extract_strided_slice %1185 {offsets = [0, 32], sizes = [2, 32], strides = [1, 1]} : vector<2x64xf32> to vector<2x32xf32>
    %c0_293 = arith.constant 0 : index
    %c32_294 = arith.constant 32 : index
    %1193 = vector.load %arg17[%c0_293, %c32_294] : memref<16x64xf32, #tpu.memory_space<vmem>>, vector<2x32xf32>
    tpu.vector_store %arg17[%c0_293, %c32_294], %1192 {strides = array<i32>} : memref<16x64xf32, #tpu.memory_space<vmem>>, vector<2x32xf32>,
    return
  }
}

</mosaic_0001>

<bundles_post_ra>
// kernel: rnn_encoder_forward.1
= control target key start
LH: loop header
LB: loop body
LE: loop exit
PB: predicated region body
PF: predicated region fallthrough
CT: control target
= control target key end

     0   :  { %s6909_s0 = inlined_call_operand.vmem [shape: f32[16,24], index: 0, kind: input, shape index: {}]   ;;  %s6910_s1 = inlined_call_operand.vmem [shape: f32[16,40], index: 1, kind: input, shape index: {}]   ;;  %s6911_s2 = inlined_call_operand.vmem [shape: f32[1,128], index: 2, kind: input, shape index: {}]   ;;  %s6912_s3 = inlined_call_operand.vmem [shape: f32[1,256], index: 3, kind: input, shape index: {}]   ;;  %s6913_s4 = inlined_call_operand.vmem [shape: f32[24,128], index: 4, kind: input, shape index: {}]   ;;  %s6914_s5 = inlined_call_operand.hbm [shape: f32[32,128], index: 5, kind: input, shape index: {}]   ;;  %s6915_s6 = inlined_call_operand.vmem [shape: f32[1,128], index: 6, kind: input, shape index: {}]   ;;  %s6916_s7 = inlined_call_operand.hbm [shape: f32[32,128], index: 7, kind: input, shape index: {}]   ;;  %s6917_s8 = inlined_call_operand.hbm [shape: f32[32,128], index: 8, kind: input, shape index: {}]   ;;  %s6918_s9 = inlined_call_operand.hbm [shape: f32[1,128], index: 9, kind: input, shape index: {}]   ;;  %s6919_s10 = inlined_call_operand.vmem [shape: f32[40,256], index: 10, kind: input, shape index: {}]   ;;  %s6920_s11 = inlined_call_operand.hbm [shape: f32[64,256], index: 11, kind: input, shape index: {}]   ;;  %s6921_s12 = inlined_call_operand.vmem [shape: f32[1,256], index: 12, kind: input, shape index: {}]   ;;  %s6922_s13 = inlined_call_operand.hbm [shape: f32[64,256], index: 13, kind: input, shape index: {}]   ;;  %s6923_s14 = inlined_call_operand.hbm [shape: f32[64,256], index: 14, kind: input, shape index: {}]   ;;  %s6924_s15 = inlined_call_operand.vmem [shape: f32[1,256], index: 15, kind: input, shape index: {}]   ;;  %s6925_s16 = inlined_call_operand.vmem [shape: f32[16,32], index: 16, kind: output, shape index: {0}]   ;;  %s6926_s17 = inlined_call_operand.vmem [shape: f32[16,64], index: 17, kind: output, shape index: {1}]  }
   0x1   :  { %6934 = sst [smem:[#allocation17_spill]] %s6909_s0 }
   0x2   :  { %6935 = sst [smem:[#allocation18_spill]] %s6910_s1 }
   0x3   :  { %23 = vsyncpa [#allocation3], 0 }
   0x4   :  { %24 = vsyncpa [#allocation5], 0 }
   0x5   :  { %25 = vsyncpa [#allocation8], 0 }
   0x6   :  { %26 = vsyncpa [#allocation11], 0  ;;  %s5537_s24 = smov [#allocation4]   ;;  %s5538_s26 = smov [#allocation7]  }
   0x7   :  { %s56_s25 = sshll.u32 %s5537_s24, 4  ;;  %s81_s27 = sshll.u32 %s5538_s26, 4  ;;  %s57_s25 = int_to_ptr.vmem [resolvable:$true] %s56_s25  ;;  %s5644_s27 = int_to_ptr.vmem [resolvable:$true] %s81_s27 }
   0x8   :  { %s5375_s0 = scalar_lea.hbm %s6916_s7, 512 }
   0x9   :  { %p5376_p0 = scmp.ne.s32.totalorder %s6916_s7, %s5375_s0  ;;  %p5379_p1 = scmp.lt.u32.totalorder %s5375_s0, %s6916_s7 }
   0xb   :  { %p5381_p2 = pnand %p5379_p1, %p5376_p0 }
   0xd   :  { %5384 = shalt.err (!%p5381_p2)
}
   0xe   :  { %s5385_s20 = scalar_lea.vmem %s57_s25, 512  ;;  %p5390_p4 = scmp.lt.s32.totalorder %s57_s25, %s57_s25 }
   0xf   :  { %p5386_p3 = scmp.ne.s32.totalorder %s57_s25, %s5385_s20  ;;  %p5391_p5 = scmp.lt.s32.totalorder %s5385_s20, %s5385_s20 }
  0x11   :  { %p5392_p6 = por %p5391_p5, %p5390_p4 }
  0x13   :  { %p5393_p7 = pnand %p5392_p6, %p5386_p3 }
  0x15   :  { %5396 = shalt.err (!%p5393_p7)
}
  0x16   :  { %s5539_s21 = smov 128   ;;  %s5540_s22 = smov 8  }
  0x17   :  { %62 = dma.hbm_to_vmem [thread:$0]  %s6916_s7, 512, %s57_s25, [#allocation5], %s5539_s21, %s5539_s21, %s5540_s22  }
  0x18   :  { %s5397_s29 = scalar_lea.hbm %s6918_s9, 16 }
  0x19   :  { %p5398_p8 = scmp.ne.s32.totalorder %s6918_s9, %s5397_s29  ;;  %p5401_p9 = scmp.lt.u32.totalorder %s5397_s29, %s6918_s9 }
  0x1b   :  { %p5403_p10 = pnand %p5401_p9, %p5398_p8 }
  0x1d   :  { %5406 = shalt.err (!%p5403_p10)
}
  0x1e   :  { %s5407_s1 = scalar_lea.vmem %s5644_s27, 16  ;;  %s5411_s7 = scalar_lea.vmem %s5644_s27, 32 }
  0x1f   :  { %p5408_p11 = scmp.ne.s32.totalorder %s5644_s27, %s5407_s1  ;;  %p5412_p12 = scmp.lt.s32.totalorder %s5644_s27, %s5644_s27 }
  0x20   :  { %p5413_p13 = scmp.lt.s32.totalorder %s5411_s7, %s5407_s1 }
  0x22   :  { %p5414_p0 = por %p5413_p13, %p5412_p12 }
  0x24   :  { %p5415_p1 = pnand %p5414_p0, %p5408_p11 }
  0x26   :  { %5418 = shalt.err (!%p5415_p1)
}
  0x27   :  { %84 = dma.hbm_to_vmem [thread:$0]  %s6918_s9, 16, %s5644_s27, [#allocation8]  }
  0x28   :  { %s5541_s23 = smov [#allocation10]   ;;  %s5542_s26 = smov [#allocation2]  }
  0x29   :  { %s106_s24 = sshll.u32 %s5541_s23, 4  ;;  %s42_s28 = sshll.u32 %s5542_s26, 4  ;;  %s107_s24 = int_to_ptr.vmem [resolvable:$true] %s106_s24  ;;  %s5679_s28 = int_to_ptr.vmem [resolvable:$true] %s42_s28 }
  0x2a   :  { %s5419_s30 = scalar_lea.hbm %s6922_s13, 2048 }
  0x2b   :  { %p5420_p2 = scmp.ne.s32.totalorder %s6922_s13, %s5419_s30  ;;  %p5423_p3 = scmp.lt.u32.totalorder %s5419_s30, %s6922_s13 }
  0x2d   :  { %p5425_p4 = pnand %p5423_p3, %p5420_p2 }
  0x2f   :  { %5428 = shalt.err (!%p5425_p4)
}
  0x30   :  { %s5429_s9 = scalar_lea.vmem %s107_s24, 2048  ;;  %p5434_p6 = scmp.lt.s32.totalorder %s107_s24, %s107_s24 }
  0x31   :  { %p5430_p5 = scmp.ne.s32.totalorder %s107_s24, %s5429_s9  ;;  %p5435_p7 = scmp.lt.s32.totalorder %s5429_s9, %s5429_s9 }
  0x33   :  { %p5436_p8 = por %p5435_p7, %p5434_p6 }
  0x35   :  { %p5437_p9 = pnand %p5436_p8, %p5430_p5 }
  0x37   :  { %5440 = shalt.err (!%p5437_p9)
}
  0x38   :  { %s5543_s27 = smov 256   ;;  %s5544_s25 = smov 16  }
  0x39   :  { %112 = dma.hbm_to_vmem [thread:$0]  %s6922_s13, 2048, %s107_s24, [#allocation11], %s5543_s27, %s5543_s27, %s5544_s25  }
  0x3a   :  { %s5441_s0 = scalar_lea.hbm %s6914_s5, 512 }
  0x3b   :  { %p5442_p10 = scmp.ne.s32.totalorder %s6914_s5, %s5441_s0  ;;  %p5445_p11 = scmp.lt.u32.totalorder %s5441_s0, %s6914_s5 }
  0x3d   :  { %p5447_p12 = pnand %p5445_p11, %p5442_p10 }
  0x3f   :  { %5450 = shalt.err (!%p5447_p12)
}
  0x40   :  { %s5451_s7 = scalar_lea.vmem %s5679_s28, 512  ;;  %p5456_p0 = scmp.lt.s32.totalorder %s5679_s28, %s5679_s28 }
  0x41   :  { %p5452_p13 = scmp.ne.s32.totalorder %s5679_s28, %s5451_s7  ;;  %p5457_p1 = scmp.lt.s32.totalorder %s5451_s7, %s5451_s7 }
  0x43   :  { %p5458_p2 = por %p5457_p1, %p5456_p0 }
  0x45   :  { %p5459_p3 = pnand %p5458_p2, %p5452_p13 }
  0x47   :  { %5462 = shalt.err (!%p5459_p3)
}
  0x48   :  { %48 = dma.hbm_to_vmem [thread:$0]  %s6914_s5, 512, %s5679_s28, [#allocation3], %s5539_s21, %s5539_s21, %s5540_s22  }
  0x49   :  { %s5545_s9 = smov [#allocation6]   ;;  %s5546_s23 = smov [#allocation9]  }
  0x4a   :  { %s68_s20 = sshll.u32 %s5545_s9, 4  ;;  %s92_s26 = sshll.u32 %s5546_s23, 4  ;;  %s69_s20 = int_to_ptr.vmem [resolvable:$true] %s68_s20  ;;  %s5716_s26 = int_to_ptr.vmem [resolvable:$true] %s92_s26 }
  0x4b   :  { %s5463_s30 = scalar_lea.hbm %s6917_s8, 512 }
  0x4c   :  { %p5464_p4 = scmp.ne.s32.totalorder %s6917_s8, %s5463_s30  ;;  %p5467_p5 = scmp.lt.u32.totalorder %s5463_s30, %s6917_s8 }
  0x4e   :  { %p5469_p6 = pnand %p5467_p5, %p5464_p4 }
  0x50   :  { %5472 = shalt.err (!%p5469_p6)
}
  0x51   :  { %s5473_s5 = scalar_lea.vmem %s69_s20, 512  ;;  %p5478_p8 = scmp.lt.s32.totalorder %s69_s20, %s69_s20 }
  0x52   :  { %p5474_p7 = scmp.ne.s32.totalorder %s69_s20, %s5473_s5  ;;  %p5479_p9 = scmp.lt.s32.totalorder %s5473_s5, %s5473_s5 }
  0x54   :  { %p5480_p10 = por %p5479_p9, %p5478_p8 }
  0x56   :  { %p5481_p11 = pnand %p5480_p10, %p5474_p7 }
  0x58   :  { %5484 = shalt.err (!%p5481_p11)
}
  0x59   :  { %74 = dma.hbm_to_vmem [thread:$0]  %s6917_s8, 512, %s69_s20, [#allocation5], %s5539_s21, %s5539_s21, %s5540_s22  }
  0x5a   :  { %s5485_s23 = scalar_lea.hbm %s6920_s11, 2048 }
  0x5b   :  { %p5486_p12 = scmp.ne.s32.totalorder %s6920_s11, %s5485_s23  ;;  %p5489_p13 = scmp.lt.u32.totalorder %s5485_s23, %s6920_s11 }
  0x5d   :  { %p5491_p0 = pnand %p5489_p13, %p5486_p12 }
  0x5f   :  { %5494 = shalt.err (!%p5491_p0)
}
  0x60   :  { %s5495_s19 = scalar_lea.vmem %s5716_s26, 2048  ;;  %p5500_p2 = scmp.lt.s32.totalorder %s5716_s26, %s5716_s26 }
  0x61   :  { %p5496_p1 = scmp.ne.s32.totalorder %s5716_s26, %s5495_s19  ;;  %p5501_p3 = scmp.lt.s32.totalorder %s5495_s19, %s5495_s19 }
  0x63   :  { %p5502_p4 = por %p5501_p3, %p5500_p2 }
  0x65   :  { %p5503_p5 = pnand %p5502_p4, %p5496_p1 }
  0x67   :  { %5506 = shalt.err (!%p5503_p5)
}
  0x68   :  { %98 = dma.hbm_to_vmem [thread:$0]  %s6920_s11, 2048, %s5716_s26, [#allocation8], %s5543_s27, %s5543_s27, %s5544_s25  }
  0x69   :  { %s5547_s22 = smov [#allocation12]   ;;  %s5507_s5 = scalar_lea.hbm %s6923_s14, 2048 }
  0x6a   :  { %s118_s20 = sshll.u32 %s5547_s22, 4  ;;  %p5508_p6 = scmp.ne.s32.totalorder %s6923_s14, %s5507_s5  ;;  %s119_s20 = int_to_ptr.vmem [resolvable:$true] %s118_s20 }
  0x6b   :  { %p5511_p7 = scmp.lt.u32.totalorder %s5507_s5, %s6923_s14 }
  0x6d   :  { %p5513_p8 = pnand %p5511_p7, %p5508_p6 }
  0x6f   :  { %5516 = shalt.err (!%p5513_p8)
}
  0x70   :  { %s5517_s23 = scalar_lea.vmem %s119_s20, 2048  ;;  %p5522_p10 = scmp.lt.s32.totalorder %s119_s20, %s119_s20 }
  0x71   :  { %p5518_p9 = scmp.ne.s32.totalorder %s119_s20, %s5517_s23  ;;  %p5523_p11 = scmp.lt.s32.totalorder %s5517_s23, %s5517_s23 }
  0x73   :  { %p5524_p12 = por %p5523_p11, %p5522_p10 }
  0x75   :  { %p5525_p13 = pnand %p5524_p12, %p5518_p9 }
  0x77   :  { %5528 = shalt.err (!%p5525_p13)
}
  0x78   :  { %124 = dma.hbm_to_vmem [thread:$0]  %s6923_s14, 2048, %s119_s20, [#allocation11], %s5543_s27, %s5543_s27, %s5544_s25  }
  0x79   :  { %5529 = dma.done.wait [#allocation3], 512  }
  0x7a   :  { %5530 = vsyncadd [#allocation3], 4294966784 }
  0x7b   :  { %5531 = dma.done.wait [#allocation5], 1024  }
  0x7c   :  { %5532 = vsyncadd [#allocation5], 4294966272 }
  0x7d   :  { %5533 = dma.done.wait [#allocation8], 2064  }
  0x7e   :  { %5534 = vsyncadd [#allocation8], 4294965232 }
  0x7f   :  { %5535 = dma.done.wait [#allocation11], 4096  }
  0x80   :  { %5536 = vsyncadd [#allocation11], 4294963200  ;;  %v5548_v0 = vmov 0.0   ;;  %vm166_vm0 = vcmask 195584   ;;  %v156_v1 = vld [vmem:[%s6913_s4] sm:$0xff]  ;;  %v157_v2 = vld [vmem:[%s6913_s4 + $0x8] sm:$0xff]  ;;  %v260_v14 = vlaneseq }
  0x81   :  { %341 = vmatprep.mubr.f32.mxu1 %v5548_v0  ;;  %v4650_v3 = vpack.c.bf16 %v157_v2, %v156_v1  ;;  %s6936_s25 = sld [smem:[#allocation17_spill]]  ;;  %v158_v5 = vld [vmem:[%s6913_s4 + $0x10] sm:$0xff]  ;;  %v354_v6 = vld [vmem:[#allocation2] sm:$0xff]  ;;  %v355_v7 = vld [vmem:[#allocation2 + $0x8] sm:$0xff]  ;;  %v5549_v12 = vmov 0.0|0.0   ;;  %vm5550_vm1 = vmmov 0  }
  0x82   :  { %v5785_v9 = vpack.c.bf16 %v355_v7, %v354_v6  ;;  %v356_v10 = vld [vmem:[#allocation2 + $0x10] sm:$0xff]  ;;  %v357_v11 = vld [vmem:[#allocation2 + $0x18] sm:$0xff]  ;;  %v148_v15 = vld [vmem:[%s6911_s2] sm:$0x1]  ;;  %v5806_v16 = vshrl.u32 %v260_v14, 7  ;;  %v5551_v18 = vmov 0  }
  0x83   :  { %4651 = vmatprep.subr.bf16.mxu0 %v4650_v3  ;;  %v5790_v13 = vpack.c.bf16 %v357_v11, %v356_v10  ;;  %vm149_vm2 = vcmp.gt.f32.partialorder %v148_v15, 0.5  ;;  %v4277_v20 = vld [vmem:[%s6915_s6] ss:$0 sm:$0xff]  ;;  %s5552_s2 = smov 64   ;;  %s5553_s6 = smov 32   ;;  %v249_v48 = vld [vmem:[%s6919_s10 + $0x8] sm:$0xff] }
  0x84   :  { %4653 = vmatpush3.bf16.msra.mxu0 %v4650_v3  ;;  %v5809_v17 = vsub.s32 0, %v5806_v16  ;;  %v374_v19 = vsel %vm149_vm2, 1, %v5551_v18  ;;  %v251_v49 = vld [vmem:[%s6919_s10 + $0x18] sm:$0xff]  ;;  %v248_v50 = vld [vmem:[%s6919_s10] sm:$0xff]  ;;  %v250_v52 = vld [vmem:[%s6919_s10 + $0x10] sm:$0xff]  ;;  %s6939_s7 = sld [smem:[#allocation18_spill]] }
  0x85   :  { %4458 = vmatprep.subr.mxu0 %v158_v5  ;;  %v4654_v51 = vpack.c.bf16 %v251_v49, %v249_v48  ;;  %v253_v53 = vld [vmem:[%s6919_s10 + $0x28] sm:$0xff]  ;;  %v255_v54 = vld [vmem:[%s6919_s10 + $0x38] sm:$0xff]  ;;  %v4656_v55 = vpack.c.bf16 %v250_v52, %v248_v50  ;;  %v252_v57 = vld [vmem:[%s6919_s10 + $0x20] sm:$0xff]  ;;  %vm270_vm4 = vcmask 326656   ;;  %vm604_vm5 = vcmask 123904  }
  0x86   :  { %v378_v21 = vrot.slane %v374_v19, %v5809_v17  ;;  %v4658_v56 = vpack.c.bf16 %v255_v54, %v253_v53  ;;  %v254_v58 = vld [vmem:[%s6919_s10 + $0x30] sm:$0xff]  ;;  %v361_v60 = vld [vmem:[#allocation9 + $0x18] sm:$0xff]  ;;  %v257_v63 = vld [vmem:[%s6919_s10 + $0x48] sm:$0xff]  ;;  %vm606_vm6 = vcmask 255104   ;;  %vm384_vm7 = vcmask 261120  }
  0x87   :  { %v152_v4 = vld [vmem:[%s6936_s25] sm:$0xff]  ;;  %v153_v8 = vld [vmem:[%s6936_s25 + $0x8] sm:$0xff]  ;;  %4655 = vmatprep.subr.bf16.mxu1 %v4654_v51  ;;  %v4660_v61 = vpack.c.bf16 %v254_v58, %v252_v57  ;;  %v360_v2 = vld [vmem:[#allocation9 + $0x10] sm:$0xff]  ;;  %vm612_vm11 = vcmask 254976   ;;  %vm614_vm12 = vcmask 517376   ;;  %vm502_vm13 = vcmask 523264  }
  0x88   :  { %4460 = vmatprep.mubr.msk.f32.mxu0 %vm166_vm0, %v152_v4  ;;  %4459 = vmatpush3.msra.mxu0 %v158_v5  ;;  %vm5816_vm3 = vcmp.eq.s32.totalorder %v378_v21, 1  ;;  %v359_v59 = vld [vmem:[#allocation9 + $0x8] sm:$0xff]  ;;  %v358_v1 = vld [vmem:[#allocation9] sm:$0xff]  ;;  %v365_v4 = vld [vmem:[#allocation9 + $0x38] sm:$0xff]  ;;  %vm838_vm14 = vcmask 125954   ;;  %vm6933_vm15 = vcmask 257154  }
  0x89   :  { %4461 = vmatmul.mubr.msk.f32.vlgmr.msra.gmra.mrb[0].mxu0 %vm166_vm0, %v153_v8  ;;  %4662 = vmatprep.subr.bf16.mxu0 %v5549_v12  ;;  %v5870_v62 = vpack.c.bf16 %v361_v60, %v359_v59  ;;  %v363_v3 = vld [vmem:[#allocation9 + $0x28] sm:$0xff]  ;;  %v256_v5 = vld [vmem:[%s6919_s10 + $0x40] sm:$0xff]  ;;  %v5882_v8 = vpack.c.bf16 %v360_v2, %v358_v1  ;;  %v364_v14 = vld [vmem:[#allocation9 + $0x30] sm:$0xff]  ;;  %vm6930_vm0 = vcmask 130054   ;;  %vm6929_vm2 = vcmask 261254  }
  0x8a   :  { %4664 = vmatpush3.bf16.msra.mxu0 %v5785_v9  ;;  %4471 = vmatprep.mubr.msk.f32.mxu0 %vm5550_vm1, %v5548_v0  ;;  %v154_v7 = vld [vmem:[%s6939_s7] sm:$0xff]  ;;  %v5885_v10 = vpack.c.bf16 %v365_v4, %v363_v3  ;;  %v367_v15 = vld [vmem:[#allocation9 + $0x48] sm:$0xff] }
  0x8b   :  { %4665 = vmatprep.subr.bf16.mxu0 %v5549_v12  ;;  %4657 = vmatpush1.bf16.msra.mxu1 %v4656_v55  ;;  %v362_v11 = vld [vmem:[#allocation9 + $0x20] sm:$0xff]  ;;  %v369_v19 = vld [vmem:[#allocation9 + $0x58] sm:$0xff] }
  0x8c   :  { %4659 = vmatprep.subr.bf16.mxu1 %v4658_v56  ;;  %v155_v21 = vld [vmem:[%s6939_s7 + $0x8] sm:$0xff]  ;;  %v258_v48 = vld [vmem:[%s6921_s12] sm:$0x3] }
  0x8d   :  { %v263_v49 = vrot.slane %v258_v48, %v5809_v17 }
  0x8e   :  { %4667 = vmatpush3.bf16.msra.mxu0 %v5790_v13 }
  0x8f   :  { %4684 = vmatprep.subr.bf16.mxu0 %v5549_v12  ;;  %4661 = vmatpush1.bf16.msra.mxu1 %v4660_v61 }
  0x90   :  { %285 = vmatprep.subr.mxu1 %v257_v63 }
  0x91   :  { %4472 = vmatmul.mubr.f32.vlgmr.msra.gmra.mrb[2].mxu0 %v5548_v0 }
  0x92   :  { %4686 = vmatpush3.bf16.msra.mxu0 %v5785_v9  ;;  %4482 = vmatprep.mubr.msk.f32.mxu0 %vm5550_vm1, %v5548_v0 }
  0x93   :  { %4687 = vmatprep.subr.bf16.mxu0 %v5549_v12  ;;  %286 = vmatpush1.msra.mxu1 %v256_v5 }
  0x94   :  { %4669 = vmatprep.subr.bf16.mxu1 %v5870_v62  ;;  %4280 = vmatmul.mubr.msk.f32.vlgmr.msra.gmra.mrb[0].mxu1 %vm270_vm4, %v154_v7 }
  0x95   :  { %4671 = vmatpush1.bf16.msra.mxu1 %v5882_v8  ;;  %347 = vmatprep.mubr.f32.mxu1 %v5548_v0 }
  0x96   :  { %4689 = vmatpush3.bf16.msra.mxu0 %v5790_v13  ;;  %4673 = vmatprep.subr.bf16.mxu1 %v5885_v10 }
  0x97   :  { %4691 = vmatprep.subr.bf16.mxu0 %v5870_v62 }
  0x98   :  { %4281 = vmatmul.mubr.msk.f32.gmra.mrb[2].mxu1 %vm270_vm4, %v155_v21  ;;  %vm6932_vm4 = vcmask 128004  }
  0x99   :  { %569 = vmatprep.mubr.f32.mxu1 %v5548_v0 }
 0x15c   :  { %v4462_v22 = vpop.f32.mrb[0].mxu0 }
 0x15d   :  { %v245_v23 = vadd.f32 %v4462_v22, %v4277_v20  ;;  %v239_v24 = vpop.f32.mrb[1].mxu0  ;;  %v5897_v22 = vpack.c.bf16 %v369_v19, %v367_v15 }
 0x15e   :  { %v240_v25 = vadd.f32 %v4277_v20, %v239_v24  ;;  %v5890_v20 = vpack.c.bf16 %v364_v14, %v362_v11  ;;  %v368_v24 = vld [vmem:[#allocation9 + $0x50] sm:$0xff] }
 0x15f   :  { %v381_v27 = vrot.slane %v245_v23, 6  ;;  %v616_v28 = vrot.slane %v245_v23, 2 }
 0x160   :  { %v1313_v29 = vrot.slane %v240_v25, 6  ;;  %v1542_v30 = vrot.slane %v240_v25, 2  ;;  %4675 = vmatpush1.bf16.msra.mxu1 %v5890_v20 }
 0x161   :  { %v5822_v31 = vsel %vm5816_vm3, %v240_v25, %v381_v27  ;;  %v5826_v32 = vsel %vm5816_vm3, %v240_v25, %v616_v28  ;;  %v371_v25 = vld [vmem:[#allocation9 + $0x68] sm:$0xff]  ;;  %v373_v27 = vld [vmem:[#allocation9 + $0x78] sm:$0xff]  ;;  %4677 = vmatprep.subr.bf16.mxu1 %v5897_v22 }
 0x162   :  { %v5830_v33 = vsel %vm5816_vm3, %v245_v23, %v1313_v29  ;;  %v5834_v34 = vsel %vm5816_vm3, %v245_v23, %v1542_v30  ;;  %v366_v23 = vld [vmem:[#allocation9 + $0x40] sm:$0xff]  ;;  %v5905_v29 = vpack.c.bf16 %v373_v27, %v371_v25 }
 0x163   :  { %v5901_v28 = vpack.c.bf16 %v368_v24, %v366_v23  ;;  %v370_v30 = vld [vmem:[#allocation9 + $0x60] sm:$0xff] }
 0x164   :  { %v454_v35 = vpop.f32.mrb[2].mxu0 }
 0x165   :  { %v458_v36 = vadd.f32 %v454_v35, %v5822_v31  ;;  %v4473_v37 = vpop.f32.mrb[3].mxu0  ;;  %v372_v35 = vld [vmem:[#allocation9 + $0x70] sm:$0xff]  ;;  %4679 = vmatpush1.bf16.msra.mxu1 %v5901_v28 }
 0x166   :  { %4681 = vmatprep.subr.bf16.mxu1 %v5905_v29 }
 0x167   :  { %5055 = vtanh.f32 %v458_v36  ;;  %v4282_v39 = vmul.f32 -1.442695, %v458_v36  ;;  %v5908_v36 = vpack.c.bf16 %v372_v35, %v370_v30 }
 0x169   :  { %5057 = vpow2.f32 %v4282_v39  ;;  %4683 = vmatpush1.bf16.msra.mxu1 %v5908_v36  ;;  %v343_v39 = vpop.f32.mrb[0].mxu1 }
 0x16a   :  { %4713 = vmatprep.subr.bf16.mxu1 %v5870_v62  ;;  %v5954_v53 = vadd.f32 %v343_v39, %v263_v49 }
 0x16c   :  { %570 = vmatmul.mubr.f32.vlgmr.msra.gmra.mrb[4].mxu1 %v5548_v0 }
 0x16d   :  { %4715 = vmatpush1.bf16.msra.mxu1 %v5882_v8  ;;  %1025 = vmatprep.mubr.f32.mxu1 %v5548_v0 }
 0x16e   :  { %4717 = vmatprep.subr.bf16.mxu1 %v5885_v10 }
 0x171   :  { %v5056_v38 = vpop.eup %5055  ;;  %4719 = vmatpush1.bf16.msra.mxu1 %v5890_v20 }
 0x172   :  { %468 = vrot.lane.b32.xlu0 %v5056_v38, %s5552_s2  ;;  %4721 = vmatprep.subr.bf16.mxu1 %v5897_v22 }
 0x173   :  { %v5058_v40 = vpop.eup %5057 }
 0x174   :  { %v462_v41 = vadd.f32 1.0, %v5058_v40  ;;  %v345_v40 = vpop.f32.mrb[1].mxu1 }
 0x175   :  { %4723 = vmatpush1.bf16.msra.mxu1 %v5901_v28 }
 0x176   :  { %5059 = vrcp.f32 %v462_v41  ;;  %4725 = vmatprep.subr.bf16.mxu1 %v5905_v29  ;;  %v349_v41 = vpop.f32.mrb[2].mxu1 }
 0x177   :  { %v5951_v51 = vadd.f32 %v349_v41, %v263_v49 }
 0x179   :  { %4727 = vmatpush1.bf16.msra.mxu1 %v5908_v36  ;;  %v496_v54 = vrot.slane %v5951_v51, 6 }
 0x17a   :  { %4750 = vmatprep.subr.bf16.mxu1 %v5549_v12 }
 0x180   :  { %v5838_v42 = vpop.eup %5059 }
 0x181   :  { %v466_v45 = vmul.f32 0.0, %v5838_v42 }
 0x1e4   :  { %v469_v43 = vpop.permute.xlu0 %468 }
 0x1e5   :  { %v471_v44 = vmul.f32 %v5838_v42, %v469_v43  ;;  %v351_v43 = vpop.f32.mrb[3].mxu1 }
 0x1e7   :  { %473 = vrot.lane.b32.xlu0 %v471_v44, %s5553_s6 }
 0x23f   :  { %v571_v44 = vpop.f32.mrb[4].mxu1 }
 0x259   :  { %v474_v46 = vpop.permute.xlu0 %473 }
 0x25a   :  { %v5843_v47 = vadd.f32 %v474_v46, %v466_v45  ;;  %v150_v46 = vld [vmem:[%s6912_s3] sm:$0x3] }
 0x25b   :  { %vm151_vm8 = vcmp.gt.f32.partialorder %v150_v46, 0.5 }
 0x25c   :  { %5061 = vtanh.f32 %v5843_v47  ;;  %v483_v50 = vsel %vm151_vm8, 1, %v5551_v18  ;;  %v5968_v18 = vsub.s32 1, %v5806_v16  ;;  %vm6931_vm8 = vcmask 259204  }
 0x25d   :  { %v487_v52 = vrot.slane %v483_v50, %v5809_v17 }
 0x25e   :  { %v267_v59 = vrot.slane %v258_v48, %v5968_v18  ;;  %v491_v61 = vrot.slane %v483_v50, %v5968_v18  ;;  %v703_v48 = vrot.slane %v5843_v47, 6 }
 0x25f   :  { %vm5957_vm9 = vcmp.eq.s32.totalorder %v487_v52, 1 }
 0x260   :  { %v5964_v56 = vsel %vm5957_vm9, %v5954_v53, %v496_v54  ;;  %v5971_v60 = vadd.f32 %v351_v43, %v267_v59  ;;  %v5974_v63 = vadd.f32 %v345_v40, %v267_v59  ;;  %vm5977_vm10 = vcmp.eq.s32.totalorder %v491_v61, 1 }
 0x261   :  { %v576_v57 = vadd.f32 %v571_v44, %v5964_v56  ;;  %v722_v61 = vrot.slane %v5951_v51, 2 }
 0x262   :  { %v497_v1 = vrot.slane %v5971_v60, 6 }
 0x263   :  { %v4283_v58 = vmul.f32 -1.442695, %v576_v57 }
 0x264   :  { %v5984_v16 = vsel %vm5977_vm10, %v5974_v63, %v497_v1 }
 0x265   :  { %5063 = vpow2.f32 %v4283_v58 }
 0x266   :  { %v5062_v6 = vpop.eup %5061 }
 0x267   :  { %479 = vrot.lane.b32.xlu1 %v5062_v6, %s5552_s2 }
 0x26f   :  { %v5064_v3 = vpop.eup %5063 }
 0x270   :  { %v581_v4 = vadd.f32 1.0, %v5064_v3 }
 0x272   :  { %5065 = vrcp.f32 %v581_v4 }
 0x27c   :  { %v5066_v15 = vpop.eup %5065 }
 0x27d   :  { %v591_v41 = vmul.f32 0.0, %v5066_v15 }
 0x2d9   :  { %v480_v37 = vpop.permute.xlu1 %479 }
 0x2da   :  { %v482_v38 = vmul.f32 %v5838_v42, %v480_v37  ;;  %v573_v42 = vpop.f32.mrb[5].mxu1 }
 0x2db   :  { %v577_v5 = vadd.f32 %v573_v42, %v5984_v16 }
 0x2dc   :  { %601 = vrot.lane.b32.xlu1 %v482_v38, %s5553_s6 }
 0x2dd   :  { %5067 = vtanh.f32 %v577_v5  ;;  %v4284_v27 = vmul.f32 -1.442695, %v577_v5  ;;  %v6020_v5 = vsel %vm5957_vm9, %v5954_v53, %v722_v61 }
 0x2e7   :  { %v5068_v19 = vpop.eup %5067 }
 0x2e8   :  { %v592_v23 = vmul.f32 %v5068_v19, %v5066_v15 }
 0x34e   :  { %v602_v45 = vpop.permute.xlu1 %601 }
 0x34f   :  { %605 = vst.msk [vmem:[%s6925_s16] sm:$0x3] %vm604_vm5, %v602_v45  ;;  %4483 = vmatmul.mubr.msk.f32.vlgmr.msra.gmra.mrb[4].mxu0 %vm384_vm7, %v602_v45 }
 0x350   :  { %607 = vst.msk [vmem:[%s6925_s16 + $0xe] sm:$0x3] %vm606_vm6, %v602_v45  ;;  %4693 = vmatpush1.bf16.msra.mxu0 %v5882_v8  ;;  %794 = vmatprep.mubr.f32.mxu0 %v5548_v0 }
 0x351   :  { %4695 = vmatprep.subr.bf16.mxu0 %v5885_v10 }
 0x354   :  { %4697 = vmatpush1.bf16.msra.mxu0 %v5890_v20 }
 0x355   :  { %4699 = vmatprep.subr.bf16.mxu0 %v5897_v22 }
 0x358   :  { %4701 = vmatpush1.bf16.msra.mxu0 %v5901_v28 }
 0x359   :  { %4703 = vmatprep.subr.bf16.mxu0 %v5905_v29 }
 0x35c   :  { %4705 = vmatpush1.bf16.msra.mxu0 %v5908_v36 }
 0x35d   :  { %4706 = vmatprep.subr.bf16.mxu0 %v5549_v12 }
 0x422   :  { %v687_v6 = vpop.f32.mrb[4].mxu0 }
 0x423   :  { %v692_v7 = vrot.slane %v687_v6, 6  ;;  %v4484_v11 = vpop.f32.mrb[5].mxu0 }
 0x424   :  { %v723_v11 = vrot.slane %v5971_v60, 2 }
 0x425   :  { %v694_v14 = vadd.f32 %v692_v7, %v5826_v32 }
 0x426   :  { %v6027_v15 = vsel %vm5977_vm10, %v5974_v63, %v723_v11 }
 0x427   :  { %5069 = vtanh.f32 %v694_v14  ;;  %v4286_v24 = vmul.f32 -1.442695, %v694_v14 }
 0x429   :  { %5071 = vpow2.f32 %v4286_v24 }
 0x42a   :  { %5073 = vpow2.f32 %v4284_v27 }
 0x431   :  { %v5070_v21 = vpop.eup %5069 }
 0x432   :  { %707 = vrot.lane.b32.xlu0 %v5070_v21, %s5552_s2 }
 0x433   :  { %v5072_v25 = vpop.eup %5071 }
 0x434   :  { %v698_v30 = vadd.f32 1.0, %v5072_v25  ;;  %v5074_v35 = vpop.eup %5073 }
 0x435   :  { %v588_v39 = vadd.f32 1.0, %v5074_v35 }
 0x436   :  { %594 = vrot.lane.b32.xlu0 %v592_v23, %s5552_s2  ;;  %5075 = vrcp.f32 %v698_v30 }
 0x437   :  { %5077 = vrcp.f32 %v588_v39 }
 0x440   :  { %v5076_v37 = vpop.eup %5075 }
 0x441   :  { %v5078_v45 = vpop.eup %5077  ;;  %v705_v49 = vmul.f32 %v5076_v37, %v703_v48 }
 0x4a4   :  { %v708_v38 = vpop.permute.xlu0 %707 }
 0x4a5   :  { %v710_v40 = vmul.f32 %v5076_v37, %v708_v38 }
 0x4a7   :  { %712 = vrot.lane.b32.xlu1 %v710_v40, %s5553_s6 }
 0x4a8   :  { %v595_v43 = vpop.permute.xlu0 %594 }
 0x4a9   :  { %v597_v44 = vadd.f32 %v595_v43, %v591_v41 }
 0x4ab   :  { %5079 = vtanh.f32 %v597_v44  ;;  %v823_v27 = vrot.slane %v597_v44, 6 }
 0x4b5   :  { %v5080_v42 = vpop.eup %5079 }
 0x4b6   :  { %v599_v46 = vmul.f32 %v5080_v42, %v5078_v45 }
 0x4b8   :  { %609 = vrot.lane.b32.xlu0 %v599_v46, %s5552_s2 }
 0x519   :  { %v713_v50 = vpop.permute.xlu1 %712 }
 0x51a   :  { %v5993_v52 = vadd.f32 %v713_v50, %v705_v49 }
 0x51c   :  { %5081 = vtanh.f32 %v5993_v52  ;;  %v937_v50 = vrot.slane %v5993_v52, 6 }
 0x526   :  { %v5082_v54 = vpop.eup %5081 }
 0x527   :  { %718 = vrot.lane.b32.xlu1 %v5082_v54, %s5552_s2 }
 0x52a   :  { %v610_v57 = vpop.permute.xlu0 %609 }
 0x52b   :  { %613 = vst.msk [vmem:[%s6926_s17] sm:$0x3] %vm612_vm11, %v610_v57  ;;  %4287 = vmatmul.mubr.msk.f32.vlgmr.msra.gmra.mrb[6].mxu0 %vm502_vm13, %v610_v57 }
 0x52c   :  { %615 = vst.msk [vmem:[%s6926_s17 + $0xe] sm:$0x3] %vm614_vm12, %v610_v57  ;;  %4708 = vmatpush3.bf16.msra.mxu0 %v5785_v9  ;;  %4493 = vmatprep.mubr.msk.f32.mxu0 %vm5550_vm1, %v5548_v0 }
 0x52d   :  { %4709 = vmatprep.subr.bf16.mxu0 %v5549_v12 }
 0x530   :  { %4711 = vmatpush3.bf16.msra.mxu0 %v5790_v13 }
 0x531   :  { %4728 = vmatprep.subr.bf16.mxu0 %v5549_v12 }
 0x599   :  { %v719_v47 = vpop.permute.xlu1 %718 }
 0x59a   :  { %v6012_v58 = vmul.f32 %v5076_v37, %v719_v47 }
 0x59c   :  { %v850_v59 = vrot.slane %v6012_v58, 2 }
 0x59e   :  { %851 = vrot.lane.b32.xlu1 %v850_v59, %s5553_s6 }
 0x5fe   :  { %v796_v1 = vpop.f32.mrb[6].mxu0 }
 0x5ff   :  { %v803_v3 = vrot.slane %v796_v1, 6  ;;  %v798_v4 = vpop.f32.mrb[7].mxu0 }
 0x600   :  { %v804_v14 = vrot.slane %v798_v4, 6 }
 0x601   :  { %v807_v6 = vadd.f32 %v803_v3, %v6020_v5 }
 0x602   :  { %v6030_v19 = vadd.f32 %v804_v14, %v6027_v15 }
 0x603   :  { %v4288_v7 = vmul.f32 -1.442695, %v807_v6 }
 0x605   :  { %5083 = vpow2.f32 %v4288_v7 }
 0x606   :  { %5085 = vtanh.f32 %v6030_v19 }
 0x60f   :  { %v5084_v21 = vpop.eup %5083 }
 0x610   :  { %v812_v23 = vadd.f32 1.0, %v5084_v21  ;;  %v852_v24 = vpop.permute.xlu1 %851  ;;  %v5086_v25 = vpop.eup %5085 }
 0x611   :  { %4494 = vmatmul.mubr.msk.f32.vlgmr.msra.gmra.mrb[8].mxu0 %vm384_vm7, %v852_v24 }
 0x612   :  { %5087 = vrcp.f32 %v812_v23  ;;  %4730 = vmatpush3.bf16.msra.mxu0 %v5785_v9  ;;  %4504 = vmatprep.mubr.msk.f32.mxu0 %vm5550_vm1, %v5548_v0  ;;  %v4289_v23 = vmul.f32 -1.442695, %v6030_v19 }
 0x613   :  { %4731 = vmatprep.subr.bf16.mxu0 %v5549_v12 }
 0x616   :  { %4733 = vmatpush3.bf16.msra.mxu0 %v5790_v13 }
 0x617   :  { %4735 = vmatprep.subr.bf16.mxu0 %v5870_v62 }
 0x61c   :  { %v5088_v30 = vpop.eup %5087 }
 0x61d   :  { %v826_v35 = vmul.f32 %v5088_v30, %v5086_v25  ;;  %v825_v37 = vmul.f32 %v5088_v30, %v823_v27 }
 0x6e4   :  { %v921_v38 = vpop.f32.mrb[8].mxu0 }
 0x6e5   :  { %v926_v39 = vrot.slane %v921_v38, 4  ;;  %v4495_v40 = vpop.f32.mrb[9].mxu0 }
 0x6e7   :  { %v928_v41 = vadd.f32 %v926_v39, %v5822_v31 }
 0x6e9   :  { %5089 = vtanh.f32 %v928_v41  ;;  %v4291_v45 = vmul.f32 -1.442695, %v928_v41 }
 0x6eb   :  { %5091 = vpow2.f32 %v4291_v45 }
 0x6f3   :  { %v5090_v43 = vpop.eup %5089 }
 0x6f4   :  { %941 = vrot.lane.b32.xlu0 %v5090_v43, %s5552_s2 }
 0x6f5   :  { %v5092_v42 = vpop.eup %5091 }
 0x6f6   :  { %v932_v46 = vadd.f32 1.0, %v5092_v42 }
 0x6f8   :  { %5093 = vrcp.f32 %v932_v46 }
 0x702   :  { %v5094_v48 = vpop.eup %5093 }
 0x703   :  { %v939_v54 = vmul.f32 %v5094_v48, %v937_v50 }
 0x766   :  { %v942_v49 = vpop.permute.xlu0 %941 }
 0x767   :  { %v944_v44 = vmul.f32 %v5094_v48, %v942_v49 }
 0x769   :  { %946 = vrot.lane.b32.xlu1 %v944_v44, %s5553_s6 }
 0x7db   :  { %v947_v57 = vpop.permute.xlu1 %946 }
 0x7dc   :  { %v949_v47 = vadd.f32 %v947_v57, %v939_v54 }
 0x7de   :  { %5095 = vtanh.f32 %v949_v47  ;;  %v1168_v45 = vrot.slane %v949_v47, 6 }
 0x7e8   :  { %v5096_v31 = vpop.eup %5095 }
 0x7e9   :  { %952 = vrot.lane.b32.xlu0 %v5096_v31, %s5552_s2 }
 0x85b   :  { %v953_v59 = vpop.permute.xlu0 %952 }
 0x85c   :  { %v6045_v61 = vmul.f32 %v5094_v48, %v953_v59 }
 0x85e   :  { %v1081_v1 = vrot.slane %v6045_v61, 4 }
 0x860   :  { %1082 = vrot.lane.b32.xlu1 %v1081_v1, %s5553_s6 }
 0x8d2   :  { %v1083_v3 = vpop.permute.xlu1 %1082 }
 0x8d3   :  { %4505 = vmatmul.mubr.msk.f32.vlgmr.msra.gmra.mrb[10].mxu0 %vm384_vm7, %v1083_v3 }
 0x8d4   :  { %4737 = vmatpush1.bf16.msra.mxu0 %v5882_v8  ;;  %1256 = vmatprep.mubr.f32.mxu0 %v5548_v0 }
 0x8d5   :  { %4739 = vmatprep.subr.bf16.mxu0 %v5885_v10 }
 0x8d8   :  { %4741 = vmatpush1.bf16.msra.mxu0 %v5890_v20 }
 0x8d9   :  { %4743 = vmatprep.subr.bf16.mxu0 %v5897_v22 }
 0x8dc   :  { %4745 = vmatpush1.bf16.msra.mxu0 %v5901_v28 }
 0x8dd   :  { %4747 = vmatprep.subr.bf16.mxu0 %v5905_v29 }
 0x8e0   :  { %4749 = vmatpush1.bf16.msra.mxu0 %v5908_v36 }
 0x8e1   :  { %4772 = vmatprep.subr.bf16.mxu0 %v5549_v12 }
 0x9a6   :  { %v1152_v52 = vpop.f32.mrb[10].mxu0 }
 0x9a7   :  { %v1157_v4 = vrot.slane %v1152_v52, 2  ;;  %v4506_v6 = vpop.f32.mrb[11].mxu0 }
 0x9a9   :  { %v1159_v7 = vadd.f32 %v1157_v4, %v5826_v32 }
 0x9ab   :  { %5097 = vtanh.f32 %v1159_v7  ;;  %v4296_v14 = vmul.f32 -1.442695, %v1159_v7 }
 0x9ad   :  { %5099 = vpow2.f32 %v4296_v14 }
 0x9ae   :  { %5101 = vpow2.f32 %v4289_v23 }
 0x9b5   :  { %v5098_v11 = vpop.eup %5097 }
 0x9b6   :  { %1172 = vrot.lane.b32.xlu0 %v5098_v11, %s5552_s2 }
 0x9b7   :  { %v5100_v21 = vpop.eup %5099 }
 0x9b8   :  { %v1163_v24 = vadd.f32 1.0, %v5100_v21  ;;  %v5102_v25 = vpop.eup %5101 }
 0x9b9   :  { %v819_v39 = vadd.f32 1.0, %v5102_v25 }
 0x9ba   :  { %828 = vrot.lane.b32.xlu0 %v826_v35, %s5552_s2  ;;  %5103 = vrcp.f32 %v1163_v24 }
 0x9bb   :  { %5105 = vrcp.f32 %v819_v39 }
 0x9c4   :  { %v5104_v27 = vpop.eup %5103 }
 0x9c5   :  { %v5106_v35 = vpop.eup %5105  ;;  %v1170_v42 = vmul.f32 %v5104_v27, %v1168_v45 }
 0xa28   :  { %v1173_v30 = vpop.permute.xlu0 %1172 }
 0xa29   :  { %v1175_v38 = vmul.f32 %v5104_v27, %v1173_v30 }
 0xa2b   :  { %1177 = vrot.lane.b32.xlu1 %v1175_v38, %s5553_s6 }
 0xa2c   :  { %v829_v32 = vpop.permute.xlu0 %828 }
 0xa2d   :  { %v831_v40 = vadd.f32 %v829_v32, %v825_v37 }
 0xa2f   :  { %5107 = vtanh.f32 %v831_v40 }
 0xa39   :  { %v5108_v41 = vpop.eup %5107 }
 0xa3a   :  { %v6064_v43 = vmul.f32 %v5108_v41, %v5106_v35 }
 0xa3c   :  { %v956_v19 = vrot.slane %v6064_v43, 2 }
 0xa3e   :  { %957 = vrot.lane.b32.xlu0 %v956_v19, %s5552_s2 }
 0xa9d   :  { %v1178_v46 = vpop.permute.xlu1 %1177 }
 0xa9e   :  { %v6068_v48 = vadd.f32 %v1178_v46, %v1170_v42 }
 0xaa0   :  { %5109 = vtanh.f32 %v6068_v48 }
 0xaaa   :  { %v5110_v49 = vpop.eup %5109 }
 0xaab   :  { %1183 = vrot.lane.b32.xlu1 %v5110_v49, %s5552_s2 }
 0xab0   :  { %v958_v37 = vpop.permute.xlu0 %957 }
 0xab1   :  { %4292 = vmatmul.mubr.msk.f32.vlgmr.msra.gmra.mrb[6].mxu1 %vm502_vm13, %v958_v37 }
 0xab2   :  { %4752 = vmatpush3.bf16.msra.mxu1 %v5785_v9  ;;  %4515 = vmatprep.mubr.msk.f32.mxu1 %vm5550_vm1, %v5548_v0 }
 0xab3   :  { %4753 = vmatprep.subr.bf16.mxu1 %v5549_v12 }
 0xab6   :  { %4755 = vmatpush3.bf16.msra.mxu1 %v5790_v13 }
 0xab7   :  { %4757 = vmatprep.subr.bf16.mxu1 %v5870_v62 }
 0xb1d   :  { %v1184_v44 = vpop.permute.xlu1 %1183 }
 0xb1e   :  { %v6079_v50 = vmul.f32 %v5104_v27, %v1184_v44 }
 0xb20   :  { %v1316_v54 = vrot.slane %v6079_v50, 6 }
 0xb22   :  { %1317 = vrot.lane.b32.xlu1 %v1316_v54, %s5553_s6 }
 0xb84   :  { %v1027_v57 = vpop.f32.mrb[6].mxu1 }
 0xb85   :  { %v1034_v47 = vrot.slane %v1027_v57, 4  ;;  %v1029_v31 = vpop.f32.mrb[7].mxu1 }
 0xb86   :  { %v1035_v3 = vrot.slane %v1029_v31, 4 }
 0xb87   :  { %v1038_v59 = vadd.f32 %v1034_v47, %v5964_v56  ;;  %v1400_v47 = vrot.slane %v6068_v48, 6 }
 0xb88   :  { %v1039_v52 = vadd.f32 %v1035_v3, %v5984_v16  ;;  %v1054_v16 = vrot.slane %v831_v40, 6 }
 0xb89   :  { %v4293_v1 = vmul.f32 -1.442695, %v1038_v59 }
 0xb8a   :  { %v4294_v23 = vmul.f32 -1.442695, %v1039_v52 }
 0xb8b   :  { %5111 = vpow2.f32 %v4293_v1 }
 0xb8c   :  { %5113 = vtanh.f32 %v1039_v52 }
 0xb94   :  { %v1318_v4 = vpop.permute.xlu1 %1317 }
 0xb95   :  { %v5112_v6 = vpop.eup %5111  ;;  %4516 = vmatmul.mubr.msk.f32.vlgmr.msra.gmra.mrb[8].mxu1 %vm384_vm7, %v1318_v4 }
 0xb96   :  { %v1043_v7 = vadd.f32 1.0, %v5112_v6  ;;  %4759 = vmatpush1.bf16.msra.mxu1 %v5882_v8  ;;  %1496 = vmatprep.mubr.f32.mxu1 %v5548_v0  ;;  %v5114_v56 = vpop.eup %5113 }
 0xb97   :  { %4761 = vmatprep.subr.bf16.mxu1 %v5885_v10 }
 0xb98   :  { %5115 = vrcp.f32 %v1043_v7 }
 0xb99   :  { %5117 = vpow2.f32 %v4294_v23 }
 0xb9a   :  { %4763 = vmatpush1.bf16.msra.mxu1 %v5890_v20 }
 0xb9b   :  { %4765 = vmatprep.subr.bf16.mxu1 %v5897_v22 }
 0xb9e   :  { %4767 = vmatpush1.bf16.msra.mxu1 %v5901_v28 }
 0xb9f   :  { %4769 = vmatprep.subr.bf16.mxu1 %v5905_v29 }
 0xba2   :  { %v5116_v11 = vpop.eup %5115  ;;  %4771 = vmatpush1.bf16.msra.mxu1 %v5908_v36 }
 0xba3   :  { %v1057_v14 = vmul.f32 %v5116_v11, %v5114_v56  ;;  %v1056_v21 = vmul.f32 %v5116_v11, %v1054_v16  ;;  %4794 = vmatprep.subr.bf16.mxu1 %v5549_v12  ;;  %v5118_v24 = vpop.eup %5117 }
 0xba4   :  { %v1050_v25 = vadd.f32 1.0, %v5118_v24 }
 0xba5   :  { %1059 = vrot.lane.b32.xlu1 %v1057_v14, %s5552_s2 }
 0xba6   :  { %5119 = vrcp.f32 %v1050_v25 }
 0xbb0   :  { %v5120_v38 = vpop.eup %5119 }
 0xc17   :  { %v1060_v27 = vpop.permute.xlu1 %1059 }
 0xc18   :  { %v1062_v30 = vadd.f32 %v1060_v27, %v1056_v21 }
 0xc1a   :  { %5121 = vtanh.f32 %v1062_v30  ;;  %v1285_v23 = vrot.slane %v1062_v30, 6 }
 0xc24   :  { %v5122_v39 = vpop.eup %5121 }
 0xc25   :  { %v6096_v32 = vmul.f32 %v5122_v39, %v5120_v38 }
 0xc27   :  { %v1187_v40 = vrot.slane %v6096_v32, 4 }
 0xc29   :  { %1188 = vrot.lane.b32.xlu1 %v1187_v40, %s5552_s2 }
 0xc68   :  { %v1387_v35 = vpop.f32.mrb[8].mxu1 }
 0xc69   :  { %v1391_v41 = vadd.f32 %v1387_v35, %v5830_v33  ;;  %v4517_v19 = vpop.f32.mrb[9].mxu1 }
 0xc6b   :  { %5123 = vtanh.f32 %v1391_v41  ;;  %v4301_v46 = vmul.f32 -1.442695, %v1391_v41 }
 0xc6d   :  { %5125 = vpow2.f32 %v4301_v46 }
 0xc75   :  { %v5124_v45 = vpop.eup %5123 }
 0xc76   :  { %1404 = vrot.lane.b32.xlu0 %v5124_v45, %s5552_s2 }
 0xc77   :  { %v5126_v49 = vpop.eup %5125 }
 0xc78   :  { %v1395_v37 = vadd.f32 1.0, %v5126_v49 }
 0xc7a   :  { %5127 = vrcp.f32 %v1395_v37 }
 0xc84   :  { %v5128_v44 = vpop.eup %5127 }
 0xc85   :  { %v1402_v31 = vmul.f32 %v5128_v44, %v1400_v47 }
 0xc9b   :  { %v1189_v42 = vpop.permute.xlu1 %1188 }
 0xc9c   :  { %4297 = vmatmul.mubr.msk.f32.vlgmr.msra.gmra.mrb[12].mxu0 %vm502_vm13, %v1189_v42 }
 0xc9d   :  { %4774 = vmatpush3.bf16.msra.mxu0 %v5785_v9  ;;  %4526 = vmatprep.mubr.msk.f32.mxu0 %vm5550_vm1, %v5548_v0 }
 0xc9e   :  { %4775 = vmatprep.subr.bf16.mxu0 %v5549_v12 }
 0xca1   :  { %4777 = vmatpush3.bf16.msra.mxu0 %v5790_v13 }
 0xca2   :  { %4779 = vmatprep.subr.bf16.mxu0 %v5870_v62 }
 0xce8   :  { %v1405_v54 = vpop.permute.xlu0 %1404 }
 0xce9   :  { %v1407_v57 = vmul.f32 %v5128_v44, %v1405_v54 }
 0xceb   :  { %1409 = vrot.lane.b32.xlu0 %v1407_v57, %s5553_s6 }
 0xd5d   :  { %v1410_v59 = vpop.permute.xlu0 %1409 }
 0xd5e   :  { %v6111_v1 = vadd.f32 %v1410_v59, %v1402_v31  ;;  %v1421_v31 = vrot.slane %v5954_v53, 6 }
 0xd60   :  { %5129 = vtanh.f32 %v6111_v1  ;;  %v6149_v59 = vsel %vm5957_vm9, %v5951_v51, %v1421_v31 }
 0xd6a   :  { %v5130_v3 = vpop.eup %5129 }
 0xd6b   :  { %1415 = vrot.lane.b32.xlu0 %v5130_v3, %s5552_s2 }
 0xd6f   :  { %v1258_v52 = vpop.f32.mrb[12].mxu0 }
 0xd70   :  { %v1265_v4 = vrot.slane %v1258_v52, 2  ;;  %v1260_v6 = vpop.f32.mrb[13].mxu0 }
 0xd71   :  { %v1266_v16 = vrot.slane %v1260_v6, 2 }
 0xd72   :  { %v1269_v7 = vadd.f32 %v1265_v4, %v6020_v5 }
 0xd73   :  { %v1270_v11 = vadd.f32 %v1266_v16, %v6027_v15 }
 0xd74   :  { %v4298_v56 = vmul.f32 -1.442695, %v1269_v7  ;;  %v1422_v7 = vrot.slane %v5974_v63, 6 }
 0xd75   :  { %v4299_v5 = vmul.f32 -1.442695, %v1270_v11 }
 0xd76   :  { %5131 = vpow2.f32 %v4298_v56  ;;  %v6156_v56 = vsel %vm5977_vm10, %v5971_v60, %v1422_v7 }
 0xd77   :  { %5133 = vtanh.f32 %v1270_v11 }
 0xd80   :  { %v5132_v48 = vpop.eup %5131 }
 0xd81   :  { %v1274_v14 = vadd.f32 1.0, %v5132_v48  ;;  %v5134_v21 = vpop.eup %5133 }
 0xd83   :  { %5135 = vrcp.f32 %v1274_v14 }
 0xd84   :  { %5137 = vpow2.f32 %v4299_v5 }
 0xd8d   :  { %v5136_v24 = vpop.eup %5135 }
 0xd8e   :  { %v1288_v25 = vmul.f32 %v5136_v24, %v5134_v21  ;;  %v1287_v27 = vmul.f32 %v5136_v24, %v1285_v23  ;;  %v5138_v40 = vpop.eup %5137 }
 0xd8f   :  { %v1281_v35 = vadd.f32 1.0, %v5138_v40 }
 0xd90   :  { %1290 = vrot.lane.b32.xlu0 %v1288_v25, %s5552_s2 }
 0xd91   :  { %5139 = vrcp.f32 %v1281_v35 }
 0xd9b   :  { %v5140_v19 = vpop.eup %5139 }
 0xddd   :  { %v1416_v38 = vpop.permute.xlu0 %1415 }
 0xdde   :  { %v1418_v39 = vmul.f32 %v5128_v44, %v1416_v38 }
 0xde0   :  { %1531 = vrot.lane.b32.xlu1 %v1418_v39, %s5553_s6 }
 0xe02   :  { %v1291_v15 = vpop.permute.xlu0 %1290 }
 0xe03   :  { %v1293_v41 = vadd.f32 %v1291_v15, %v1287_v27  ;;  %v1629_v15 = vrot.slane %v6111_v1, 6 }
 0xe05   :  { %5141 = vtanh.f32 %v1293_v41  ;;  %v1519_v21 = vrot.slane %v1293_v41, 6 }
 0xe0f   :  { %v5142_v45 = vpop.eup %5141 }
 0xe10   :  { %v6119_v30 = vmul.f32 %v5142_v45, %v5140_v19 }
 0xe12   :  { %v1427_v42 = vrot.slane %v6119_v30, 6 }
 0xe14   :  { %1428 = vrot.lane.b32.xlu0 %v1427_v42, %s5552_s2 }
 0xe52   :  { %v6123_v46 = vpop.permute.xlu1 %1531 }
 0xe53   :  { %4527 = vmatmul.mubr.msk.f32.vlgmr.msra.gmra.mrb[14].mxu0 %vm384_vm7, %v6123_v46 }
 0xe54   :  { %4781 = vmatpush1.bf16.msra.mxu0 %v5882_v8  ;;  %1720 = vmatprep.mubr.f32.mxu0 %v5548_v0 }
 0xe55   :  { %4783 = vmatprep.subr.bf16.mxu0 %v5885_v10 }
 0xe58   :  { %4785 = vmatpush1.bf16.msra.mxu0 %v5890_v20 }
 0xe59   :  { %4787 = vmatprep.subr.bf16.mxu0 %v5897_v22 }
 0xe5c   :  { %4789 = vmatpush1.bf16.msra.mxu0 %v5901_v28 }
 0xe5d   :  { %4791 = vmatprep.subr.bf16.mxu0 %v5905_v29 }
 0xe60   :  { %4793 = vmatpush1.bf16.msra.mxu0 %v5908_v36 }
 0xe61   :  { %4816 = vmatprep.subr.bf16.mxu0 %v5549_v12 }
 0xe86   :  { %v1429_v49 = vpop.permute.xlu0 %1428 }
 0xe87   :  { %4302 = vmatmul.mubr.msk.f32.vlgmr.msra.gmra.mrb[10].mxu1 %vm502_vm13, %v1429_v49 }
 0xe88   :  { %4796 = vmatpush3.bf16.msra.mxu1 %v5785_v9  ;;  %4537 = vmatprep.mubr.msk.f32.mxu1 %vm5550_vm1, %v5548_v0 }
 0xe89   :  { %4797 = vmatprep.subr.bf16.mxu1 %v5549_v12 }
 0xe8c   :  { %4799 = vmatpush3.bf16.msra.mxu1 %v5790_v13 }
 0xe8d   :  { %4801 = vmatprep.subr.bf16.mxu1 %v5870_v62 }
 0xf26   :  { %v1613_v37 = vpop.f32.mrb[14].mxu0 }
 0xf27   :  { %v1618_v44 = vrot.slane %v1613_v37, 6  ;;  %v4528_v54 = vpop.f32.mrb[15].mxu0 }
 0xf29   :  { %v1620_v57 = vadd.f32 %v1618_v44, %v5834_v34 }
 0xf2b   :  { %5143 = vtanh.f32 %v1620_v57  ;;  %v4306_v27 = vmul.f32 -1.442695, %v1620_v57 }
 0xf35   :  { %v5144_v47 = vpop.eup %5143 }
 0xf36   :  { %1633 = vrot.lane.b32.xlu1 %v5144_v47, %s5552_s2 }
 0xf5a   :  { %v1498_v3 = vpop.f32.mrb[10].mxu1 }
 0xf5b   :  { %v1503_v52 = vadd.f32 %v1498_v3, %v6149_v59  ;;  %v1500_v4 = vpop.f32.mrb[11].mxu1 }
 0xf5c   :  { %v1504_v16 = vadd.f32 %v1500_v4, %v6156_v56 }
 0xf5d   :  { %v4303_v6 = vmul.f32 -1.442695, %v1503_v52 }
 0xf5e   :  { %v4304_v49 = vmul.f32 -1.442695, %v1504_v16 }
 0xf5f   :  { %5145 = vpow2.f32 %v4303_v6 }
 0xf60   :  { %5147 = vtanh.f32 %v1504_v16 }
 0xf69   :  { %v5146_v11 = vpop.eup %5145 }
 0xf6a   :  { %v1508_v48 = vadd.f32 1.0, %v5146_v11  ;;  %v5148_v14 = vpop.eup %5147 }
 0xf6c   :  { %5149 = vrcp.f32 %v1508_v48 }
 0xf6d   :  { %5151 = vpow2.f32 %v4306_v27 }
 0xf76   :  { %v5150_v23 = vpop.eup %5149 }
 0xf77   :  { %v1522_v24 = vmul.f32 %v5150_v23, %v5148_v14  ;;  %v1521_v25 = vmul.f32 %v5150_v23, %v1519_v21  ;;  %v5152_v38 = vpop.eup %5151  ;;  %v1648_v21 = vrot.slane %v5954_v53, 2 }
 0xf78   :  { %v1624_v39 = vadd.f32 1.0, %v5152_v38 }
 0xf7a   :  { %5153 = vrcp.f32 %v1624_v39 }
 0xf84   :  { %v5154_v5 = vpop.eup %5153 }
 0xf85   :  { %v1631_v19 = vmul.f32 %v5154_v5, %v1629_v15 }
 0xfa8   :  { %v1634_v40 = vpop.permute.xlu1 %1633 }
 0xfa9   :  { %v1636_v35 = vmul.f32 %v5154_v5, %v1634_v40 }
 0xfab   :  { %1638 = vrot.lane.b32.xlu1 %v1636_v35, %s5553_s6 }
0x101d   :  { %v1639_v45 = vpop.permute.xlu1 %1638 }
0x101e   :  { %v6161_v42 = vadd.f32 %v1639_v45, %v1631_v19 }
0x1020   :  { %5155 = vtanh.f32 %v6161_v42 }
0x1021   :  { %5157 = vpow2.f32 %v4304_v49 }
0x102a   :  { %v5156_v41 = vpop.eup %5155 }
0x102b   :  { %1644 = vrot.lane.b32.xlu0 %v5156_v41, %s5552_s2  ;;  %v5158_v37 = vpop.eup %5157 }
0x102c   :  { %v1515_v57 = vadd.f32 1.0, %v5158_v37 }
0x102e   :  { %5159 = vrcp.f32 %v1515_v57  ;;  %v1859_v57 = vrot.slane %v6161_v42, 6 }
0x102f   :  { %1524 = vrot.lane.b32.xlu0 %v1522_v24, %s5552_s2 }
0x1038   :  { %v5160_v3 = vpop.eup %5159 }
0x109d   :  { %v1645_v44 = vpop.permute.xlu0 %1644 }
0x109e   :  { %v6166_v54 = vmul.f32 %v5154_v5, %v1645_v44 }
0x10a0   :  { %v1772_v1 = vrot.slane %v6166_v54, 2 }
0x10a1   :  { %v1525_v47 = vpop.permute.xlu0 %1524 }
0x10a2   :  { %v1527_v31 = vadd.f32 %v1525_v47, %v1521_v25  ;;  %1773 = vrot.lane.b32.xlu1 %v1772_v1, %s5553_s6 }
0x10a4   :  { %5161 = vtanh.f32 %v1527_v31  ;;  %v1749_v35 = vrot.slane %v1527_v31, 6 }
0x10ae   :  { %v5162_v52 = vpop.eup %5161 }
0x10af   :  { %v1529_v4 = vmul.f32 %v5162_v52, %v5160_v3 }
0x10b1   :  { %1537 = vrot.lane.b32.xlu1 %v1529_v4, %s5552_s2 }
0x1114   :  { %v1774_v6 = vpop.permute.xlu1 %1773 }
0x1115   :  { %4538 = vmatmul.mubr.msk.f32.vlgmr.msra.gmra.mrb[12].mxu1 %vm384_vm7, %v1774_v6 }
0x1116   :  { %4803 = vmatpush1.bf16.msra.mxu1 %v5882_v8  ;;  %1947 = vmatprep.mubr.f32.mxu1 %v5548_v0 }
0x1117   :  { %4805 = vmatprep.subr.bf16.mxu1 %v5885_v10 }
0x111a   :  { %4807 = vmatpush1.bf16.msra.mxu1 %v5890_v20 }
0x111b   :  { %4809 = vmatprep.subr.bf16.mxu1 %v5897_v22 }
0x111e   :  { %4811 = vmatpush1.bf16.msra.mxu1 %v5901_v28 }
0x111f   :  { %4813 = vmatprep.subr.bf16.mxu1 %v5905_v29 }
0x1122   :  { %4815 = vmatpush1.bf16.msra.mxu1 %v5908_v36 }
0x1123   :  { %v6180_v7 = vpop.permute.xlu1 %1537 }
0x1124   :  { %4307 = vmatmul.mubr.msk.f32.vlgmr.msra.gmra.mrb[16].mxu0 %vm502_vm13, %v6180_v7 }
0x1125   :  { %4818 = vmatpush3.bf16.msra.mxu0 %v5785_v9  ;;  %4548 = vmatprep.mubr.msk.f32.mxu0 %vm5550_vm1, %v5548_v0 }
0x1126   :  { %4819 = vmatprep.subr.bf16.mxu0 %v5549_v12 }
0x1129   :  { %4821 = vmatpush3.bf16.msra.mxu0 %v5790_v13  ;;  %v6196_v13 = vsel %vm5957_vm9, %v5951_v51, %v1648_v21 }
0x112a   :  { %4823 = vmatprep.subr.bf16.mxu0 %v5870_v62 }
0x11e8   :  { %v1843_v16 = vpop.f32.mrb[12].mxu1 }
0x11e9   :  { %v1848_v11 = vrot.slane %v1843_v16, 4  ;;  %v4539_v48 = vpop.f32.mrb[13].mxu1 }
0x11eb   :  { %v1850_v14 = vadd.f32 %v1848_v11, %v5830_v33  ;;  %v1649_v33 = vrot.slane %v5974_v63, 2 }
0x11ed   :  { %5163 = vtanh.f32 %v1850_v14  ;;  %v6203_v53 = vsel %vm5977_vm10, %v5971_v60, %v1649_v33  ;;  %v4311_v41 = vmul.f32 -1.442695, %v1850_v14 }
0x11f7   :  { %v5164_v23 = vpop.eup %5163  ;;  %v1722_v24 = vpop.f32.mrb[16].mxu0 }
0x11f8   :  { %v1729_v9 = vrot.slane %v1722_v24, 6  ;;  %1863 = vrot.lane.b32.xlu0 %v5164_v23, %s5552_s2  ;;  %v1724_v25 = vpop.f32.mrb[17].mxu0 }
0x11f9   :  { %v1730_v38 = vrot.slane %v1724_v25, 6 }
0x11fa   :  { %v1733_v62 = vadd.f32 %v1729_v9, %v6196_v13 }
0x11fb   :  { %v1734_v39 = vadd.f32 %v1730_v38, %v6203_v53 }
0x11fc   :  { %v4308_v27 = vmul.f32 -1.442695, %v1733_v62 }
0x11fd   :  { %v4309_v52 = vmul.f32 -1.442695, %v1734_v39 }
0x11fe   :  { %5165 = vpow2.f32 %v4308_v27 }
0x11ff   :  { %5167 = vtanh.f32 %v1734_v39 }
0x1208   :  { %v5166_v5 = vpop.eup %5165 }
0x1209   :  { %v1738_v40 = vadd.f32 1.0, %v5166_v5  ;;  %v5168_v51 = vpop.eup %5167 }
0x120b   :  { %5169 = vrcp.f32 %v1738_v40 }
0x120c   :  { %5171 = vpow2.f32 %v4311_v41 }
0x1215   :  { %v5170_v15 = vpop.eup %5169 }
0x1216   :  { %v1752_v19 = vmul.f32 %v5170_v15, %v5168_v51  ;;  %v1751_v45 = vmul.f32 %v5170_v15, %v1749_v35  ;;  %v5172_v63 = vpop.eup %5171 }
0x1217   :  { %v1854_v49 = vadd.f32 1.0, %v5172_v63 }
0x1219   :  { %5173 = vrcp.f32 %v1854_v49 }
0x1223   :  { %v5174_v37 = vpop.eup %5173 }
0x1224   :  { %v1861_v1 = vmul.f32 %v5174_v37, %v1859_v57 }
0x126a   :  { %v1864_v44 = vpop.permute.xlu0 %1863 }
0x126b   :  { %v1866_v60 = vmul.f32 %v5174_v37, %v1864_v44 }
0x126d   :  { %1868 = vrot.lane.b32.xlu1 %v1866_v60, %s5553_s6 }
0x12df   :  { %v1869_v47 = vpop.permute.xlu1 %1868 }
0x12e0   :  { %v6208_v3 = vadd.f32 %v1869_v47, %v1861_v1 }
0x12e2   :  { %5175 = vtanh.f32 %v6208_v3 }
0x12e3   :  { %5177 = vpow2.f32 %v4309_v52 }
0x12ec   :  { %v5176_v31 = vpop.eup %5175 }
0x12ed   :  { %1874 = vrot.lane.b32.xlu0 %v5176_v31, %s5552_s2  ;;  %v5178_v4 = vpop.eup %5177 }
0x12ee   :  { %v1745_v11 = vadd.f32 1.0, %v5178_v4 }
0x12f0   :  { %5179 = vrcp.f32 %v1745_v11 }
0x12f1   :  { %1754 = vrot.lane.b32.xlu0 %v1752_v19, %s5552_s2 }
0x12fa   :  { %v5180_v21 = vpop.eup %5179 }
0x135f   :  { %v1875_v6 = vpop.permute.xlu0 %1874 }
0x1360   :  { %v1877_v16 = vmul.f32 %v5174_v37, %v1875_v6 }
0x1362   :  { %v1999_v48 = vrot.slane %v1877_v16, 4 }
0x1363   :  { %v1755_v14 = vpop.permute.xlu0 %1754 }
0x1364   :  { %v1757_v42 = vadd.f32 %v1755_v14, %v1751_v45  ;;  %2000 = vrot.lane.b32.xlu1 %v1999_v48, %s5553_s6 }
0x1366   :  { %5181 = vtanh.f32 %v1757_v42 }
0x1370   :  { %v5182_v23 = vpop.eup %5181 }
0x1371   :  { %v6214_v24 = vmul.f32 %v5182_v23, %v5180_v21  ;;  %v2231_v23 = vld [vmem:[#allocation4 + $0x8] sm:$0xff] }
0x1373   :  { %v1878_v9 = vrot.slane %v6214_v24, 2 }
0x1375   :  { %1879 = vrot.lane.b32.xlu1 %v1878_v9, %s5552_s2 }
0x13d6   :  { %v2001_v25 = vpop.permute.xlu1 %2000 }
0x13d7   :  { %4549 = vmatmul.mubr.msk.f32.vlgmr.msra.gmra.mrb[18].mxu0 %vm384_vm7, %v2001_v25  ;;  %v2232_v25 = vld [vmem:[#allocation4 + $0x10] sm:$0xff] }
0x13d8   :  { %4825 = vmatpush1.bf16.msra.mxu0 %v5882_v8  ;;  %2174 = vmatprep.mubr.f32.mxu0 %v5548_v0 }
0x13d9   :  { %4827 = vmatprep.subr.bf16.mxu0 %v5885_v10 }
0x13dc   :  { %4829 = vmatpush1.bf16.msra.mxu0 %v5890_v20 }
0x13dd   :  { %4831 = vmatprep.subr.bf16.mxu0 %v5897_v22 }
0x13e0   :  { %4833 = vmatpush1.bf16.msra.mxu0 %v5901_v28 }
0x13e1   :  { %4835 = vmatprep.subr.bf16.mxu0 %v5905_v29 }
0x13e4   :  { %4837 = vmatpush1.bf16.msra.mxu0 %v5908_v36 }
0x13e5   :  { %4862 = vmatprep.subr.bf16.mxu0 %v5549_v12 }
0x13e7   :  { %v1880_v62 = vpop.permute.xlu1 %1879 }
0x13e8   :  { %4312 = vmatmul.mubr.msk.f32.vlgmr.msra.gmra.mrb[14].mxu1 %vm502_vm13, %v1880_v62  ;;  %v2233_v62 = vld [vmem:[#allocation4 + $0x18] sm:$0xff] }
0x14aa   :  { %v2070_v8 = vpop.f32.mrb[18].mxu0 }
0x14ab   :  { %v2075_v27 = vrot.slane %v2070_v8, 2  ;;  %v4550_v33 = vpop.f32.mrb[19].mxu0  ;;  %v2433_v8 = vld [vmem:[#allocation6] sm:$0xff] }
0x14ac   :  { %v2434_v33 = vld [vmem:[#allocation6 + $0x8] sm:$0xff] }
0x14ad   :  { %v2077_v10 = vadd.f32 %v2075_v27, %v5834_v34  ;;  %v1976_v34 = vrot.slane %v1757_v42, 6  ;;  %v4842_v27 = vpack.c.bf16 %v2233_v62, %v2232_v25 }
0x14af   :  { %5183 = vtanh.f32 %v2077_v10 }
0x14b9   :  { %v5184_v20 = vpop.eup %5183 }
0x14ba   :  { %2090 = vrot.lane.b32.xlu0 %v5184_v20, %s5552_s2 }
0x14bb   :  { %v1949_v22 = vpop.f32.mrb[14].mxu1 }
0x14bc   :  { %v1956_v28 = vrot.slane %v1949_v22, 4  ;;  %v1951_v38 = vpop.f32.mrb[15].mxu1 }
0x14bd   :  { %v1957_v39 = vrot.slane %v1951_v38, 4 }
0x14be   :  { %v1960_v29 = vadd.f32 %v1956_v28, %v6149_v59  ;;  %v4316_v59 = vmul.f32 -1.442695, %v2077_v10  ;;  %v2436_v10 = vld [vmem:[#allocation6 + $0x18] sm:$0xff] }
0x14bf   :  { %v1961_v5 = vadd.f32 %v1957_v39, %v6156_v56 }
0x14c0   :  { %v4313_v36 = vmul.f32 -1.442695, %v1960_v29 }
0x14c1   :  { %v4314_v44 = vmul.f32 -1.442695, %v1961_v5 }
0x14c2   :  { %5185 = vpow2.f32 %v4313_v36 }
0x14c3   :  { %5187 = vtanh.f32 %v1961_v5 }
0x14cc   :  { %v5186_v40 = vpop.eup %5185 }
0x14cd   :  { %v1965_v51 = vadd.f32 1.0, %v5186_v40  ;;  %v5188_v35 = vpop.eup %5187 }
0x14cf   :  { %5189 = vrcp.f32 %v1965_v51 }
0x14d0   :  { %5191 = vpow2.f32 %v4316_v59 }
0x14d9   :  { %v5190_v15 = vpop.eup %5189 }
0x14da   :  { %v1979_v19 = vmul.f32 %v5190_v15, %v5188_v35  ;;  %v1978_v45 = vmul.f32 %v5190_v15, %v1976_v34  ;;  %v5192_v56 = vpop.eup %5191 }
0x14db   :  { %v2081_v41 = vadd.f32 1.0, %v5192_v56 }
0x14dc   :  { %1981 = vrot.lane.b32.xlu0 %v1979_v19, %s5552_s2 }
0x14dd   :  { %5193 = vrcp.f32 %v2081_v41 }
0x14de   :  { %5195 = vpow2.f32 %v4314_v44 }
0x14e0   :  { %835 = vrot.lane.b32.xlu0 %v6012_v58, %s5553_s6 }
0x14e4   :  { %1297 = vrot.lane.b32.xlu0 %v6079_v50, %s5553_s6 }
0x14e7   :  { %v6239_v63 = vpop.eup %5193 }
0x14e8   :  { %1988 = vrot.lane.b32.xlu0 %v1877_v16, %s5553_s6  ;;  %v5196_v58 = vpop.eup %5195 }
0x14e9   :  { %v1972_v60 = vadd.f32 1.0, %v5196_v58 }
0x14eb   :  { %5197 = vrcp.f32 %v1972_v60 }
0x14f5   :  { %v5198_v31 = vpop.eup %5197 }
0x152c   :  { %v2091_v49 = vpop.permute.xlu0 %2090 }
0x152d   :  { %v2093_v37 = vmul.f32 %v6239_v63, %v2091_v49 }
0x152f   :  { %2095 = vrot.lane.b32.xlu1 %v2093_v37, %s5553_s6 }
0x154e   :  { %v1982_v57 = vpop.permute.xlu0 %1981 }
0x154f   :  { %v6243_v50 = vadd.f32 %v1982_v57, %v1978_v45  ;;  %v4320_v57 = vld [vmem:[#allocation7] ss:$0 sm:$0xff] }
0x1551   :  { %5199 = vtanh.f32 %v6243_v50 }
0x1552   :  { %v836_v1 = vpop.permute.xlu0 %835 }
0x1553   :  { %839 = vst.msk [vmem:[%s6925_s16] sm:$0xc] %vm838_vm14, %v836_v1 }
0x1554   :  { %841 = vst.msk [vmem:[%s6925_s16 + $0xa] sm:$0xc] %vm6933_vm15, %v836_v1 }
0x1556   :  { %v1298_v47 = vpop.permute.xlu0 %1297 }
0x1557   :  { %1301 = vst.msk [vmem:[%s6925_s16] sm:$0xc0] %vm6930_vm0, %v1298_v47 }
0x1558   :  { %1303 = vst.msk [vmem:[%s6925_s16 + $0x2] sm:$0xc0] %vm6929_vm2, %v1298_v47 }
0x1559   :  { %1534 = vst.msk [vmem:[%s6925_s16 + $0x8] sm:$0x3] %vm604_vm5, %v6123_v46 }
0x155a   :  { %1535 = vst.msk [vmem:[%s6925_s16 + $0x6] sm:$0x3] %vm606_vm6, %v6123_v46  ;;  %v1989_v52 = vpop.permute.xlu0 %1988  ;;  %v2086_v46 = vrot.slane %v6208_v3, 6  ;;  %v2230_v3 = vld [vmem:[#allocation4] sm:$0xff] }
0x155b   :  { %v5200_v4 = vpop.eup %5199  ;;  %1991 = vst.msk [vmem:[%s6925_s16 + $0x8] sm:$0x30] %vm6932_vm4, %v1989_v52  ;;  %v4838_v9 = vpack.c.bf16 %v2231_v23, %v2230_v3 }
0x155c   :  { %1992 = vst.msk [vmem:[%s6925_s16 - $0x2] sm:$0x30] %vm6931_vm8, %v1989_v52  ;;  %v6280_v6 = vmul.f32 %v5200_v4, %v5198_v31  ;;  %v2088_v11 = vmul.f32 %v6239_v63, %v2086_v46 }
0x155d   :  { %4839 = vmatprep.subr.bf16.mxu1 %v4838_v9 }
0x155e   :  { %v2105_v16 = vrot.slane %v6280_v6, 4  ;;  %4841 = vmatpush3.bf16.msra.mxu1 %v4838_v9 }
0x155f   :  { %4843 = vmatprep.subr.bf16.mxu1 %v4842_v27 }
0x1560   :  { %2106 = vrot.lane.b32.xlu0 %v2105_v16, %s5552_s2 }
0x1562   :  { %4845 = vmatpush3.bf16.msra.mxu1 %v4842_v27 }
0x15a1   :  { %v2096_v48 = vpop.permute.xlu1 %2095 }
0x15a2   :  { %v2098_v14 = vadd.f32 %v2096_v48, %v2088_v11 }
0x15a4   :  { %5201 = vtanh.f32 %v2098_v14 }
0x15ae   :  { %v5202_v42 = vpop.eup %5201 }
0x15af   :  { %2101 = vrot.lane.b32.xlu1 %v5202_v42, %s5552_s2 }
0x15b3   :  { %1066 = vrot.lane.b32.xlu1 %v6045_v61, %s5553_s6  ;;  %v6294_v61 = vpack.c.bf16 %v2434_v33, %v2433_v8 }
0x15b7   :  { %1761 = vrot.lane.b32.xlu1 %v6166_v54, %s5553_s6  ;;  %v2435_v54 = vld [vmem:[#allocation6 + $0x10] sm:$0xff] }
0x15b8   :  { %v6298_v20 = vpack.c.bf16 %v2436_v10, %v2435_v54 }
0x15d2   :  { %v2107_v21 = vpop.permute.xlu0 %2106 }
0x15d3   :  { %4317 = vmatmul.mubr.msk.f32.vlgmr.msra.gmra.mrb[20].mxu0 %vm502_vm13, %v2107_v21 }
0x15d4   :  { %4570 = vmatprep.mubr.msk.f32.mxu0 %vm5550_vm1, %v5548_v0  ;;  %4864 = vmatpush3.bf16.msra.mxu0 %v6294_v61 }
0x15d5   :  { %4865 = vmatprep.subr.bf16.mxu0 %v5549_v12 }
0x15d8   :  { %4867 = vmatpush3.bf16.msra.mxu0 %v6298_v20 }
0x15db   :  { %4571 = vmatmul.mubr.f32.vlgmr.msra.gmra.mrb[22].mxu0 %v5548_v0 }
0x15dc   :  { %2624 = vmatprep.mubr.f32.mxu0 %v5548_v0 }
0x1621   :  { %v2102_v22 = vpop.permute.xlu1 %2101 }
0x1622   :  { %v2104_v28 = vmul.f32 %v6239_v63, %v2102_v22  ;;  %v2203_v63 = vrot.slane %v6243_v50, 6 }
0x1624   :  { %2215 = vrot.lane.b32.xlu1 %v2104_v28, %s5553_s6 }
0x1625   :  { %v1067_v38 = vpop.permute.xlu1 %1066 }
0x1626   :  { %1070 = vst.msk [vmem:[%s6925_s16] sm:$0x30] %vm6932_vm4, %v1067_v38  ;;  %vm1077_vm4 = vcmask 259076  }
0x1627   :  { %1072 = vst.msk [vmem:[%s6925_s16 + $0x6] sm:$0x30] %vm6931_vm8, %v1067_v38  ;;  %vm1310_vm8 = vcmask 523526  }
0x1629   :  { %v1762_v29 = vpop.permute.xlu1 %1761 }
0x162a   :  { %1764 = vst.msk [vmem:[%s6925_s16 + $0x8] sm:$0xc] %vm838_vm14, %v1762_v29 }
0x162b   :  { %1765 = vst.msk [vmem:[%s6925_s16 + $0x2] sm:$0xc] %vm6933_vm15, %v1762_v29  ;;  %vm1079_vm15 = vcmask 521476  }
0x1696   :  { %v2216_v36 = vpop.permute.xlu1 %2215 }
0x1697   :  { %2218 = vst.msk [vmem:[%s6925_s16 + $0x8] sm:$0xc0] %vm6930_vm0, %v2216_v36  ;;  %vm1308_vm0 = vcmask 261126  }
0x1698   :  { %2219 = vst.msk [vmem:[%s6925_s16 - $0x6] sm:$0xc0] %vm6929_vm2, %v2216_v36  ;;  %vm848_vm2 = vcmask 519426   ;;  %v2323_v36 = vld [vmem:[#allocation10 + $0x8] sm:$0xff] }
0x169e   :  { %v2227_v5 = vld [vmem:[%s6925_s16 + $0x8] sm:$0xff] }
0x169f   :  { %v2226_v39 = vld [vmem:[%s6925_s16] sm:$0xff] }
0x16a0   :  { %4559 = vmatprep.mubr.msk.f32.mxu1 %vm384_vm7, %v2226_v39  ;;  %v2325_v39 = vld [vmem:[#allocation10 + $0x18] sm:$0xff] }
0x16a1   :  { %4560 = vmatmul.mubr.msk.f32.vlgmr.msra.gmra.mrb[16].mxu1 %vm384_vm7, %v2227_v5  ;;  %v4846_v5 = vpack.c.bf16 %v2325_v39, %v2323_v36 }
0x16a2   :  { %2420 = vmatprep.mubr.f32.mxu1 %v5548_v0 }
0x16a3   :  { %4847 = vmatprep.subr.bf16.mxu1 %v4846_v5 }
0x16a6   :  { %v2176_v40 = vpop.f32.mrb[20].mxu0 }
0x16a7   :  { %v2183_v51 = vrot.slane %v2176_v40, 2  ;;  %v2178_v35 = vpop.f32.mrb[21].mxu0  ;;  %v2322_v40 = vld [vmem:[#allocation10] sm:$0xff] }
0x16a8   :  { %v2184_v19 = vrot.slane %v2178_v35, 2 }
0x16a9   :  { %v2187_v34 = vadd.f32 %v2183_v51, %v6196_v13  ;;  %v2324_v51 = vld [vmem:[#allocation10 + $0x10] sm:$0xff] }
0x16aa   :  { %v2188_v45 = vadd.f32 %v2184_v19, %v6203_v53  ;;  %v4848_v35 = vpack.c.bf16 %v2324_v51, %v2322_v40 }
0x16ab   :  { %v4318_v15 = vmul.f32 -1.442695, %v2187_v34  ;;  %v2327_v34 = vld [vmem:[#allocation10 + $0x28] sm:$0xff] }
0x16ac   :  { %v4319_v3 = vmul.f32 -1.442695, %v2188_v45  ;;  %4849 = vmatpush1.bf16.msra.mxu1 %v4848_v35 }
0x16ad   :  { %5203 = vpow2.f32 %v4318_v15  ;;  %v2329_v15 = vld [vmem:[#allocation10 + $0x38] sm:$0xff] }
0x16ae   :  { %5205 = vtanh.f32 %v2188_v45  ;;  %v2523_v58 = vpop.f32.mrb[22].mxu0  ;;  %v4850_v19 = vpack.c.bf16 %v2329_v15, %v2327_v34  ;;  %v2326_v45 = vld [vmem:[#allocation10 + $0x20] sm:$0xff] }
0x16af   :  { %v4572_v60 = vpop.f32.mrb[23].mxu0 }
0x16b0   :  { %4851 = vmatprep.subr.bf16.mxu1 %v4850_v19  ;;  %v2338_v19 = vld [vmem:[%s6924_s15] sm:$0x3] }
0x16b7   :  { %v5204_v59 = vpop.eup %5203 }
0x16b8   :  { %v2192_v56 = vadd.f32 1.0, %v5204_v59  ;;  %v5206_v41 = vpop.eup %5205  ;;  %v2328_v59 = vld [vmem:[#allocation10 + $0x30] sm:$0xff] }
0x16ba   :  { %5207 = vrcp.f32 %v2192_v56  ;;  %v4852_v56 = vpack.c.bf16 %v2328_v59, %v2326_v45  ;;  %v2343_v45 = vrot.slane %v2338_v19, %v5809_v17  ;;  %v2347_v59 = vrot.slane %v2338_v19, %v5968_v18 }
0x16bc   :  { %4853 = vmatpush1.bf16.msra.mxu1 %v4852_v56 }
0x16c4   :  { %v5208_v49 = vpop.eup %5207 }
0x16c5   :  { %v2206_v37 = vmul.f32 %v5208_v49, %v5206_v41  ;;  %v2205_v44 = vmul.f32 %v5208_v49, %v2203_v63  ;;  %v2331_v41 = vld [vmem:[#allocation10 + $0x48] sm:$0xff]  ;;  %v2333_v63 = vld [vmem:[#allocation10 + $0x58] sm:$0xff] }
0x16c6   :  { %v4854_v49 = vpack.c.bf16 %v2333_v63, %v2331_v41 }
0x16c8   :  { %4855 = vmatprep.subr.bf16.mxu1 %v4854_v49 }
0x1774   :  { %v4561_v1 = vpop.f32.mrb[16].mxu1 }
0x1775   :  { %v2319_v13 = vadd.f32 %v4561_v1, %v4320_v57  ;;  %v2313_v47 = vpop.f32.mrb[17].mxu1  ;;  %v2437_v1 = vld [vmem:[#allocation12] sm:$0xff] }
0x1776   :  { %v2314_v31 = vadd.f32 %v4320_v57, %v2313_v47  ;;  %v2440_v57 = vld [vmem:[#allocation12 + $0x18] sm:$0xff] }
0x1777   :  { %v2454_v52 = vrot.slane %v2319_v13, 6  ;;  %v2667_v4 = vrot.slane %v2319_v13, 2 }
0x1778   :  { %v3352_v53 = vrot.slane %v2314_v31, 6  ;;  %v3581_v16 = vrot.slane %v2314_v31, 2 }
0x1779   :  { %v6343_v46 = vsel %vm5816_vm3, %v2314_v31, %v2454_v52  ;;  %v6347_v50 = vsel %vm5816_vm3, %v2314_v31, %v2667_v4  ;;  %v2335_v4 = vld [vmem:[#allocation10 + $0x68] sm:$0xff] }
0x177a   :  { %v2527_v11 = vadd.f32 %v2523_v58, %v6343_v46  ;;  %v6352_v48 = vsel %vm5816_vm3, %v2319_v13, %v3352_v53  ;;  %v6356_v14 = vsel %vm5816_vm3, %v2319_v13, %v3581_v16  ;;  %vm846_vm3 = vcmask 257026   ;;  %v2438_v58 = vld [vmem:[#allocation12 + $0x8] sm:$0xff]  ;;  %v2439_v13 = vld [vmem:[#allocation12 + $0x10] sm:$0xff]  ;;  %v2337_v53 = vld [vmem:[#allocation10 + $0x78] sm:$0xff] }
0x177b   :  { %v6410_v31 = vpack.c.bf16 %v2440_v57, %v2438_v58  ;;  %v6412_v52 = vpack.c.bf16 %v2439_v13, %v2437_v1  ;;  %v2334_v16 = vld [vmem:[#allocation10 + $0x60] sm:$0xff] }
0x177c   :  { %5209 = vtanh.f32 %v2527_v11  ;;  %v4325_v21 = vmul.f32 -1.442695, %v2527_v11  ;;  %v4858_v11 = vpack.c.bf16 %v2337_v53, %v2335_v4 }
0x177d   :  { %4869 = vmatprep.subr.bf16.mxu0 %v6410_v31 }
0x177e   :  { %5211 = vpow2.f32 %v4325_v21  ;;  %v2442_v21 = vld [vmem:[#allocation12 + $0x28] sm:$0xff]  ;;  %4871 = vmatpush1.bf16.msra.mxu0 %v6412_v52 }
0x177f   :  { %5213 = vpow2.f32 %v4319_v3 }
0x1786   :  { %v5210_v42 = vpop.eup %5209 }
0x1787   :  { %2537 = vrot.lane.b32.xlu1 %v5210_v42, %s5552_s2  ;;  %v2336_v42 = vld [vmem:[#allocation10 + $0x70] sm:$0xff] }
0x1788   :  { %v5212_v26 = vpop.eup %5211  ;;  %v4860_v3 = vpack.c.bf16 %v2336_v42, %v2334_v16 }
0x1789   :  { %v2531_v23 = vadd.f32 1.0, %v5212_v26  ;;  %v5214_v9 = vpop.eup %5213  ;;  %v2444_v26 = vld [vmem:[#allocation12 + $0x38] sm:$0xff] }
0x178b   :  { %2208 = vrot.lane.b32.xlu1 %v2206_v37, %s5552_s2  ;;  %5215 = vrcp.f32 %v2531_v23  ;;  %v2330_v37 = vld [vmem:[#allocation10 + $0x40] sm:$0xff]  ;;  %v6416_v23 = vpack.c.bf16 %v2444_v26, %v2442_v21 }
0x178d   :  { %4873 = vmatprep.subr.bf16.mxu0 %v6416_v23 }
0x178f   :  { %843 = vrot.lane.b32.xlu1 %v6064_v43, %s5552_s2  ;;  %v2199_v43 = vadd.f32 1.0, %v5214_v9  ;;  %v2441_v9 = vld [vmem:[#allocation12 + $0x20] sm:$0xff] }
0x1791   :  { %5217 = vrcp.f32 %v2199_v43  ;;  %v2446_v43 = vld [vmem:[#allocation12 + $0x48] sm:$0xff] }
0x1793   :  { %1305 = vrot.lane.b32.xlu1 %v6119_v30, %s5552_s2 }
0x1795   :  { %v6366_v25 = vpop.eup %5215 }
0x1796   :  { %v2535_v38 = vmul.f32 0.0, %v6366_v25 }
0x1797   :  { %1994 = vrot.lane.b32.xlu1 %v6280_v6, %s5552_s2 }
0x179b   :  { %v5218_v54 = vpop.eup %5217 }
0x17f9   :  { %v2538_v62 = vpop.permute.xlu1 %2537 }
0x17fa   :  { %v2540_v8 = vmul.f32 %v6366_v25, %v2538_v62  ;;  %v2443_v62 = vld [vmem:[#allocation12 + $0x30] sm:$0xff] }
0x17fc   :  { %2542 = vrot.lane.b32.xlu0 %v2540_v8, %s5553_s6  ;;  %v6419_v8 = vpack.c.bf16 %v2443_v62, %v2441_v9 }
0x17fd   :  { %v2209_v30 = vpop.permute.xlu1 %2208 }
0x17fe   :  { %v2211_v27 = vadd.f32 %v2209_v30, %v2205_v44  ;;  %v2332_v44 = vld [vmem:[#allocation10 + $0x50] sm:$0xff]  ;;  %v2448_v30 = vld [vmem:[#allocation12 + $0x58] sm:$0xff]  ;;  %4875 = vmatpush1.bf16.msra.mxu0 %v6419_v8 }
0x17ff   :  { %v4856_v60 = vpack.c.bf16 %v2332_v44, %v2330_v37 }
0x1800   :  { %5219 = vtanh.f32 %v2211_v27  ;;  %v6426_v27 = vpack.c.bf16 %v2448_v30, %v2446_v43 }
0x1801   :  { %v844_v6 = vpop.permute.xlu1 %843  ;;  %4857 = vmatpush1.bf16.msra.mxu1 %v4856_v60 }
0x1802   :  { %847 = vst.msk [vmem:[%s6926_s17] sm:$0xc] %vm846_vm3, %v844_v6  ;;  %4859 = vmatprep.subr.bf16.mxu1 %v4858_v11  ;;  %4877 = vmatprep.subr.bf16.mxu0 %v6426_v27 }
0x1803   :  { %849 = vst.msk [vmem:[%s6926_s17 + $0xa] sm:$0xc] %vm848_vm2, %v844_v6  ;;  %v2445_v6 = vld [vmem:[#allocation12 + $0x40] sm:$0xff] }
0x1805   :  { %v1306_v33 = vpop.permute.xlu1 %1305  ;;  %4861 = vmatpush1.bf16.msra.mxu1 %v4860_v3 }
0x1806   :  { %1309 = vst.msk [vmem:[%s6926_s17] sm:$0xc0] %vm1308_vm0, %v1306_v33  ;;  %4884 = vmatprep.subr.bf16.mxu1 %v5549_v12 }
0x1807   :  { %1311 = vst.msk [vmem:[%s6926_s17 + $0x2] sm:$0xc0] %vm1310_vm8, %v1306_v33  ;;  %v2447_v33 = vld [vmem:[#allocation12 + $0x50] sm:$0xff] }
0x1808   :  { %1540 = vst.msk [vmem:[%s6926_s17 + $0x8] sm:$0x3] %vm612_vm11, %v6180_v7 }
0x1809   :  { %1541 = vst.msk [vmem:[%s6926_s17 + $0x6] sm:$0x3] %vm614_vm12, %v6180_v7  ;;  %v1995_v10 = vpop.permute.xlu1 %1994 }
0x180a   :  { %v5220_v22 = vpop.eup %5219  ;;  %1997 = vst.msk [vmem:[%s6926_s17 + $0x8] sm:$0x30] %vm1077_vm4, %v1995_v10 }
0x180b   :  { %1998 = vst.msk [vmem:[%s6926_s17 - $0x2] sm:$0x30] %vm1079_vm15, %v1995_v10  ;;  %v6404_v28 = vmul.f32 %v5220_v22, %v5218_v54  ;;  %v6428_v54 = vpack.c.bf16 %v2447_v33, %v2445_v6  ;;  %v2450_v10 = vld [vmem:[#allocation12 + $0x68] sm:$0xff] }
0x180d   :  { %4879 = vmatpush1.bf16.msra.mxu0 %v6428_v54 }
0x186e   :  { %v2543_v7 = vpop.permute.xlu0 %2542 }
0x186f   :  { %v6407_v29 = vadd.f32 %v2543_v7, %v2535_v38  ;;  %v2449_v38 = vld [vmem:[#allocation12 + $0x60] sm:$0xff]  ;;  %v2451_v7 = vld [vmem:[#allocation12 + $0x70] sm:$0xff] }
0x1870   :  { %v6436_v36 = vpack.c.bf16 %v2451_v7, %v2449_v38 }
0x1871   :  { %5221 = vtanh.f32 %v6407_v29 }
0x187b   :  { %v5222_v47 = vpop.eup %5221 }
0x187c   :  { %2548 = vrot.lane.b32.xlu0 %v5222_v47, %s5552_s2 }
0x1880   :  { %1074 = vrot.lane.b32.xlu0 %v6096_v32, %s5552_s2  ;;  %v2452_v32 = vld [vmem:[#allocation12 + $0x78] sm:$0xff] }
0x1881   :  { %v6434_v22 = vpack.c.bf16 %v2452_v32, %v2450_v10 }
0x1883   :  { %4881 = vmatprep.subr.bf16.mxu0 %v6434_v22 }
0x1884   :  { %1767 = vrot.lane.b32.xlu0 %v6214_v24, %s5552_s2  ;;  %4883 = vmatpush1.bf16.msra.mxu0 %v6436_v36 }
0x1885   :  { %4906 = vmatprep.subr.bf16.mxu0 %v5549_v12 }
0x1887   :  { %2625 = vmatmul.mubr.f32.vlgmr.msra.gmra.mrb[24].mxu0 %v5548_v0 }
0x1888   :  { %2221 = vrot.lane.b32.xlu0 %v6404_v28, %s5552_s2  ;;  %4908 = vmatpush3.bf16.msra.mxu0 %v6294_v61 }
0x1889   :  { %4592 = vmatprep.mubr.msk.f32.mxu0 %vm5550_vm1, %v5548_v0  ;;  %4909 = vmatprep.subr.bf16.mxu0 %v5549_v12 }
0x188c   :  { %4911 = vmatpush3.bf16.msra.mxu0 %v6298_v20 }
0x188d   :  { %4913 = vmatprep.subr.bf16.mxu0 %v6410_v31 }
0x18ee   :  { %v2549_v24 = vpop.permute.xlu0 %2548 }
0x18ef   :  { %v2551_v28 = vmul.f32 %v6366_v25, %v2549_v24 }
0x18f1   :  { %2656 = vrot.lane.b32.xlu1 %v2551_v28, %s5553_s6 }
0x18f2   :  { %v1075_v39 = vpop.permute.xlu0 %1074 }
0x18f3   :  { %1078 = vst.msk [vmem:[%s6926_s17] sm:$0x30] %vm1077_vm4, %v1075_v39 }
0x18f4   :  { %1080 = vst.msk [vmem:[%s6926_s17 + $0x6] sm:$0x30] %vm1079_vm15, %v1075_v39 }
0x18f6   :  { %v1768_v5 = vpop.permute.xlu0 %1767 }
0x18f7   :  { %1770 = vst.msk [vmem:[%s6926_s17 + $0x8] sm:$0xc] %vm846_vm3, %v1768_v5 }
0x18f8   :  { %1771 = vst.msk [vmem:[%s6926_s17 + $0x2] sm:$0xc] %vm848_vm2, %v1768_v5 }
0x18fa   :  { %v2222_v25 = vpop.permute.xlu0 %2221 }
0x18fb   :  { %2224 = vst.msk [vmem:[%s6926_s17 + $0x8] sm:$0xc0] %vm1308_vm0, %v2222_v25 }
0x18fc   :  { %2225 = vst.msk [vmem:[%s6926_s17 - $0x6] sm:$0xc0] %vm1310_vm8, %v2222_v25 }
0x1902   :  { %v2229_v51 = vld [vmem:[%s6926_s17 + $0x8] sm:$0xff] }
0x1903   :  { %v2228_v40 = vld [vmem:[%s6926_s17] sm:$0xff] }
0x1904   :  { %4323 = vmatmul.mubr.msk.f32.vlgmr.msra.gmra.mrb[18].mxu1 %vm502_vm13, %v2228_v40 }
0x1905   :  { %2426 = vmatprep.mubr.f32.mxu1 %v5548_v0  ;;  %4886 = vmatpush3.bf16.msra.mxu1 %v6294_v61 }
0x1906   :  { %4887 = vmatprep.subr.bf16.mxu1 %v5549_v12 }
0x1908   :  { %4324 = vmatmul.mubr.msk.f32.gmra.mrb[20].mxu1 %vm502_vm13, %v2229_v51 }
0x1909   :  { %4889 = vmatpush3.bf16.msra.mxu1 %v6298_v20  ;;  %4581 = vmatprep.mubr.msk.f32.mxu1 %vm5550_vm1, %v5548_v0 }
0x190a   :  { %4891 = vmatprep.subr.bf16.mxu1 %v6410_v31 }
0x195a   :  { %v2626_v35 = vpop.f32.mrb[24].mxu0 }
0x195b   :  { %v2628_v34 = vpop.f32.mrb[25].mxu0 }
0x1963   :  { %v2657_v15 = vpop.permute.xlu1 %2656 }
0x1964   :  { %2659 = vst.msk [vmem:[%s6925_s16] sm:$0x3] %vm604_vm5, %v2657_v15  ;;  %4582 = vmatmul.mubr.msk.f32.vlgmr.msra.gmra.mrb[22].mxu1 %vm384_vm7, %v2657_v15 }
0x1965   :  { %2660 = vst.msk [vmem:[%s6925_s16 + $0xe] sm:$0x3] %vm606_vm6, %v2657_v15  ;;  %4893 = vmatpush1.bf16.msra.mxu1 %v6412_v52  ;;  %2845 = vmatprep.mubr.f32.mxu1 %v5548_v0  ;;  %v2754_v15 = vrot.slane %v6407_v29, 6 }
0x1966   :  { %4895 = vmatprep.subr.bf16.mxu1 %v6416_v23 }
0x1969   :  { %4897 = vmatpush1.bf16.msra.mxu1 %v6419_v8 }
0x196a   :  { %4899 = vmatprep.subr.bf16.mxu1 %v6426_v27 }
0x196d   :  { %4901 = vmatpush1.bf16.msra.mxu1 %v6428_v54 }
0x196e   :  { %4903 = vmatprep.subr.bf16.mxu1 %v6434_v22 }
0x1971   :  { %4905 = vmatpush1.bf16.msra.mxu1 %v6436_v36 }
0x1972   :  { %4928 = vmatprep.subr.bf16.mxu1 %v5549_v12 }
0x19d7   :  { %v2422_v56 = vpop.f32.mrb[18].mxu1 }
0x19d8   :  { %v2423_v41 = vadd.f32 %v2422_v56, %v2343_v45  ;;  %v2424_v63 = vpop.f32.mrb[19].mxu1 }
0x19d9   :  { %v2425_v49 = vadd.f32 %v2424_v63, %v2347_v59 }
0x19da   :  { %v3460_v60 = vrot.slane %v2423_v41, 6  ;;  %v3687_v57 = vrot.slane %v2423_v41, 2 }
0x19db   :  { %v2428_v37 = vpop.f32.mrb[20].mxu1  ;;  %v3461_v13 = vrot.slane %v2425_v49, 6  ;;  %v3688_v47 = vrot.slane %v2425_v49, 2 }
0x19dc   :  { %v2429_v44 = vadd.f32 %v2428_v37, %v2343_v45  ;;  %v2430_v58 = vpop.f32.mrb[21].mxu1 }
0x19dd   :  { %v2431_v1 = vadd.f32 %v2430_v58, %v2347_v59 }
0x19de   :  { %v2554_v4 = vrot.slane %v2429_v44, 6  ;;  %v2773_v53 = vrot.slane %v2429_v44, 2  ;;  %v6516_v16 = vsel %vm5957_vm9, %v2429_v44, %v3460_v60  ;;  %v6520_v17 = vsel %vm5957_vm9, %v2429_v44, %v3687_v57 }
0x19df   :  { %v2555_v18 = vrot.slane %v2431_v1, 6  ;;  %v2774_v11 = vrot.slane %v2431_v1, 2  ;;  %v6524_v42 = vsel %vm5977_vm10, %v2431_v1, %v3461_v13  ;;  %v6528_v21 = vsel %vm5977_vm10, %v2431_v1, %v3688_v47 }
0x19e0   :  { %v6532_v26 = vsel %vm5957_vm9, %v2423_v41, %v2554_v4  ;;  %v6536_v3 = vsel %vm5957_vm9, %v2423_v41, %v2773_v53  ;;  %vm6946_vm9 = vcmask 259204  }
0x19e1   :  { %v2631_v9 = vadd.f32 %v2626_v35, %v6532_v26  ;;  %v6541_v62 = vsel %vm5977_vm10, %v2425_v49, %v2555_v18  ;;  %v6545_v43 = vsel %vm5977_vm10, %v2425_v49, %v2774_v11  ;;  %vm6947_vm10 = vcmask 130054  }
0x19e2   :  { %v2632_v6 = vadd.f32 %v2628_v34, %v6541_v62 }
0x19e3   :  { %v4326_v30 = vmul.f32 -1.442695, %v2631_v9 }
0x19e4   :  { %v4327_v41 = vmul.f32 -1.442695, %v2632_v6 }
0x19e5   :  { %5223 = vpow2.f32 %v4326_v30 }
0x19e6   :  { %5225 = vtanh.f32 %v2632_v6 }
0x19ef   :  { %v5224_v33 = vpop.eup %5223 }
0x19f0   :  { %v2636_v10 = vadd.f32 1.0, %v5224_v33  ;;  %v5226_v55 = vpop.eup %5225 }
0x19f2   :  { %5227 = vrcp.f32 %v2636_v10 }
0x19fc   :  { %v5228_v32 = vpop.eup %5227 }
0x19fd   :  { %v2647_v38 = vmul.f32 %v5228_v32, %v5226_v55  ;;  %v2646_v58 = vmul.f32 0.0, %v5228_v32 }
0x1a37   :  { %v2738_v7 = vpop.f32.mrb[22].mxu1 }
0x1a38   :  { %v2743_v24 = vrot.slane %v2738_v7, 6  ;;  %v4583_v28 = vpop.f32.mrb[23].mxu1 }
0x1a3a   :  { %v2745_v39 = vadd.f32 %v2743_v24, %v6347_v50 }
0x1a3c   :  { %5229 = vtanh.f32 %v2745_v39  ;;  %v4329_v5 = vmul.f32 -1.442695, %v2745_v39 }
0x1a3e   :  { %5231 = vpow2.f32 %v4329_v5 }
0x1a46   :  { %v5230_v2 = vpop.eup %5229 }
0x1a47   :  { %2758 = vrot.lane.b32.xlu0 %v5230_v2, %s5552_s2 }
0x1a48   :  { %v5232_v25 = vpop.eup %5231 }
0x1a49   :  { %v2749_v40 = vadd.f32 1.0, %v5232_v25 }
0x1a4b   :  { %5233 = vrcp.f32 %v2749_v40 }
0x1a55   :  { %v5234_v51 = vpop.eup %5233 }
0x1a56   :  { %v2756_v19 = vmul.f32 %v5234_v51, %v2754_v15 }
0x1ab9   :  { %v2759_v35 = vpop.permute.xlu0 %2758 }
0x1aba   :  { %v2761_v34 = vmul.f32 %v5234_v51, %v2759_v35 }
0x1abc   :  { %2763 = vrot.lane.b32.xlu1 %v2761_v34, %s5553_s6 }
0x1b2e   :  { %v2764_v45 = vpop.permute.xlu1 %2763 }
0x1b2f   :  { %v6552_v59 = vadd.f32 %v2764_v45, %v2756_v19 }
0x1b31   :  { %5235 = vtanh.f32 %v6552_v59 }
0x1b32   :  { %5237 = vpow2.f32 %v4327_v41 }
0x1b3b   :  { %v5236_v56 = vpop.eup %5235 }
0x1b3c   :  { %2769 = vrot.lane.b32.xlu0 %v5236_v56, %s5552_s2  ;;  %v5238_v63 = vpop.eup %5237  ;;  %v2984_v56 = vrot.slane %v6552_v59, 6 }
0x1b3d   :  { %v2643_v44 = vadd.f32 1.0, %v5238_v63 }
0x1b3f   :  { %5239 = vrcp.f32 %v2643_v44 }
0x1b40   :  { %2649 = vrot.lane.b32.xlu0 %v2647_v38, %s5552_s2 }
0x1b49   :  { %v5240_v1 = vpop.eup %5239 }
0x1bae   :  { %v2770_v49 = vpop.permute.xlu0 %2769 }
0x1baf   :  { %v6557_v37 = vmul.f32 %v5234_v51, %v2770_v49 }
0x1bb1   :  { %v2897_v29 = vrot.slane %v6557_v37, 2 }
0x1bb2   :  { %v2650_v60 = vpop.permute.xlu0 %2649 }
0x1bb3   :  { %v2652_v57 = vadd.f32 %v2650_v60, %v2646_v58  ;;  %2898 = vrot.lane.b32.xlu1 %v2897_v29, %s5553_s6 }
0x1bb5   :  { %5241 = vtanh.f32 %v2652_v57 }
0x1bbf   :  { %v5242_v13 = vpop.eup %5241 }
0x1bc0   :  { %v2654_v47 = vmul.f32 %v5242_v13, %v5240_v1 }
0x1bc2   :  { %2662 = vrot.lane.b32.xlu1 %v2654_v47, %s5552_s2 }
0x1c25   :  { %v2899_v4 = vpop.permute.xlu1 %2898 }
0x1c26   :  { %4593 = vmatmul.mubr.msk.f32.vlgmr.msra.gmra.mrb[26].mxu0 %vm384_vm7, %v2899_v4 }
0x1c27   :  { %4915 = vmatpush1.bf16.msra.mxu0 %v6412_v52  ;;  %3072 = vmatprep.mubr.f32.mxu0 %v5548_v0 }
0x1c28   :  { %4917 = vmatprep.subr.bf16.mxu0 %v6416_v23 }
0x1c2b   :  { %4919 = vmatpush1.bf16.msra.mxu0 %v6419_v8 }
0x1c2c   :  { %4921 = vmatprep.subr.bf16.mxu0 %v6426_v27 }
0x1c2f   :  { %4923 = vmatpush1.bf16.msra.mxu0 %v6428_v54 }
0x1c30   :  { %4925 = vmatprep.subr.bf16.mxu0 %v6434_v22 }
0x1c33   :  { %4927 = vmatpush1.bf16.msra.mxu0 %v6436_v36 }
0x1c34   :  { %v2663_v53 = vpop.permute.xlu1 %2662  ;;  %4950 = vmatprep.subr.bf16.mxu0 %v5549_v12 }
0x1c35   :  { %2665 = vst.msk [vmem:[%s6926_s17] sm:$0x3] %vm612_vm11, %v2663_v53  ;;  %4330 = vmatmul.mubr.msk.f32.vlgmr.msra.gmra.mrb[24].mxu1 %vm502_vm13, %v2663_v53 }
0x1c36   :  { %2666 = vst.msk [vmem:[%s6926_s17 + $0xe] sm:$0x3] %vm614_vm12, %v2663_v53  ;;  %4930 = vmatpush3.bf16.msra.mxu1 %v6294_v61  ;;  %4603 = vmatprep.mubr.msk.f32.mxu1 %vm5550_vm1, %v5548_v0 }
0x1c37   :  { %4931 = vmatprep.subr.bf16.mxu1 %v5549_v12 }
0x1c3a   :  { %4933 = vmatpush3.bf16.msra.mxu1 %v6298_v20 }
0x1c3b   :  { %4935 = vmatprep.subr.bf16.mxu1 %v6410_v31 }
0x1cf9   :  { %v2968_v18 = vpop.f32.mrb[26].mxu0 }
0x1cfa   :  { %v2973_v11 = vrot.slane %v2968_v18, 4  ;;  %v4594_v9 = vpop.f32.mrb[27].mxu0 }
0x1cfc   :  { %v2975_v30 = vadd.f32 %v2973_v11, %v6343_v46  ;;  %v2874_v46 = vrot.slane %v2652_v57, 6 }
0x1cfe   :  { %5243 = vtanh.f32 %v2975_v30  ;;  %v4334_v51 = vmul.f32 -1.442695, %v2975_v30 }
0x1d08   :  { %v5244_v6 = vpop.eup %5243  ;;  %v2847_v33 = vpop.f32.mrb[24].mxu1 }
0x1d09   :  { %v2854_v10 = vrot.slane %v2847_v33, 6  ;;  %2988 = vrot.lane.b32.xlu0 %v5244_v6, %s5552_s2  ;;  %v2849_v55 = vpop.f32.mrb[25].mxu1 }
0x1d0a   :  { %v2855_v7 = vrot.slane %v2849_v55, 6 }
0x1d0b   :  { %v2858_v32 = vadd.f32 %v2854_v10, %v6536_v3 }
0x1d0c   :  { %v2859_v24 = vadd.f32 %v2855_v7, %v6545_v43 }
0x1d0d   :  { %v4331_v38 = vmul.f32 -1.442695, %v2858_v32 }
0x1d0e   :  { %v4332_v29 = vmul.f32 -1.442695, %v2859_v24 }
0x1d0f   :  { %5245 = vpow2.f32 %v4331_v38 }
0x1d10   :  { %5247 = vtanh.f32 %v2859_v24 }
0x1d19   :  { %v5246_v28 = vpop.eup %5245 }
0x1d1a   :  { %v2863_v39 = vadd.f32 1.0, %v5246_v28  ;;  %v5248_v2 = vpop.eup %5247 }
0x1d1c   :  { %5249 = vrcp.f32 %v2863_v39 }
0x1d1d   :  { %5251 = vpow2.f32 %v4334_v51 }
0x1d26   :  { %v5250_v5 = vpop.eup %5249 }
0x1d27   :  { %v2877_v25 = vmul.f32 %v5250_v5, %v5248_v2  ;;  %v2876_v40 = vmul.f32 %v5250_v5, %v2874_v46  ;;  %v5252_v35 = vpop.eup %5251 }
0x1d28   :  { %v2979_v34 = vadd.f32 1.0, %v5252_v35 }
0x1d2a   :  { %5253 = vrcp.f32 %v2979_v34 }
0x1d34   :  { %v5254_v15 = vpop.eup %5253 }
0x1d35   :  { %v2986_v41 = vmul.f32 %v5254_v15, %v2984_v56 }
0x1d7b   :  { %v2989_v19 = vpop.permute.xlu0 %2988 }
0x1d7c   :  { %v2991_v45 = vmul.f32 %v5254_v15, %v2989_v19 }
0x1d7e   :  { %2993 = vrot.lane.b32.xlu1 %v2991_v45, %s5553_s6 }
0x1df0   :  { %v2994_v63 = vpop.permute.xlu1 %2993 }
0x1df1   :  { %v6593_v49 = vadd.f32 %v2994_v63, %v2986_v41 }
0x1df3   :  { %5255 = vtanh.f32 %v6593_v49  ;;  %v3211_v63 = vrot.slane %v6593_v49, 6 }
0x1df4   :  { %5257 = vpow2.f32 %v4332_v29 }
0x1dfd   :  { %v5256_v44 = vpop.eup %5255 }
0x1dfe   :  { %2999 = vrot.lane.b32.xlu0 %v5256_v44, %s5552_s2  ;;  %v5258_v58 = vpop.eup %5257 }
0x1dff   :  { %v2870_v1 = vadd.f32 1.0, %v5258_v58 }
0x1e01   :  { %5259 = vrcp.f32 %v2870_v1 }
0x1e02   :  { %2879 = vrot.lane.b32.xlu0 %v2877_v25, %s5552_s2 }
0x1e0b   :  { %v5260_v4 = vpop.eup %5259 }
0x1e70   :  { %v3000_v60 = vpop.permute.xlu0 %2999 }
0x1e71   :  { %v6598_v57 = vmul.f32 %v5254_v15, %v3000_v60 }
0x1e73   :  { %v3124_v59 = vrot.slane %v6598_v57, 4 }
0x1e74   :  { %v2880_v13 = vpop.permute.xlu0 %2879 }
0x1e75   :  { %v2882_v47 = vadd.f32 %v2880_v13, %v2876_v40  ;;  %3125 = vrot.lane.b32.xlu1 %v3124_v59, %s5553_s6 }
0x1e77   :  { %5261 = vtanh.f32 %v2882_v47 }
0x1e81   :  { %v5262_v53 = vpop.eup %5261 }
0x1e82   :  { %v6602_v18 = vmul.f32 %v5262_v53, %v5260_v4 }
0x1e84   :  { %v3003_v11 = vrot.slane %v6602_v18, 2 }
0x1e86   :  { %3004 = vrot.lane.b32.xlu1 %v3003_v11, %s5552_s2 }
0x1ee7   :  { %v3126_v9 = vpop.permute.xlu1 %3125 }
0x1ee8   :  { %4604 = vmatmul.mubr.msk.f32.vlgmr.msra.gmra.mrb[26].mxu1 %vm384_vm7, %v3126_v9 }
0x1ee9   :  { %4937 = vmatpush1.bf16.msra.mxu1 %v6412_v52  ;;  %3299 = vmatprep.mubr.f32.mxu1 %v5548_v0 }
0x1eea   :  { %4939 = vmatprep.subr.bf16.mxu1 %v6416_v23 }
0x1eed   :  { %4941 = vmatpush1.bf16.msra.mxu1 %v6419_v8 }
0x1eee   :  { %4943 = vmatprep.subr.bf16.mxu1 %v6426_v27 }
0x1ef1   :  { %4945 = vmatpush1.bf16.msra.mxu1 %v6428_v54 }
0x1ef2   :  { %4947 = vmatprep.subr.bf16.mxu1 %v6434_v22 }
0x1ef5   :  { %4949 = vmatpush1.bf16.msra.mxu1 %v6436_v36 }
0x1ef6   :  { %4972 = vmatprep.subr.bf16.mxu1 %v5549_v12 }
0x1ef8   :  { %v3005_v30 = vpop.permute.xlu1 %3004 }
0x1ef9   :  { %4335 = vmatmul.mubr.msk.f32.vlgmr.msra.gmra.mrb[28].mxu0 %vm502_vm13, %v3005_v30 }
0x1efa   :  { %4952 = vmatpush3.bf16.msra.mxu0 %v6294_v61  ;;  %4614 = vmatprep.mubr.msk.f32.mxu0 %vm5550_vm1, %v5548_v0 }
0x1efb   :  { %4953 = vmatprep.subr.bf16.mxu0 %v5549_v12 }
0x1efe   :  { %4955 = vmatpush3.bf16.msra.mxu0 %v6298_v20 }
0x1eff   :  { %4957 = vmatprep.subr.bf16.mxu0 %v6410_v31 }
0x1fbb   :  { %v3195_v6 = vpop.f32.mrb[26].mxu1 }
0x1fbc   :  { %v3200_v33 = vrot.slane %v3195_v6, 2  ;;  %v4605_v10 = vpop.f32.mrb[27].mxu1 }
0x1fbe   :  { %v3202_v55 = vadd.f32 %v3200_v33, %v6347_v50  ;;  %v3101_v50 = vrot.slane %v2882_v47, 6 }
0x1fc0   :  { %5263 = vtanh.f32 %v3202_v55  ;;  %v4339_v15 = vmul.f32 -1.442695, %v3202_v55 }
0x1fca   :  { %v5264_v32 = vpop.eup %5263 }
0x1fcb   :  { %3215 = vrot.lane.b32.xlu0 %v5264_v32, %s5552_s2 }
0x1fcc   :  { %v3074_v38 = vpop.f32.mrb[28].mxu0 }
0x1fcd   :  { %v3081_v7 = vrot.slane %v3074_v38, 4  ;;  %v3076_v24 = vpop.f32.mrb[29].mxu0 }
0x1fce   :  { %v3082_v2 = vrot.slane %v3076_v24, 4 }
0x1fcf   :  { %v3085_v28 = vadd.f32 %v3081_v7, %v6532_v26 }
0x1fd0   :  { %v3086_v46 = vadd.f32 %v3082_v2, %v6541_v62 }
0x1fd1   :  { %v4336_v39 = vmul.f32 -1.442695, %v3085_v28 }
0x1fd2   :  { %v4337_v62 = vmul.f32 -1.442695, %v3086_v46 }
0x1fd3   :  { %5265 = vpow2.f32 %v4336_v39 }
0x1fd4   :  { %5267 = vtanh.f32 %v3086_v46 }
0x1fdd   :  { %v5266_v5 = vpop.eup %5265 }
0x1fde   :  { %v3090_v25 = vadd.f32 1.0, %v5266_v5  ;;  %v5268_v40 = vpop.eup %5267 }
0x1fe0   :  { %5269 = vrcp.f32 %v3090_v25 }
0x1fe1   :  { %5271 = vpow2.f32 %v4339_v15 }
0x1fea   :  { %v5270_v51 = vpop.eup %5269 }
0x1feb   :  { %v3104_v35 = vmul.f32 %v5270_v51, %v5268_v40  ;;  %v3103_v34 = vmul.f32 %v5270_v51, %v3101_v50  ;;  %v5272_v19 = vpop.eup %5271 }
0x1fec   :  { %v3206_v45 = vadd.f32 1.0, %v5272_v19 }
0x1fee   :  { %5273 = vrcp.f32 %v3206_v45 }
0x1fef   :  { %5275 = vpow2.f32 %v4337_v62 }
0x1ff8   :  { %v5274_v26 = vpop.eup %5273 }
0x1ff9   :  { %v5276_v44 = vpop.eup %5275  ;;  %v3213_v29 = vmul.f32 %v5274_v26, %v3211_v63 }
0x1ffa   :  { %v3097_v1 = vadd.f32 1.0, %v5276_v44 }
0x203d   :  { %v3216_v56 = vpop.permute.xlu0 %3215 }
0x203e   :  { %v3218_v41 = vmul.f32 %v5274_v26, %v3216_v56 }
0x2040   :  { %3220 = vrot.lane.b32.xlu1 %v3218_v41, %s5553_s6 }
0x2044   :  { %3106 = vrot.lane.b32.xlu1 %v3104_v35, %s5552_s2 }
0x20b2   :  { %v3221_v58 = vpop.permute.xlu1 %3220 }
0x20b3   :  { %v6630_v60 = vadd.f32 %v3221_v58, %v3213_v29 }
0x20b5   :  { %5277 = vtanh.f32 %v6630_v60 }
0x20b6   :  { %v3107_v59 = vpop.permute.xlu1 %3106  ;;  %5279 = vrcp.f32 %v3097_v1 }
0x20b7   :  { %v3109_v13 = vadd.f32 %v3107_v59, %v3103_v34 }
0x20b9   :  { %5281 = vtanh.f32 %v3109_v13  ;;  %v3328_v25 = vrot.slane %v3109_v13, 6 }
0x20bf   :  { %v5278_v47 = vpop.eup %5277 }
0x20c0   :  { %3226 = vrot.lane.b32.xlu0 %v5278_v47, %s5552_s2  ;;  %v5280_v4 = vpop.eup %5279 }
0x20c3   :  { %v5282_v53 = vpop.eup %5281 }
0x20c4   :  { %v6634_v11 = vmul.f32 %v5282_v53, %v5280_v4  ;;  %v3439_v53 = vrot.slane %v6630_v60, 6 }
0x20c6   :  { %v3230_v49 = vrot.slane %v6634_v11, 4 }
0x20c8   :  { %3231 = vrot.lane.b32.xlu1 %v3230_v49, %s5552_s2 }
0x2132   :  { %v3227_v9 = vpop.permute.xlu0 %3226 }
0x2133   :  { %v6638_v30 = vmul.f32 %v5274_v26, %v3227_v9 }
0x2135   :  { %v3355_v6 = vrot.slane %v6638_v30, 6 }
0x2137   :  { %3356 = vrot.lane.b32.xlu0 %v3355_v6, %s5553_s6 }
0x213a   :  { %v3232_v33 = vpop.permute.xlu1 %3231 }
0x213b   :  { %4340 = vmatmul.mubr.msk.f32.vlgmr.msra.gmra.mrb[28].mxu1 %vm502_vm13, %v3232_v33 }
0x213c   :  { %4974 = vmatpush3.bf16.msra.mxu1 %v6294_v61  ;;  %4625 = vmatprep.mubr.msk.f32.mxu1 %vm5550_vm1, %v5548_v0 }
0x213d   :  { %4975 = vmatprep.subr.bf16.mxu1 %v5549_v12 }
0x2140   :  { %4977 = vmatpush3.bf16.msra.mxu1 %v6298_v20 }
0x2141   :  { %4979 = vmatprep.subr.bf16.mxu1 %v6410_v31 }
0x21a9   :  { %v3357_v10 = vpop.permute.xlu0 %3356 }
0x21aa   :  { %4615 = vmatmul.mubr.msk.f32.vlgmr.msra.gmra.mrb[30].mxu0 %vm384_vm7, %v3357_v10 }
0x21ab   :  { %4959 = vmatpush1.bf16.msra.mxu0 %v6412_v52  ;;  %3535 = vmatprep.mubr.f32.mxu0 %v5548_v0 }
0x21ac   :  { %4961 = vmatprep.subr.bf16.mxu0 %v6416_v23 }
0x21af   :  { %4963 = vmatpush1.bf16.msra.mxu0 %v6419_v8 }
0x21b0   :  { %4965 = vmatprep.subr.bf16.mxu0 %v6426_v27 }
0x21b3   :  { %4967 = vmatpush1.bf16.msra.mxu0 %v6428_v54 }
0x21b4   :  { %4969 = vmatprep.subr.bf16.mxu0 %v6434_v22 }
0x21b7   :  { %4971 = vmatpush1.bf16.msra.mxu0 %v6436_v36 }
0x21b8   :  { %4994 = vmatprep.subr.bf16.mxu0 %v5549_v12 }
0x220e   :  { %v3301_v55 = vpop.f32.mrb[28].mxu1 }
0x220f   :  { %v3308_v32 = vrot.slane %v3301_v55, 2  ;;  %v3303_v38 = vpop.f32.mrb[29].mxu1 }
0x2210   :  { %v3309_v28 = vrot.slane %v3303_v38, 2 }
0x2211   :  { %v3312_v7 = vadd.f32 %v3308_v32, %v6536_v3 }
0x2212   :  { %v3313_v39 = vadd.f32 %v3309_v28, %v6545_v43 }
0x2213   :  { %v4341_v24 = vmul.f32 -1.442695, %v3312_v7 }
0x2214   :  { %v4342_v43 = vmul.f32 -1.442695, %v3313_v39 }
0x2215   :  { %5283 = vpow2.f32 %v4341_v24 }
0x2216   :  { %5285 = vtanh.f32 %v3313_v39 }
0x221f   :  { %v5284_v2 = vpop.eup %5283 }
0x2220   :  { %v3317_v46 = vadd.f32 1.0, %v5284_v2  ;;  %v5286_v5 = vpop.eup %5285 }
0x2222   :  { %5287 = vrcp.f32 %v3317_v46 }
0x222c   :  { %v5288_v40 = vpop.eup %5287 }
0x222d   :  { %v3331_v50 = vmul.f32 %v5288_v40, %v5286_v5  ;;  %v3330_v51 = vmul.f32 %v5288_v40, %v3328_v25 }
0x222f   :  { %3333 = vrot.lane.b32.xlu1 %v3331_v50, %s5552_s2 }
0x227d   :  { %v3426_v35 = vpop.f32.mrb[30].mxu0 }
0x227e   :  { %v3430_v34 = vadd.f32 %v3426_v35, %v6352_v48  ;;  %v4616_v3 = vpop.f32.mrb[31].mxu0 }
0x2280   :  { %5289 = vtanh.f32 %v3430_v34  ;;  %v4344_v29 = vmul.f32 -1.442695, %v3430_v34 }
0x2281   :  { %5291 = vpow2.f32 %v4342_v43 }
0x228a   :  { %v5290_v15 = vpop.eup %5289 }
0x228b   :  { %3443 = vrot.lane.b32.xlu0 %v5290_v15, %s5552_s2  ;;  %v5292_v19 = vpop.eup %5291 }
0x228c   :  { %v3324_v45 = vadd.f32 1.0, %v5292_v19 }
0x228e   :  { %5293 = vrcp.f32 %v3324_v45 }
0x2298   :  { %v5294_v41 = vpop.eup %5293 }
0x22a1   :  { %v3334_v26 = vpop.permute.xlu1 %3333 }
0x22a2   :  { %v3336_v56 = vadd.f32 %v3334_v26, %v3330_v51 }
0x22a4   :  { %5295 = vtanh.f32 %v3336_v56  ;;  %v3558_v46 = vrot.slane %v3336_v56, 6 }
0x22a5   :  { %5297 = vpow2.f32 %v4344_v29 }
0x22ae   :  { %v5296_v62 = vpop.eup %5295 }
0x22af   :  { %v6664_v63 = vmul.f32 %v5296_v62, %v5294_v41  ;;  %v5298_v58 = vpop.eup %5297 }
0x22b0   :  { %v3434_v1 = vadd.f32 1.0, %v5298_v58 }
0x22b1   :  { %v3466_v44 = vrot.slane %v6664_v63, 6 }
0x22b2   :  { %5299 = vrcp.f32 %v3434_v1 }
0x22b3   :  { %3467 = vrot.lane.b32.xlu1 %v3466_v44, %s5552_s2 }
0x22bc   :  { %v5300_v59 = vpop.eup %5299 }
0x22bd   :  { %v3441_v49 = vmul.f32 %v5300_v59, %v3439_v53 }
0x22fd   :  { %v3444_v13 = vpop.permute.xlu0 %3443 }
0x22fe   :  { %v3446_v47 = vmul.f32 %v5300_v59, %v3444_v13 }
0x2300   :  { %3448 = vrot.lane.b32.xlu0 %v3446_v47, %s5553_s6 }
0x2325   :  { %v3468_v4 = vpop.permute.xlu1 %3467 }
0x2326   :  { %4345 = vmatmul.mubr.msk.f32.vlgmr.msra.gmra.mrb[32].mxu0 %vm502_vm13, %v3468_v4 }
0x2327   :  { %4996 = vmatpush3.bf16.msra.mxu0 %v6294_v61  ;;  %4636 = vmatprep.mubr.msk.f32.mxu0 %vm5550_vm1, %v5548_v0 }
0x2328   :  { %4997 = vmatprep.subr.bf16.mxu0 %v5549_v12 }
0x232b   :  { %4999 = vmatpush3.bf16.msra.mxu0 %v6298_v20 }
0x232c   :  { %5001 = vmatprep.subr.bf16.mxu0 %v6410_v31 }
0x2372   :  { %v3449_v9 = vpop.permute.xlu0 %3448 }
0x2373   :  { %v6677_v6 = vadd.f32 %v3449_v9, %v3441_v49 }
0x2375   :  { %5301 = vtanh.f32 %v6677_v6 }
0x237f   :  { %v5302_v33 = vpop.eup %5301 }
0x2380   :  { %3454 = vrot.lane.b32.xlu0 %v5302_v33, %s5552_s2 }
0x23f2   :  { %v3455_v10 = vpop.permute.xlu0 %3454 }
0x23f3   :  { %v3457_v55 = vmul.f32 %v5300_v59, %v3455_v10 }
0x23f5   :  { %3570 = vrot.lane.b32.xlu1 %v3457_v55, %s5553_s6 }
0x23f9   :  { %v3537_v32 = vpop.f32.mrb[32].mxu0 }
0x23fa   :  { %v3542_v38 = vadd.f32 %v3537_v32, %v6516_v16  ;;  %v3539_v7 = vpop.f32.mrb[33].mxu0 }
0x23fb   :  { %v3543_v60 = vadd.f32 %v3539_v7, %v6524_v42 }
0x23fc   :  { %v4346_v24 = vmul.f32 -1.442695, %v3542_v38 }
0x23fd   :  { %v4347_v51 = vmul.f32 -1.442695, %v3543_v60 }
0x23fe   :  { %5303 = vpow2.f32 %v4346_v24 }
0x23ff   :  { %5305 = vtanh.f32 %v3543_v60  ;;  %v3668_v60 = vrot.slane %v6677_v6, 6 }
0x2408   :  { %v5304_v28 = vpop.eup %5303 }
0x2409   :  { %v3547_v39 = vadd.f32 1.0, %v5304_v28  ;;  %v5306_v2 = vpop.eup %5305 }
0x240b   :  { %5307 = vrcp.f32 %v3547_v39 }
0x240c   :  { %5309 = vpow2.f32 %v4347_v51 }
0x2415   :  { %v5308_v5 = vpop.eup %5307 }
0x2416   :  { %v3561_v25 = vmul.f32 %v5308_v5, %v5306_v2  ;;  %v3560_v40 = vmul.f32 %v5308_v5, %v3558_v46  ;;  %v5310_v35 = vpop.eup %5309 }
0x2417   :  { %v3554_v34 = vadd.f32 1.0, %v5310_v35 }
0x2418   :  { %3563 = vrot.lane.b32.xlu0 %v3561_v25, %s5552_s2 }
0x2419   :  { %5311 = vrcp.f32 %v3554_v34 }
0x2423   :  { %v5312_v43 = vpop.eup %5311 }
0x2467   :  { %v6685_v50 = vpop.permute.xlu1 %3570 }
0x2468   :  { %4626 = vmatmul.mubr.msk.f32.vlgmr.msra.gmra.mrb[30].mxu1 %vm384_vm7, %v6685_v50 }
0x2469   :  { %4981 = vmatpush1.bf16.msra.mxu1 %v6412_v52  ;;  %3759 = vmatprep.mubr.f32.mxu1 %v5548_v0 }
0x246a   :  { %4983 = vmatprep.subr.bf16.mxu1 %v6416_v23 }
0x246d   :  { %4985 = vmatpush1.bf16.msra.mxu1 %v6419_v8 }
0x246e   :  { %4987 = vmatprep.subr.bf16.mxu1 %v6426_v27 }
0x2471   :  { %4989 = vmatpush1.bf16.msra.mxu1 %v6428_v54 }
0x2472   :  { %4991 = vmatprep.subr.bf16.mxu1 %v6434_v22 }
0x2475   :  { %4993 = vmatpush1.bf16.msra.mxu1 %v6436_v36 }
0x2476   :  { %5016 = vmatprep.subr.bf16.mxu1 %v5549_v12 }
0x248a   :  { %v3564_v3 = vpop.permute.xlu0 %3563 }
0x248b   :  { %v3566_v15 = vadd.f32 %v3564_v3, %v3560_v40 }
0x248d   :  { %5313 = vtanh.f32 %v3566_v15  ;;  %v3788_v32 = vrot.slane %v3566_v15, 6 }
0x2497   :  { %v5314_v19 = vpop.eup %5313 }
0x2498   :  { %v3568_v45 = vmul.f32 %v5314_v19, %v5312_v43 }
0x249a   :  { %3576 = vrot.lane.b32.xlu0 %v3568_v45, %s5552_s2 }
0x250c   :  { %v6699_v26 = vpop.permute.xlu0 %3576 }
0x250d   :  { %4350 = vmatmul.mubr.msk.f32.vlgmr.msra.gmra.mrb[32].mxu1 %vm502_vm13, %v6699_v26 }
0x250e   :  { %5018 = vmatpush3.bf16.msra.mxu1 %v6294_v61  ;;  %4647 = vmatprep.mubr.msk.f32.mxu1 %vm5550_vm1, %v5548_v0  ;;  %vm6944_vm1 = vcmask 257154  }
0x250f   :  { %5019 = vmatprep.subr.bf16.mxu1 %v5549_v12 }
0x2512   :  { %5021 = vmatpush3.bf16.msra.mxu1 %v6298_v20 }
0x2513   :  { %5023 = vmatprep.subr.bf16.mxu1 %v6410_v31 }
0x253b   :  { %v3652_v56 = vpop.f32.mrb[30].mxu1 }
0x253c   :  { %v3657_v41 = vrot.slane %v3652_v56, 6  ;;  %v4627_v62 = vpop.f32.mrb[31].mxu1 }
0x253e   :  { %v3659_v44 = vadd.f32 %v3657_v41, %v6356_v14 }
0x2540   :  { %5315 = vtanh.f32 %v3659_v44  ;;  %v4349_v58 = vmul.f32 -1.442695, %v3659_v44 }
0x2542   :  { %5317 = vpow2.f32 %v4349_v58 }
0x254a   :  { %v5316_v29 = vpop.eup %5315 }
0x254b   :  { %3672 = vrot.lane.b32.xlu1 %v5316_v29, %s5552_s2 }
0x254c   :  { %v5318_v61 = vpop.eup %5317 }
0x254d   :  { %v3663_v1 = vadd.f32 1.0, %v5318_v61 }
0x254f   :  { %5319 = vrcp.f32 %v3663_v1 }
0x2559   :  { %v5320_v59 = vpop.eup %5319 }
0x255a   :  { %v3670_v28 = vmul.f32 %v5320_v59, %v3668_v60 }
0x25bd   :  { %v3673_v12 = vpop.permute.xlu1 %3672 }
0x25be   :  { %v3675_v13 = vmul.f32 %v5320_v59, %v3673_v12 }
0x25c0   :  { %3677 = vrot.lane.b32.xlu1 %v3675_v13, %s5553_s6 }
0x25e0   :  { %v3761_v20 = vpop.f32.mrb[32].mxu1 }
0x25e1   :  { %v3768_v31 = vrot.slane %v3761_v20, 6  ;;  %v3763_v47 = vpop.f32.mrb[33].mxu1 }
0x25e2   :  { %v3769_v49 = vrot.slane %v3763_v47, 6 }
0x25e3   :  { %v3772_v4 = vadd.f32 %v3768_v31, %v6520_v17 }
0x25e4   :  { %v3773_v9 = vadd.f32 %v3769_v49, %v6528_v21 }
0x25e5   :  { %v4351_v53 = vmul.f32 -1.442695, %v3772_v4 }
0x25e6   :  { %v4352_v5 = vmul.f32 -1.442695, %v3773_v9 }
0x25e7   :  { %5321 = vpow2.f32 %v4351_v53 }
0x25e8   :  { %5323 = vtanh.f32 %v3773_v9 }
0x25f1   :  { %v5322_v33 = vpop.eup %5321 }
0x25f2   :  { %v3777_v10 = vadd.f32 1.0, %v5322_v33  ;;  %v5324_v55 = vpop.eup %5323 }
0x25f4   :  { %5325 = vrcp.f32 %v3777_v10 }
0x25fe   :  { %v5326_v38 = vpop.eup %5325 }
0x25ff   :  { %v3791_v7 = vmul.f32 %v5326_v38, %v5324_v55  ;;  %v3790_v24 = vmul.f32 %v5326_v38, %v3788_v32 }
0x2632   :  { %v3678_v39 = vpop.permute.xlu1 %3677 }
0x2633   :  { %v6715_v2 = vadd.f32 %v3678_v39, %v3670_v28 }
0x2635   :  { %5327 = vtanh.f32 %v6715_v2 }
0x2636   :  { %5329 = vpow2.f32 %v4352_v5 }
0x263f   :  { %v5328_v46 = vpop.eup %5327 }
0x2640   :  { %3683 = vrot.lane.b32.xlu0 %v5328_v46, %s5552_s2  ;;  %v5330_v25 = vpop.eup %5329 }
0x2641   :  { %v3784_v35 = vadd.f32 1.0, %v5330_v25 }
0x2643   :  { %5331 = vrcp.f32 %v3784_v35 }
0x2644   :  { %3793 = vrot.lane.b32.xlu0 %v3791_v7, %s5552_s2 }
0x264d   :  { %v5332_v15 = vpop.eup %5331 }
0x26b2   :  { %v3684_v40 = vpop.permute.xlu0 %3683 }
0x26b3   :  { %v6720_v51 = vmul.f32 %v5320_v59, %v3684_v40 }
0x26b5   :  { %v3811_v6 = vrot.slane %v6720_v51, 2 }
0x26b6   :  { %v3794_v34 = vpop.permute.xlu0 %3793 }
0x26b7   :  { %v3796_v3 = vadd.f32 %v3794_v34, %v3790_v24  ;;  %3812 = vrot.lane.b32.xlu1 %v3811_v6, %s5553_s6 }
0x26b9   :  { %5333 = vtanh.f32 %v3796_v3 }
0x26c3   :  { %v5334_v43 = vpop.eup %5333 }
0x26c4   :  { %v6724_v19 = vmul.f32 %v5334_v43, %v5332_v15 }
0x26c6   :  { %v3917_v45 = vrot.slane %v6724_v19, 2 }
0x26c8   :  { %3918 = vrot.lane.b32.xlu1 %v3917_v45, %s5552_s2 }
0x2729   :  { %v3813_v56 = vpop.permute.xlu1 %3812 }
0x272a   :  { %4637 = vmatmul.mubr.msk.f32.vlgmr.msra.gmra.mrb[34].mxu0 %vm384_vm7, %v3813_v56 }
0x272b   :  { %5003 = vmatpush1.bf16.msra.mxu0 %v6412_v52  ;;  %3986 = vmatprep.mubr.f32.mxu0 %v5548_v0 }
0x272c   :  { %5005 = vmatprep.subr.bf16.mxu0 %v6416_v23 }
0x272f   :  { %5007 = vmatpush1.bf16.msra.mxu0 %v6419_v8 }
0x2730   :  { %5009 = vmatprep.subr.bf16.mxu0 %v6426_v27 }
0x2733   :  { %5011 = vmatpush1.bf16.msra.mxu0 %v6428_v54 }
0x2734   :  { %5013 = vmatprep.subr.bf16.mxu0 %v6434_v22 }
0x2737   :  { %5015 = vmatpush1.bf16.msra.mxu0 %v6436_v36 }
0x273a   :  { %v3919_v41 = vpop.permute.xlu1 %3918 }
0x273b   :  { %4355 = vmatmul.mubr.msk.f32.vlgmr.msra.gmra.mrb[36].mxu0 %vm502_vm13, %v3919_v41 }
0x27fd   :  { %v3882_v62 = vpop.f32.mrb[34].mxu0 }
0x27fe   :  { %v3887_v44 = vrot.slane %v3882_v62, 4  ;;  %v4638_v29 = vpop.f32.mrb[35].mxu0 }
0x2800   :  { %v3889_v58 = vadd.f32 %v3887_v44, %v6352_v48  ;;  %v4015_v48 = vrot.slane %v3796_v3, 6 }
0x2802   :  { %5335 = vtanh.f32 %v3889_v58  ;;  %v4354_v55 = vmul.f32 -1.442695, %v3889_v58 }
0x280c   :  { %v5336_v61 = vpop.eup %5335 }
0x280d   :  { %3902 = vrot.lane.b32.xlu0 %v5336_v61, %s5552_s2 }
0x280e   :  { %v3988_v1 = vpop.f32.mrb[36].mxu0 }
0x280f   :  { %v3995_v59 = vrot.slane %v3988_v1, 4  ;;  %v3990_v12 = vpop.f32.mrb[37].mxu0 }
0x2810   :  { %v3996_v31 = vrot.slane %v3990_v12, 4 }
0x2811   :  { %v3999_v13 = vadd.f32 %v3995_v59, %v6516_v16 }
0x2812   :  { %v4000_v47 = vadd.f32 %v3996_v31, %v6524_v42  ;;  %v3898_v42 = vrot.slane %v6715_v2, 6 }
0x2813   :  { %v4356_v20 = vmul.f32 -1.442695, %v3999_v13 }
0x2814   :  { %v4357_v5 = vmul.f32 -1.442695, %v4000_v47 }
0x2815   :  { %5337 = vpow2.f32 %v4356_v20 }
0x2816   :  { %5339 = vtanh.f32 %v4000_v47 }
0x281f   :  { %v5338_v4 = vpop.eup %5337 }
0x2820   :  { %v4004_v53 = vadd.f32 1.0, %v5338_v4  ;;  %v5340_v49 = vpop.eup %5339 }
0x2822   :  { %5341 = vrcp.f32 %v4004_v53 }
0x2823   :  { %5343 = vpow2.f32 %v4354_v55 }
0x282c   :  { %v5342_v9 = vpop.eup %5341 }
0x282d   :  { %v4018_v33 = vmul.f32 %v5342_v9, %v5340_v49  ;;  %v4017_v10 = vmul.f32 %v5342_v9, %v4015_v48  ;;  %v5344_v32 = vpop.eup %5343 }
0x282e   :  { %v3893_v38 = vadd.f32 1.0, %v5344_v32 }
0x2830   :  { %5345 = vrcp.f32 %v3893_v38 }
0x283a   :  { %v5346_v16 = vpop.eup %5345 }
0x283b   :  { %v3900_v60 = vmul.f32 %v5346_v16, %v3898_v42 }
0x287f   :  { %v3903_v7 = vpop.permute.xlu0 %3902 }
0x2880   :  { %v3905_v24 = vmul.f32 %v5346_v16, %v3903_v7 }
0x2882   :  { %3907 = vrot.lane.b32.xlu1 %v3905_v24, %s5553_s6 }
0x28f4   :  { %v3908_v28 = vpop.permute.xlu1 %3907 }
0x28f5   :  { %v6744_v39 = vadd.f32 %v3908_v28, %v3900_v60 }
0x28f7   :  { %5347 = vtanh.f32 %v6744_v39 }
0x28f8   :  { %5349 = vpow2.f32 %v4357_v5 }
0x2901   :  { %v5348_v46 = vpop.eup %5347 }
0x2902   :  { %3913 = vrot.lane.b32.xlu0 %v5348_v46, %s5552_s2  ;;  %v5350_v25 = vpop.eup %5349 }
0x2903   :  { %v4011_v6 = vadd.f32 1.0, %v5350_v25 }
0x2905   :  { %5351 = vrcp.f32 %v4011_v6 }
0x2906   :  { %4020 = vrot.lane.b32.xlu0 %v4018_v33, %s5552_s2 }
0x290f   :  { %v5352_v15 = vpop.eup %5351 }
0x2974   :  { %v3914_v40 = vpop.permute.xlu0 %3913 }
0x2975   :  { %v3916_v35 = vmul.f32 %v5346_v16, %v3914_v40 }
0x2977   :  { %v4038_v34 = vrot.slane %v3916_v35, 4 }
0x2978   :  { %v4021_v3 = vpop.permute.xlu0 %4020 }
0x2979   :  { %v4023_v2 = vadd.f32 %v4021_v3, %v4017_v10  ;;  %4039 = vrot.lane.b32.xlu1 %v4038_v34, %s5553_s6 }
0x297b   :  { %5353 = vtanh.f32 %v4023_v2 }
0x2985   :  { %v5354_v43 = vpop.eup %5353 }
0x2986   :  { %v6750_v45 = vmul.f32 %v5354_v43, %v5352_v15 }
0x2988   :  { %v4144_v56 = vrot.slane %v6750_v45, 4 }
0x298a   :  { %4145 = vrot.lane.b32.xlu1 %v4144_v56, %s5552_s2 }
0x29eb   :  { %v4040_v41 = vpop.permute.xlu1 %4039 }
0x29ec   :  { %4648 = vmatmul.mubr.msk.f32.vlgmr.msra.gmra.mrb[34].mxu1 %vm384_vm7, %v4040_v41  ;;  %vm6945_vm7 = vcmask 128004  }
0x29ed   :  { %5025 = vmatpush1.bf16.msra.mxu1 %v6412_v52  ;;  %4213 = vmatprep.mubr.f32.mxu1 %v5548_v0 }
0x29ee   :  { %5027 = vmatprep.subr.bf16.mxu1 %v6416_v23 }
0x29f1   :  { %5029 = vmatpush1.bf16.msra.mxu1 %v6419_v8 }
0x29f2   :  { %5031 = vmatprep.subr.bf16.mxu1 %v6426_v27 }
0x29f5   :  { %5033 = vmatpush1.bf16.msra.mxu1 %v6428_v54 }
0x29f6   :  { %5035 = vmatprep.subr.bf16.mxu1 %v6434_v22 }
0x29f9   :  { %5037 = vmatpush1.bf16.msra.mxu1 %v6436_v36 }
0x29fc   :  { %v4146_v62 = vpop.permute.xlu1 %4145 }
0x29fd   :  { %4360 = vmatmul.mubr.msk.f32.vlgmr.msra.gmra.mrb[36].mxu1 %vm502_vm13, %v4146_v62  ;;  %vm6948_vm13 = vcmask 261254  }
0x2abf   :  { %v4109_v44 = vpop.f32.mrb[34].mxu1 }
0x2ac0   :  { %v4114_v29 = vrot.slane %v4109_v44, 2  ;;  %v4649_v52 = vpop.f32.mrb[35].mxu1 }
0x2ac2   :  { %v4116_v0 = vadd.f32 %v4114_v29, %v6356_v14  ;;  %v4242_v14 = vrot.slane %v4023_v2, 6 }
0x2ac4   :  { %5355 = vtanh.f32 %v4116_v0 }
0x2ace   :  { %v5356_v23 = vpop.eup %5355 }
0x2acf   :  { %4129 = vrot.lane.b32.xlu0 %v5356_v23, %s5552_s2 }
0x2ad0   :  { %v4215_v8 = vpop.f32.mrb[36].mxu1 }
0x2ad1   :  { %v4222_v27 = vrot.slane %v4215_v8, 2  ;;  %v4217_v58 = vpop.f32.mrb[37].mxu1 }
0x2ad2   :  { %v4223_v36 = vrot.slane %v4217_v58, 2 }
0x2ad3   :  { %v4226_v54 = vadd.f32 %v4222_v27, %v6520_v17  ;;  %v4359_v17 = vmul.f32 -1.442695, %v4116_v0 }
0x2ad4   :  { %v4227_v61 = vadd.f32 %v4223_v36, %v6528_v21 }
0x2ad5   :  { %v4361_v22 = vmul.f32 -1.442695, %v4226_v54 }
0x2ad7   :  { %5357 = vpow2.f32 %v4361_v22 }
0x2ad8   :  { %5359 = vtanh.f32 %v4227_v61 }
0x2ae1   :  { %v5358_v1 = vpop.eup %5357 }
0x2ae2   :  { %v4231_v59 = vadd.f32 1.0, %v5358_v1  ;;  %v5360_v12 = vpop.eup %5359 }
0x2ae4   :  { %5361 = vrcp.f32 %v4231_v59 }
0x2ae5   :  { %5363 = vpow2.f32 %v4359_v17 }
0x2aee   :  { %v5362_v13 = vpop.eup %5361 }
0x2aef   :  { %v4245_v20 = vmul.f32 %v5362_v13, %v5360_v12  ;;  %v4244_v31 = vmul.f32 %v5362_v13, %v4242_v14  ;;  %v5364_v21 = vpop.eup %5363 }
0x2af0   :  { %v4120_v47 = vadd.f32 1.0, %v5364_v21 }
0x2af1   :  { %4247 = vrot.lane.b32.xlu0 %v4245_v20, %s5552_s2 }
0x2af2   :  { %5365 = vrcp.f32 %v4120_v47 }
0x2af5   :  { %2886 = vrot.lane.b32.xlu0 %v6557_v37, %s5553_s6  ;;  %v4362_v37 = vmul.f32 -1.442695, %v4227_v61 }
0x2af7   :  { %5367 = vpow2.f32 %v4362_v37 }
0x2af9   :  { %3113 = vrot.lane.b32.xlu0 %v6598_v57, %s5553_s6 }
0x2afc   :  { %v5366_v4 = vpop.eup %5365 }
0x2afd   :  { %3340 = vrot.lane.b32.xlu0 %v6638_v30, %s5553_s6 }
0x2b01   :  { %3800 = vrot.lane.b32.xlu0 %v6720_v51, %s5553_s6  ;;  %v5368_v57 = vpop.eup %5367 }
0x2b02   :  { %v4238_v48 = vadd.f32 1.0, %v5368_v57 }
0x2b04   :  { %5369 = vrcp.f32 %v4238_v48 }
0x2b05   :  { %4027 = vrot.lane.b32.xlu0 %v3916_v35, %s5553_s6 }
0x2b0e   :  { %v5370_v10 = vpop.eup %5369 }
0x2b41   :  { %v4130_v53 = vpop.permute.xlu0 %4129 }
0x2b42   :  { %v4132_v49 = vmul.f32 %v5366_v4, %v4130_v53 }
0x2b44   :  { %4134 = vrot.lane.b32.xlu1 %v4132_v49, %s5553_s6 }
0x2b63   :  { %v4248_v30 = vpop.permute.xlu0 %4247 }
0x2b64   :  { %v4250_v9 = vadd.f32 %v4248_v30, %v4244_v31 }
0x2b66   :  { %5371 = vtanh.f32 %v4250_v9 }
0x2b67   :  { %v2887_v51 = vpop.permute.xlu0 %2886 }
0x2b68   :  { %2889 = vst.msk [vmem:[%s6925_s16] sm:$0xc] %vm838_vm14, %v2887_v51 }
0x2b69   :  { %2890 = vst.msk [vmem:[%s6925_s16 + $0xa] sm:$0xc] %vm6944_vm1, %v2887_v51 }
0x2b6b   :  { %v3114_v33 = vpop.permute.xlu0 %3113 }
0x2b6c   :  { %3116 = vst.msk [vmem:[%s6925_s16] sm:$0x30] %vm6945_vm7, %v3114_v33 }
0x2b6d   :  { %3117 = vst.msk [vmem:[%s6925_s16 + $0x6] sm:$0x30] %vm6946_vm9, %v3114_v33 }
0x2b6f   :  { %v3341_v55 = vpop.permute.xlu0 %3340 }
0x2b70   :  { %v5372_v32 = vpop.eup %5371  ;;  %3343 = vst.msk [vmem:[%s6925_s16] sm:$0xc0] %vm6947_vm10, %v3341_v55 }
0x2b71   :  { %3344 = vst.msk [vmem:[%s6925_s16 + $0x2] sm:$0xc0] %vm6948_vm13, %v3341_v55  ;;  %v4252_v38 = vmul.f32 %v5372_v32, %v5370_v10 }
0x2b72   :  { %3573 = vst.msk [vmem:[%s6925_s16 + $0x8] sm:$0x3] %vm604_vm5, %v6685_v50  ;;  %vm6949_vm5 = vmmov %vm6945_vm7 }
0x2b73   :  { %3574 = vst.msk [vmem:[%s6925_s16 + $0x6] sm:$0x3] %vm606_vm6, %v6685_v50  ;;  %v3801_v16 = vpop.permute.xlu0 %3800  ;;  %vm6950_vm7 = vmmov %vm6946_vm9  ;;  %v4125_v50 = vrot.slane %v6744_v39, 6 }
0x2b74   :  { %3803 = vst.msk [vmem:[%s6925_s16 + $0x8] sm:$0xc] %vm838_vm14, %v3801_v16  ;;  %vm6951_vm6 = vmmov %vm6947_vm10 }
0x2b75   :  { %3804 = vst.msk [vmem:[%s6925_s16 + $0x2] sm:$0xc] %vm6944_vm1, %v3801_v16  ;;  %v4127_v24 = vmul.f32 %v5366_v4, %v4125_v50 }
0x2b77   :  { %v4028_v7 = vpop.permute.xlu0 %4027 }
0x2b78   :  { %4030 = vst.msk [vmem:[%s6925_s16 + $0x8] sm:$0x30] %vm6949_vm5, %v4028_v7 }
0x2b79   :  { %4031 = vst.msk [vmem:[%s6925_s16 - $0x2] sm:$0x30] %vm6950_vm7, %v4028_v7 }
0x2bb6   :  { %v4135_v42 = vpop.permute.xlu1 %4134 }
0x2bb7   :  { %v4137_v60 = vadd.f32 %v4135_v42, %v4127_v24 }
0x2bb9   :  { %5373 = vtanh.f32 %v4137_v60 }
0x2bc3   :  { %v5374_v28 = vpop.eup %5373 }
0x2bc4   :  { %4140 = vrot.lane.b32.xlu1 %v5374_v28, %s5552_s2 }
0x2bc8   :  { %2892 = vrot.lane.b32.xlu1 %v6602_v18, %s5552_s2 }
0x2bcc   :  { %3119 = vrot.lane.b32.xlu1 %v6634_v11, %s5552_s2 }
0x2bd0   :  { %3346 = vrot.lane.b32.xlu1 %v6664_v63, %s5552_s2 }
0x2bd4   :  { %3806 = vrot.lane.b32.xlu1 %v6724_v19, %s5552_s2 }
0x2bd8   :  { %4033 = vrot.lane.b32.xlu1 %v6750_v45, %s5552_s2 }
0x2bdc   :  { %4260 = vrot.lane.b32.xlu1 %v4252_v38, %s5552_s2 }
0x2c36   :  { %v4141_v39 = vpop.permute.xlu1 %4140 }
0x2c37   :  { %v4143_v46 = vmul.f32 %v5366_v4, %v4141_v39 }
0x2c39   :  { %4254 = vrot.lane.b32.xlu0 %v4143_v46, %s5553_s6 }
0x2c3a   :  { %v2893_v5 = vpop.permute.xlu1 %2892 }
0x2c3b   :  { %2895 = vst.msk [vmem:[%s6926_s17] sm:$0xc] %vm846_vm3, %v2893_v5 }
0x2c3c   :  { %2896 = vst.msk [vmem:[%s6926_s17 + $0xa] sm:$0xc] %vm848_vm2, %v2893_v5 }
0x2c3e   :  { %v3120_v18 = vpop.permute.xlu1 %3119 }
0x2c3f   :  { %3122 = vst.msk [vmem:[%s6926_s17] sm:$0x30] %vm1077_vm4, %v3120_v18 }
0x2c40   :  { %3123 = vst.msk [vmem:[%s6926_s17 + $0x6] sm:$0x30] %vm1079_vm15, %v3120_v18 }
0x2c42   :  { %v3347_v11 = vpop.permute.xlu1 %3346 }
0x2c43   :  { %3349 = vst.msk [vmem:[%s6926_s17] sm:$0xc0] %vm1308_vm0, %v3347_v11 }
0x2c44   :  { %3350 = vst.msk [vmem:[%s6926_s17 + $0x2] sm:$0xc0] %vm1310_vm8, %v3347_v11 }
0x2c45   :  { %3579 = vst.msk [vmem:[%s6926_s17 + $0x8] sm:$0x3] %vm612_vm11, %v6699_v26  ;;  %vm6952_vm11 = vmmov %vm6948_vm13 }
0x2c46   :  { %3580 = vst.msk [vmem:[%s6926_s17 + $0x6] sm:$0x3] %vm614_vm12, %v6699_v26  ;;  %v3807_v63 = vpop.permute.xlu1 %3806 }
0x2c47   :  { %3809 = vst.msk [vmem:[%s6926_s17 + $0x8] sm:$0xc] %vm846_vm3, %v3807_v63 }
0x2c48   :  { %3810 = vst.msk [vmem:[%s6926_s17 + $0x2] sm:$0xc] %vm848_vm2, %v3807_v63 }
0x2c4a   :  { %v4034_v19 = vpop.permute.xlu1 %4033 }
0x2c4b   :  { %4036 = vst.msk [vmem:[%s6926_s17 + $0x8] sm:$0x30] %vm1077_vm4, %v4034_v19 }
0x2c4c   :  { %4037 = vst.msk [vmem:[%s6926_s17 - $0x2] sm:$0x30] %vm1079_vm15, %v4034_v19 }
0x2c4e   :  { %v4261_v26 = vpop.permute.xlu1 %4260 }
0x2c4f   :  { %4263 = vst.msk [vmem:[%s6926_s17 + $0x8] sm:$0xc0] %vm1308_vm0, %v4261_v26 }
0x2c50   :  { %4264 = vst.msk [vmem:[%s6926_s17 - $0x6] sm:$0xc0] %vm1310_vm8, %v4261_v26 }
0x2cab   :  { %v4255_v25 = vpop.permute.xlu0 %4254 }
0x2cac   :  { %4257 = vst.msk [vmem:[%s6925_s16 + $0x8] sm:$0xc0] %vm6951_vm6, %v4255_v25 }
0x2cad   :  { %4258 = vst.msk [vmem:[%s6925_s16 - $0x6] sm:$0xc0] %vm6952_vm11, %v4255_v25 }
0x2cae   :  { %4273 = vsyncpa [#allocation3], 1 }
0x2caf   :  { %4274 = vsyncpa [#allocation5], 1 }
0x2cb0   :  { %4275 = vsyncpa [#allocation8], 1 }
0x2cb1   :  { %4276 = vsyncpa [#allocation11], 1 }

</bundles_post_ra>
